<compile_context>
chip_gen: v7x
topology: tpu7x:2x2x1
jax: 0.10.0
libtpu: 0.0.40
codegen_flags: <defaults>
</compile_context>

<pallas_src>
import jax
import jax.numpy as jnp
from jax.experimental import pallas as pl
from jax.experimental.pallas import tpu as pltpu

LANES = 128          # lane width; every feature dim is padded up to this
TB = 256             # batch tile; >=256 keeps the 256-wide MXU M-dim busy (v6e/v7x)
IN_FEATURES = 12
NUM_CLASSES = 5      # real width of the softmax output


def _dae_kernel(x_ref, noise_ref,
                w1, b1, w2, b2, w3, b3, w4, b4, w5, b5, w6, b6,
                w7a, w7b, b7, w8, b8, w9, b9,
                out_ref):
    """One batch tile: full encoder/decoder + MLP head. Weights stay in VMEM."""
    x = x_ref[...]                        # (TB, 128) f32, clean input (padded lanes are 0)
    noisy = x + 0.01 * noise_ref[...]     # DAE input corruption: train_x + 0.01 * N(0,1)

    def dense(h, w_ref, b_ref):
        # bf16 operands on the MXU, f32 accumulation; bias-add stays in f32 (VPU).
        y = jnp.dot(h.astype(jnp.bfloat16), w_ref[...],
                    preferred_element_type=jnp.float32)
        return y + b_ref[...]             # (1, 128) bias broadcasts over the tile

    relu = lambda v: jnp.maximum(v, 0.0)

    e1 = relu(dense(noisy, w1, b1))       # 12 -> 10
    e2 = relu(dense(e1, w2, b2))          # 10 -> 8
    e3 = relu(dense(e2, w3, b3))          # 8  -> 6
    d1 = relu(dense(e3, w4, b4))          # 6  -> 8
    d2 = relu(dense(d1 + e2, w5, b5))     # 8  -> 10   (residual add)
    d3 = dense(d2 + e1, w6, b6)           # 10 -> 12   (no activation)

    # MLP head.  torch.cat((d3, x), dim=1) @ W7  ==  d3 @ W7[:12] + x @ W7[12:]
    h1 = relu(
        jnp.dot(d3.astype(jnp.bfloat16), w7a[...], preferred_element_type=jnp.float32)
        + jnp.dot(x.astype(jnp.bfloat16), w7b[...], preferred_element_type=jnp.float32)
        + b7[...])
    # TODO(synk): nn.Dropout layers are treated as identity (inference/eval semantics).
    h2 = relu(dense(h1, w8, b8))          # 10 -> 8
    logits = dense(h2, w9, b9)            # 8  -> 5 (padded out to 128 lanes)

    # Softmax over the 5 real classes only: mask padded lanes before exp.
    col = jax.lax.broadcasted_iota(jnp.int32, logits.shape, 1)
    logits = jnp.where(col < NUM_CLASSES, logits, -1e30)
    m = jnp.max(logits, axis=-1, keepdims=True)
    p = jnp.exp(logits - m)
    denom = jnp.sum(p, axis=-1, keepdims=True)
    out_ref[...] = (p * pl.reciprocal(denom, approx=True)).astype(out_ref.dtype)


def _pad_w(w):
    fi, fo = w.shape
    return jnp.pad(w, ((0, LANES - fi), (0, LANES - fo))).astype(jnp.bfloat16)


def _pad_b(b):
    return jnp.pad(b, (0, LANES - b.shape[0])).reshape(1, LANES).astype(jnp.float32)


def improved_dae_forward(train_x, noise, params, *, tb=TB):
    """params: 9 (w, b) pairs, w in (in, out) layout, ordered linear1..linear6 then
       mlp Linear(24,10), Linear(10,8), Linear(8,5)."""
    B, F = train_x.shape
    assert F == IN_FEATURES
    b_pad = pl.cdiv(B, tb) * tb

    x_p = jnp.pad(train_x.astype(jnp.float32), ((0, b_pad - B), (0, LANES - F)))
    n_p = jnp.pad(noise.astype(jnp.float32), ((0, b_pad - B), (0, LANES - F)))

    (w1, b1), (w2, b2), (w3, b3), (w4, b4), (w5, b5), (w6, b6), \
        (w7, b7), (w8, b8), (w9, b9) = params
    # Split the first MLP weight so torch.cat((d3, x), 1) needs no in-kernel concat.
    w7a, w7b = w7[:IN_FEATURES], w7[IN_FEATURES:]

    flat = [
        _pad_w(w1), _pad_b(b1), _pad_w(w2), _pad_b(b2), _pad_w(w3), _pad_b(b3),
        _pad_w(w4), _pad_b(b4), _pad_w(w5), _pad_b(b5), _pad_w(w6), _pad_b(b6),
        _pad_w(w7a), _pad_w(w7b), _pad_b(b7),
        _pad_w(w8), _pad_b(b8), _pad_w(w9), _pad_b(b9),
    ]

    act_spec = pl.BlockSpec((tb, LANES), lambda i: (i, 0))        # tiled over batch
    w_spec = pl.BlockSpec((LANES, LANES), lambda i: (0, 0))       # VMEM-resident weight
    b_spec = pl.BlockSpec((1, LANES), lambda i: (0, 0))           # VMEM-resident bias
    in_specs = [act_spec, act_spec] + [
        w_spec if a.shape[0] == LANES else b_spec for a in flat
    ]

    out = pl.pallas_call(
        _dae_kernel,
        out_shape=jax.ShapeDtypeStruct((b_pad, LANES), jnp.float32),
        grid_spec=pltpu.PrefetchScalarGridSpec(
            num_scalar_prefetch=0,
            grid=(b_pad // tb,),
            in_specs=in_specs,
            out_specs=act_spec,
        ),
        compiler_params=pltpu.CompilerParams(
            dimension_semantics=("parallel",),   # batch tiles split across TCs (v7x megacore)
        ),
    )(x_p, n_p, *flat)
    return out[:B, :NUM_CLASSES]


def init_params(key):
    """Deterministic stand-in for the PyTorch init (reset_weight is never actually
    called in the original module); weights stored in (in, out) layout."""
    dims = [(12, 10), (10, 8), (8, 6), (6, 8), (8, 10), (10, 12),
            (24, 10), (10, 8), (8, 5)]
    keys = jax.random.split(key, 2 * len(dims))
    params = []
    for idx, (fi, fo) in enumerate(dims):
        w = jax.random.normal(keys[2 * idx], (fi, fo), jnp.float32) / jnp.sqrt(float(fi))
        b = jax.random.normal(keys[2 * idx + 1], (fo,), jnp.float32) * 0.1
        params.append((w, b))
    return params


def reference_forward(train_x, noise, params):
    """Pure-JAX (f32) reference mirroring the PyTorch forward (dropout = identity)."""
    (w1, b1), (w2, b2), (w3, b3), (w4, b4), (w5, b5), (w6, b6), \
        (w7, b7), (w8, b8), (w9, b9) = params
    inp = train_x + 0.01 * noise
    e1 = jax.nn.relu(inp @ w1 + b1)
    e2 = jax.nn.relu(e1 @ w2 + b2)
    e3 = jax.nn.relu(e2 @ w3 + b3)
    d1 = jax.nn.relu(e3 @ w4 + b4)
    d2 = jax.nn.relu((d1 + e2) @ w5 + b5)
    d3 = (d2 + e1) @ w6 + b6
    cat = jnp.concatenate([d3, train_x], axis=1)
    h1 = jax.nn.relu(cat @ w7 + b7)
    h2 = jax.nn.relu(h1 @ w8 + b8)
    return jax.nn.softmax(h2 @ w9 + b9, axis=-1)


if __name__ == "__main__":
    key = jax.random.PRNGKey(0)
    kx, kn, kp = jax.random.split(key, 3)
    B = 64
    train_x = jax.random.normal(kx, (B, IN_FEATURES), jnp.float32)
    # TODO(synk): the corruption noise could be generated in-kernel with
    # pltpu.prng_seed + pltpu.prng_random_bits to save one HBM read; generated
    # host-side here for determinism.
    noise = jax.random.normal(kn, (B, IN_FEATURES), jnp.float32)
    params = init_params(kp)

    out = improved_dae_forward(train_x, noise, params)
    out = jax.block_until_ready(out)
    assert out.shape == (B, NUM_CLASSES), out.shape

    ref = jax.block_until_ready(reference_forward(train_x, noise, params))
    assert jnp.allclose(out, ref, atol=5e-2, rtol=5e-2), (
        "mismatch: max abs err = %f" % float(jnp.max(jnp.abs(out - ref))))
    print("KERNEL_OK")
</pallas_src>

<mosaic_0001>
module attributes {stable_mosaic.version = 11 : i64} {
  func.func @_dae_kernel(%arg0: i32, %arg1: memref<256x128xf32, #tpu.memory_space<vmem>>, %arg2: memref<256x128xf32, #tpu.memory_space<vmem>>, %arg3: memref<128x128xbf16, #tpu.memory_space<vmem>>, %arg4: memref<1x128xf32, #tpu.memory_space<vmem>>, %arg5: memref<128x128xbf16, #tpu.memory_space<vmem>>, %arg6: memref<1x128xf32, #tpu.memory_space<vmem>>, %arg7: memref<128x128xbf16, #tpu.memory_space<vmem>>, %arg8: memref<1x128xf32, #tpu.memory_space<vmem>>, %arg9: memref<128x128xbf16, #tpu.memory_space<vmem>>, %arg10: memref<1x128xf32, #tpu.memory_space<vmem>>, %arg11: memref<128x128xbf16, #tpu.memory_space<vmem>>, %arg12: memref<1x128xf32, #tpu.memory_space<vmem>>, %arg13: memref<128x128xbf16, #tpu.memory_space<vmem>>, %arg14: memref<1x128xf32, #tpu.memory_space<vmem>>, %arg15: memref<128x128xbf16, #tpu.memory_space<vmem>>, %arg16: memref<128x128xbf16, #tpu.memory_space<vmem>>, %arg17: memref<1x128xf32, #tpu.memory_space<vmem>>, %arg18: memref<128x128xbf16, #tpu.memory_space<vmem>>, %arg19: memref<1x128xf32, #tpu.memory_space<vmem>>, %arg20: memref<128x128xbf16, #tpu.memory_space<vmem>>, %arg21: memref<1x128xf32, #tpu.memory_space<vmem>>, %arg22: memref<256x128xf32, #tpu.memory_space<vmem>>) attributes {dimension_semantics = [#tpu.dimension_semantics<parallel>], iteration_bounds = array<i64: 1>, scalar_prefetch = 0 : i64, scratch_operands = 0 : i64, tpu.core_type = #tpu.core_type<tc>, window_params = [{transform_indices = @transform_0, window_bounds = array<i64: 256, 128>}, {transform_indices = @transform_1, window_bounds = array<i64: 256, 128>}, {pipeline_mode = #tpu.pipeline_mode<synchronous>, transform_indices = @transform_2, window_bounds = array<i64: 128, 128>}, {pipeline_mode = #tpu.pipeline_mode<synchronous>, transform_indices = @transform_3, window_bounds = array<i64: 1, 128>}, {pipeline_mode = #tpu.pipeline_mode<synchronous>, transform_indices = @transform_4, window_bounds = array<i64: 128, 128>}, {pipeline_mode = #tpu.pipeline_mode<synchronous>, transform_indices = @transform_5, window_bounds = array<i64: 1, 128>}, {pipeline_mode = #tpu.pipeline_mode<synchronous>, transform_indices = @transform_6, window_bounds = array<i64: 128, 128>}, {pipeline_mode = #tpu.pipeline_mode<synchronous>, transform_indices = @transform_7, window_bounds = array<i64: 1, 128>}, {pipeline_mode = #tpu.pipeline_mode<synchronous>, transform_indices = @transform_8, window_bounds = array<i64: 128, 128>}, {pipeline_mode = #tpu.pipeline_mode<synchronous>, transform_indices = @transform_9, window_bounds = array<i64: 1, 128>}, {pipeline_mode = #tpu.pipeline_mode<synchronous>, transform_indices = @transform_10, window_bounds = array<i64: 128, 128>}, {pipeline_mode = #tpu.pipeline_mode<synchronous>, transform_indices = @transform_11, window_bounds = array<i64: 1, 128>}, {pipeline_mode = #tpu.pipeline_mode<synchronous>, transform_indices = @transform_12, window_bounds = array<i64: 128, 128>}, {pipeline_mode = #tpu.pipeline_mode<synchronous>, transform_indices = @transform_13, window_bounds = array<i64: 1, 128>}, {pipeline_mode = #tpu.pipeline_mode<synchronous>, transform_indices = @transform_14, window_bounds = array<i64: 128, 128>}, {pipeline_mode = #tpu.pipeline_mode<synchronous>, transform_indices = @transform_15, window_bounds = array<i64: 128, 128>}, {pipeline_mode = #tpu.pipeline_mode<synchronous>, transform_indices = @transform_16, window_bounds = array<i64: 1, 128>}, {pipeline_mode = #tpu.pipeline_mode<synchronous>, transform_indices = @transform_17, window_bounds = array<i64: 128, 128>}, {pipeline_mode = #tpu.pipeline_mode<synchronous>, transform_indices = @transform_18, window_bounds = array<i64: 1, 128>}, {pipeline_mode = #tpu.pipeline_mode<synchronous>, transform_indices = @transform_19, window_bounds = array<i64: 128, 128>}, {pipeline_mode = #tpu.pipeline_mode<synchronous>, transform_indices = @transform_20, window_bounds = array<i64: 1, 128>}, {transform_indices = @transform_21, window_bounds = array<i64: 256, 128>}]} {
    %c0 = arith.constant 0 : index
    %c0_0 = arith.constant 0 : index
    %0 = vector.load %arg1[%c0, %c0_0] : memref<256x128xf32, #tpu.memory_space<vmem>>, vector<256x128xf32>
    %c0_1 = arith.constant 0 : index
    %c0_2 = arith.constant 0 : index
    %1 = vector.load %arg2[%c0_1, %c0_2] : memref<256x128xf32, #tpu.memory_space<vmem>>, vector<256x128xf32>
    %cst = arith.constant 0.00999999977 : f32
    %2 = vector.broadcast %cst : f32 to vector<256x128xf32>
    %3 = arith.mulf %2, %1 : vector<256x128xf32>
    %4 = arith.addf %0, %3 : vector<256x128xf32>
    %5 = arith.truncf %4 : vector<256x128xf32> to vector<256x128xbf16>
    %c0_3 = arith.constant 0 : index
    %c0_4 = arith.constant 0 : index
    %6 = vector.load %arg3[%c0_3, %c0_4] : memref<128x128xbf16, #tpu.memory_space<vmem>>, vector<128x128xbf16>
    %cst_5 = arith.constant dense<0.000000e+00> : vector<256x128xf32>
    %7 = tpu.matmul %5, %6, %cst_5 {dimension_numbers = #tpu.dot_dimension_numbers<[1], [0], [0], [1], [0, 0, 1, 1], [], []>} : vector<256x128xbf16>, vector<128x128xbf16>, vector<256x128xf32> -> vector<256x128xf32>
    %c0_6 = arith.constant 0 : index
    %c0_7 = arith.constant 0 : index
    %8 = vector.load %arg4[%c0_6, %c0_7] : memref<1x128xf32, #tpu.memory_space<vmem>>, vector<1x128xf32>
    %9 = vector.broadcast %8 : vector<1x128xf32> to vector<256x128xf32>
    %10 = arith.addf %7, %9 : vector<256x128xf32>
    %cst_8 = arith.constant 0.000000e+00 : f32
    %11 = vector.broadcast %cst_8 : f32 to vector<256x128xf32>
    %12 = arith.maximumf %10, %11 : vector<256x128xf32>
    %13 = arith.truncf %12 : vector<256x128xf32> to vector<256x128xbf16>
    %c0_9 = arith.constant 0 : index
    %c0_10 = arith.constant 0 : index
    %14 = vector.load %arg5[%c0_9, %c0_10] : memref<128x128xbf16, #tpu.memory_space<vmem>>, vector<128x128xbf16>
    %cst_11 = arith.constant dense<0.000000e+00> : vector<256x128xf32>
    %15 = tpu.matmul %13, %14, %cst_11 {dimension_numbers = #tpu.dot_dimension_numbers<[1], [0], [0], [1], [0, 0, 1, 1], [], []>} : vector<256x128xbf16>, vector<128x128xbf16>, vector<256x128xf32> -> vector<256x128xf32>
    %c0_12 = arith.constant 0 : index
    %c0_13 = arith.constant 0 : index
    %16 = vector.load %arg6[%c0_12, %c0_13] : memref<1x128xf32, #tpu.memory_space<vmem>>, vector<1x128xf32>
    %17 = vector.broadcast %16 : vector<1x128xf32> to vector<256x128xf32>
    %18 = arith.addf %15, %17 : vector<256x128xf32>
    %cst_14 = arith.constant 0.000000e+00 : f32
    %19 = vector.broadcast %cst_14 : f32 to vector<256x128xf32>
    %20 = arith.maximumf %18, %19 : vector<256x128xf32>
    %21 = arith.truncf %20 : vector<256x128xf32> to vector<256x128xbf16>
    %c0_15 = arith.constant 0 : index
    %c0_16 = arith.constant 0 : index
    %22 = vector.load %arg7[%c0_15, %c0_16] : memref<128x128xbf16, #tpu.memory_space<vmem>>, vector<128x128xbf16>
    %cst_17 = arith.constant dense<0.000000e+00> : vector<256x128xf32>
    %23 = tpu.matmul %21, %22, %cst_17 {dimension_numbers = #tpu.dot_dimension_numbers<[1], [0], [0], [1], [0, 0, 1, 1], [], []>} : vector<256x128xbf16>, vector<128x128xbf16>, vector<256x128xf32> -> vector<256x128xf32>
    %c0_18 = arith.constant 0 : index
    %c0_19 = arith.constant 0 : index
    %24 = vector.load %arg8[%c0_18, %c0_19] : memref<1x128xf32, #tpu.memory_space<vmem>>, vector<1x128xf32>
    %25 = vector.broadcast %24 : vector<1x128xf32> to vector<256x128xf32>
    %26 = arith.addf %23, %25 : vector<256x128xf32>
    %cst_20 = arith.constant 0.000000e+00 : f32
    %27 = vector.broadcast %cst_20 : f32 to vector<256x128xf32>
    %28 = arith.maximumf %26, %27 : vector<256x128xf32>
    %29 = arith.truncf %28 : vector<256x128xf32> to vector<256x128xbf16>
    %c0_21 = arith.constant 0 : index
    %c0_22 = arith.constant 0 : index
    %30 = vector.load %arg9[%c0_21, %c0_22] : memref<128x128xbf16, #tpu.memory_space<vmem>>, vector<128x128xbf16>
    %cst_23 = arith.constant dense<0.000000e+00> : vector<256x128xf32>
    %31 = tpu.matmul %29, %30, %cst_23 {dimension_numbers = #tpu.dot_dimension_numbers<[1], [0], [0], [1], [0, 0, 1, 1], [], []>} : vector<256x128xbf16>, vector<128x128xbf16>, vector<256x128xf32> -> vector<256x128xf32>
    %c0_24 = arith.constant 0 : index
    %c0_25 = arith.constant 0 : index
    %32 = vector.load %arg10[%c0_24, %c0_25] : memref<1x128xf32, #tpu.memory_space<vmem>>, vector<1x128xf32>
    %33 = vector.broadcast %32 : vector<1x128xf32> to vector<256x128xf32>
    %34 = arith.addf %31, %33 : vector<256x128xf32>
    %cst_26 = arith.constant 0.000000e+00 : f32
    %35 = vector.broadcast %cst_26 : f32 to vector<256x128xf32>
    %36 = arith.maximumf %34, %35 : vector<256x128xf32>
    %37 = arith.addf %36, %20 : vector<256x128xf32>
    %38 = arith.truncf %37 : vector<256x128xf32> to vector<256x128xbf16>
    %c0_27 = arith.constant 0 : index
    %c0_28 = arith.constant 0 : index
    %39 = vector.load %arg11[%c0_27, %c0_28] : memref<128x128xbf16, #tpu.memory_space<vmem>>, vector<128x128xbf16>
    %cst_29 = arith.constant dense<0.000000e+00> : vector<256x128xf32>
    %40 = tpu.matmul %38, %39, %cst_29 {dimension_numbers = #tpu.dot_dimension_numbers<[1], [0], [0], [1], [0, 0, 1, 1], [], []>} : vector<256x128xbf16>, vector<128x128xbf16>, vector<256x128xf32> -> vector<256x128xf32>
    %c0_30 = arith.constant 0 : index
    %c0_31 = arith.constant 0 : index
    %41 = vector.load %arg12[%c0_30, %c0_31] : memref<1x128xf32, #tpu.memory_space<vmem>>, vector<1x128xf32>
    %42 = vector.broadcast %41 : vector<1x128xf32> to vector<256x128xf32>
    %43 = arith.addf %40, %42 : vector<256x128xf32>
    %cst_32 = arith.constant 0.000000e+00 : f32
    %44 = vector.broadcast %cst_32 : f32 to vector<256x128xf32>
    %45 = arith.maximumf %43, %44 : vector<256x128xf32>
    %46 = arith.addf %45, %12 : vector<256x128xf32>
    %47 = arith.truncf %46 : vector<256x128xf32> to vector<256x128xbf16>
    %c0_33 = arith.constant 0 : index
    %c0_34 = arith.constant 0 : index
    %48 = vector.load %arg13[%c0_33, %c0_34] : memref<128x128xbf16, #tpu.memory_space<vmem>>, vector<128x128xbf16>
    %cst_35 = arith.constant dense<0.000000e+00> : vector<256x128xf32>
    %49 = tpu.matmul %47, %48, %cst_35 {dimension_numbers = #tpu.dot_dimension_numbers<[1], [0], [0], [1], [0, 0, 1, 1], [], []>} : vector<256x128xbf16>, vector<128x128xbf16>, vector<256x128xf32> -> vector<256x128xf32>
    %c0_36 = arith.constant 0 : index
    %c0_37 = arith.constant 0 : index
    %50 = vector.load %arg14[%c0_36, %c0_37] : memref<1x128xf32, #tpu.memory_space<vmem>>, vector<1x128xf32>
    %51 = vector.broadcast %50 : vector<1x128xf32> to vector<256x128xf32>
    %52 = arith.addf %49, %51 : vector<256x128xf32>
    %53 = arith.truncf %52 : vector<256x128xf32> to vector<256x128xbf16>
    %c0_38 = arith.constant 0 : index
    %c0_39 = arith.constant 0 : index
    %54 = vector.load %arg15[%c0_38, %c0_39] : memref<128x128xbf16, #tpu.memory_space<vmem>>, vector<128x128xbf16>
    %cst_40 = arith.constant dense<0.000000e+00> : vector<256x128xf32>
    %55 = tpu.matmul %53, %54, %cst_40 {dimension_numbers = #tpu.dot_dimension_numbers<[1], [0], [0], [1], [0, 0, 1, 1], [], []>} : vector<256x128xbf16>, vector<128x128xbf16>, vector<256x128xf32> -> vector<256x128xf32>
    %56 = arith.truncf %0 : vector<256x128xf32> to vector<256x128xbf16>
    %c0_41 = arith.constant 0 : index
    %c0_42 = arith.constant 0 : index
    %57 = vector.load %arg16[%c0_41, %c0_42] : memref<128x128xbf16, #tpu.memory_space<vmem>>, vector<128x128xbf16>
    %cst_43 = arith.constant dense<0.000000e+00> : vector<256x128xf32>
    %58 = tpu.matmul %56, %57, %cst_43 {dimension_numbers = #tpu.dot_dimension_numbers<[1], [0], [0], [1], [0, 0, 1, 1], [], []>} : vector<256x128xbf16>, vector<128x128xbf16>, vector<256x128xf32> -> vector<256x128xf32>
    %59 = arith.addf %55, %58 : vector<256x128xf32>
    %c0_44 = arith.constant 0 : index
    %c0_45 = arith.constant 0 : index
    %60 = vector.load %arg17[%c0_44, %c0_45] : memref<1x128xf32, #tpu.memory_space<vmem>>, vector<1x128xf32>
    %61 = vector.broadcast %60 : vector<1x128xf32> to vector<256x128xf32>
    %62 = arith.addf %59, %61 : vector<256x128xf32>
    %cst_46 = arith.constant 0.000000e+00 : f32
    %63 = vector.broadcast %cst_46 : f32 to vector<256x128xf32>
    %64 = arith.maximumf %62, %63 : vector<256x128xf32>
    %65 = arith.truncf %64 : vector<256x128xf32> to vector<256x128xbf16>
    %c0_47 = arith.constant 0 : index
    %c0_48 = arith.constant 0 : index
    %66 = vector.load %arg18[%c0_47, %c0_48] : memref<128x128xbf16, #tpu.memory_space<vmem>>, vector<128x128xbf16>
    %cst_49 = arith.constant dense<0.000000e+00> : vector<256x128xf32>
    %67 = tpu.matmul %65, %66, %cst_49 {dimension_numbers = #tpu.dot_dimension_numbers<[1], [0], [0], [1], [0, 0, 1, 1], [], []>} : vector<256x128xbf16>, vector<128x128xbf16>, vector<256x128xf32> -> vector<256x128xf32>
    %c0_50 = arith.constant 0 : index
    %c0_51 = arith.constant 0 : index
    %68 = vector.load %arg19[%c0_50, %c0_51] : memref<1x128xf32, #tpu.memory_space<vmem>>, vector<1x128xf32>
    %69 = vector.broadcast %68 : vector<1x128xf32> to vector<256x128xf32>
    %70 = arith.addf %67, %69 : vector<256x128xf32>
    %cst_52 = arith.constant 0.000000e+00 : f32
    %71 = vector.broadcast %cst_52 : f32 to vector<256x128xf32>
    %72 = arith.maximumf %70, %71 : vector<256x128xf32>
    %73 = arith.truncf %72 : vector<256x128xf32> to vector<256x128xbf16>
    %c0_53 = arith.constant 0 : index
    %c0_54 = arith.constant 0 : index
    %74 = vector.load %arg20[%c0_53, %c0_54] : memref<128x128xbf16, #tpu.memory_space<vmem>>, vector<128x128xbf16>
    %cst_55 = arith.constant dense<0.000000e+00> : vector<256x128xf32>
    %75 = tpu.matmul %73, %74, %cst_55 {dimension_numbers = #tpu.dot_dimension_numbers<[1], [0], [0], [1], [0, 0, 1, 1], [], []>} : vector<256x128xbf16>, vector<128x128xbf16>, vector<256x128xf32> -> vector<256x128xf32>
    %c0_56 = arith.constant 0 : index
    %c0_57 = arith.constant 0 : index
    %76 = vector.load %arg21[%c0_56, %c0_57] : memref<1x128xf32, #tpu.memory_space<vmem>>, vector<1x128xf32>
    %77 = vector.broadcast %76 : vector<1x128xf32> to vector<256x128xf32>
    %78 = arith.addf %75, %77 : vector<256x128xf32>
    %79 = tpu.iota {dimensions = array<i32: 1>} : vector<256x128xi32>
    %c5_i32 = arith.constant 5 : i32
    %80 = vector.broadcast %c5_i32 : i32 to vector<256x128xi32>
    %81 = arith.cmpi slt, %79, %80 : vector<256x128xi32>
    %cst_58 = arith.constant -1.000000e+30 : f32
    %82 = vector.broadcast %cst_58 : f32 to vector<256x128xf32>
    %83 = arith.select %81, %78, %82 : vector<256x128xi1>, vector<256x128xf32>
    %cst_59 = arith.constant dense<0xFF800000> : vector<256xf32>
    %84 = vector.multi_reduction <maximumf>, %83, %cst_59 [1] : vector<256x128xf32> to vector<256xf32>
    %85 = vector.shape_cast %84 : vector<256xf32> to vector<256x1xf32>
    %86 = vector.broadcast %85 : vector<256x1xf32> to vector<256x128xf32>
    %87 = arith.subf %83, %86 : vector<256x128xf32>
    %88 = math.exp %87 : vector<256x128xf32>
    %cst_60 = arith.constant dense<0.000000e+00> : vector<256xf32>
    %89 = vector.multi_reduction <add>, %88, %cst_60 [1] : vector<256x128xf32> to vector<256xf32>
    %90 = vector.shape_cast %89 : vector<256xf32> to vector<256x1xf32>
    %91 = tpu.reciprocal %90 {approx = true} : vector<256x1xf32> -> vector<256x1xf32>
    %92 = vector.broadcast %91 : vector<256x1xf32> to vector<256x128xf32>
    %93 = arith.mulf %88, %92 : vector<256x128xf32>
    %c0_61 = arith.constant 0 : index
    %c0_62 = arith.constant 0 : index
    %94 = vector.load %arg22[%c0_61, %c0_62] : memref<256x128xf32, #tpu.memory_space<vmem>>, vector<256x128xf32>
    tpu.vector_store %arg22[%c0_61, %c0_62], %93 {strides = array<i32>} : memref<256x128xf32, #tpu.memory_space<vmem>>, vector<256x128xf32>,
    return
  }
  func.func @transform_0(%arg0: i32) -> (i32, i32) {
    %c0_i32 = arith.constant 0 : i32
    %c0_i32_0 = arith.constant 0 : i32
    return %arg0, %c0_i32 : i32, i32
  }
  func.func @transform_1(%arg0: i32) -> (i32, i32) {
    %c0_i32 = arith.constant 0 : i32
    %c0_i32_0 = arith.constant 0 : i32
    return %arg0, %c0_i32 : i32, i32
  }
  func.func @transform_2(%arg0: i32) -> (i32, i32) {
    %c0_i32 = arith.constant 0 : i32
    %c0_i32_0 = arith.constant 0 : i32
    %c0_i32_1 = arith.constant 0 : i32
    return %c0_i32, %c0_i32_0 : i32, i32
  }
  func.func @transform_3(%arg0: i32) -> (i32, i32) {
    %c0_i32 = arith.constant 0 : i32
    %c0_i32_0 = arith.constant 0 : i32
    %c0_i32_1 = arith.constant 0 : i32
    return %c0_i32, %c0_i32_0 : i32, i32
  }
  func.func @transform_4(%arg0: i32) -> (i32, i32) {
    %c0_i32 = arith.constant 0 : i32
    %c0_i32_0 = arith.constant 0 : i32
    %c0_i32_1 = arith.constant 0 : i32
    return %c0_i32, %c0_i32_0 : i32, i32
  }
  func.func @transform_5(%arg0: i32) -> (i32, i32) {
    %c0_i32 = arith.constant 0 : i32
    %c0_i32_0 = arith.constant 0 : i32
    %c0_i32_1 = arith.constant 0 : i32
    return %c0_i32, %c0_i32_0 : i32, i32
  }
  func.func @transform_6(%arg0: i32) -> (i32, i32) {
    %c0_i32 = arith.constant 0 : i32
    %c0_i32_0 = arith.constant 0 : i32
    %c0_i32_1 = arith.constant 0 : i32
    return %c0_i32, %c0_i32_0 : i32, i32
  }
  func.func @transform_7(%arg0: i32) -> (i32, i32) {
    %c0_i32 = arith.constant 0 : i32
    %c0_i32_0 = arith.constant 0 : i32
    %c0_i32_1 = arith.constant 0 : i32
    return %c0_i32, %c0_i32_0 : i32, i32
  }
  func.func @transform_8(%arg0: i32) -> (i32, i32) {
    %c0_i32 = arith.constant 0 : i32
    %c0_i32_0 = arith.constant 0 : i32
    %c0_i32_1 = arith.constant 0 : i32
    return %c0_i32, %c0_i32_0 : i32, i32
  }
  func.func @transform_9(%arg0: i32) -> (i32, i32) {
    %c0_i32 = arith.constant 0 : i32
    %c0_i32_0 = arith.constant 0 : i32
    %c0_i32_1 = arith.constant 0 : i32
    return %c0_i32, %c0_i32_0 : i32, i32
  }
  func.func @transform_10(%arg0: i32) -> (i32, i32) {
    %c0_i32 = arith.constant 0 : i32
    %c0_i32_0 = arith.constant 0 : i32
    %c0_i32_1 = arith.constant 0 : i32
    return %c0_i32, %c0_i32_0 : i32, i32
  }
  func.func @transform_11(%arg0: i32) -> (i32, i32) {
    %c0_i32 = arith.constant 0 : i32
    %c0_i32_0 = arith.constant 0 : i32
    %c0_i32_1 = arith.constant 0 : i32
    return %c0_i32, %c0_i32_0 : i32, i32
  }
  func.func @transform_12(%arg0: i32) -> (i32, i32) {
    %c0_i32 = arith.constant 0 : i32
    %c0_i32_0 = arith.constant 0 : i32
    %c0_i32_1 = arith.constant 0 : i32
    return %c0_i32, %c0_i32_0 : i32, i32
  }
  func.func @transform_13(%arg0: i32) -> (i32, i32) {
    %c0_i32 = arith.constant 0 : i32
    %c0_i32_0 = arith.constant 0 : i32
    %c0_i32_1 = arith.constant 0 : i32
    return %c0_i32, %c0_i32_0 : i32, i32
  }
  func.func @transform_14(%arg0: i32) -> (i32, i32) {
    %c0_i32 = arith.constant 0 : i32
    %c0_i32_0 = arith.constant 0 : i32
    %c0_i32_1 = arith.constant 0 : i32
    return %c0_i32, %c0_i32_0 : i32, i32
  }
  func.func @transform_15(%arg0: i32) -> (i32, i32) {
    %c0_i32 = arith.constant 0 : i32
    %c0_i32_0 = arith.constant 0 : i32
    %c0_i32_1 = arith.constant 0 : i32
    return %c0_i32, %c0_i32_0 : i32, i32
  }
  func.func @transform_16(%arg0: i32) -> (i32, i32) {
    %c0_i32 = arith.constant 0 : i32
    %c0_i32_0 = arith.constant 0 : i32
    %c0_i32_1 = arith.constant 0 : i32
    return %c0_i32, %c0_i32_0 : i32, i32
  }
  func.func @transform_17(%arg0: i32) -> (i32, i32) {
    %c0_i32 = arith.constant 0 : i32
    %c0_i32_0 = arith.constant 0 : i32
    %c0_i32_1 = arith.constant 0 : i32
    return %c0_i32, %c0_i32_0 : i32, i32
  }
  func.func @transform_18(%arg0: i32) -> (i32, i32) {
    %c0_i32 = arith.constant 0 : i32
    %c0_i32_0 = arith.constant 0 : i32
    %c0_i32_1 = arith.constant 0 : i32
    return %c0_i32, %c0_i32_0 : i32, i32
  }
  func.func @transform_19(%arg0: i32) -> (i32, i32) {
    %c0_i32 = arith.constant 0 : i32
    %c0_i32_0 = arith.constant 0 : i32
    %c0_i32_1 = arith.constant 0 : i32
    return %c0_i32, %c0_i32_0 : i32, i32
  }
  func.func @transform_20(%arg0: i32) -> (i32, i32) {
    %c0_i32 = arith.constant 0 : i32
    %c0_i32_0 = arith.constant 0 : i32
    %c0_i32_1 = arith.constant 0 : i32
    return %c0_i32, %c0_i32_0 : i32, i32
  }
  func.func @transform_21(%arg0: i32) -> (i32, i32) {
    %c0_i32 = arith.constant 0 : i32
    %c0_i32_0 = arith.constant 0 : i32
    return %arg0, %c0_i32 : i32, i32
  }
}

</mosaic_0001>

<bundles_post_ra>
// kernel: tpu_custom_call.1
= control target key start
LH: loop header
LB: loop body
LE: loop exit
PB: predicated region body
PF: predicated region fallthrough
CT: control target
= control target key end

     0   :  { %s6739_s0 = inlined_call_operand.hbm [shape: f32[256,128], index: 0, kind: input, shape index: {}]   ;;  %s6740_s1 = inlined_call_operand.hbm [shape: f32[256,128], index: 1, kind: input, shape index: {}]   ;;  %s6741_s2 = inlined_call_operand.hbm [shape: bf16[128,128], index: 2, kind: input, shape index: {}]   ;;  %s6742_s3 = inlined_call_operand.hbm [shape: f32[1,128], index: 3, kind: input, shape index: {}]   ;;  %s6743_s4 = inlined_call_operand.hbm [shape: bf16[128,128], index: 4, kind: input, shape index: {}]   ;;  %s6744_s5 = inlined_call_operand.hbm [shape: f32[1,128], index: 5, kind: input, shape index: {}]   ;;  %s6745_s6 = inlined_call_operand.hbm [shape: bf16[128,128], index: 6, kind: input, shape index: {}]   ;;  %s6746_s7 = inlined_call_operand.hbm [shape: f32[1,128], index: 7, kind: input, shape index: {}]   ;;  %s6747_s8 = inlined_call_operand.hbm [shape: bf16[128,128], index: 8, kind: input, shape index: {}]   ;;  %s6748_s9 = inlined_call_operand.hbm [shape: f32[1,128], index: 9, kind: input, shape index: {}]   ;;  %s6749_s10 = inlined_call_operand.hbm [shape: bf16[128,128], index: 10, kind: input, shape index: {}]   ;;  %s6750_s11 = inlined_call_operand.hbm [shape: f32[1,128], index: 11, kind: input, shape index: {}]   ;;  %s6751_s12 = inlined_call_operand.hbm [shape: bf16[128,128], index: 12, kind: input, shape index: {}]   ;;  %s6752_s13 = inlined_call_operand.hbm [shape: f32[1,128], index: 13, kind: input, shape index: {}]   ;;  %s6753_s14 = inlined_call_operand.hbm [shape: bf16[128,128], index: 14, kind: input, shape index: {}]   ;;  %s6754_s15 = inlined_call_operand.hbm [shape: bf16[128,128], index: 15, kind: input, shape index: {}]   ;;  %s6755_s16 = inlined_call_operand.hbm [shape: f32[1,128], index: 16, kind: input, shape index: {}]   ;;  %s6756_s17 = inlined_call_operand.vmem [shape: bf16[128,128], index: 17, kind: input, shape index: {}]   ;;  %s6757_s18 = inlined_call_operand.vmem [shape: f32[1,128], index: 18, kind: input, shape index: {}]   ;;  %s6758_s19 = inlined_call_operand.hbm [shape: bf16[128,128], index: 19, kind: input, shape index: {}]   ;;  %s6759_s20 = inlined_call_operand.vmem [shape: f32[1,128], index: 20, kind: input, shape index: {}]   ;;  %s6760_s21 = inlined_call_operand.hbm [shape: f32[256,128], index: 21, kind: output, shape index: {}]  }
   0x1   :  { %6858 = sst [smem:[#allocation65_spill]] %s6739_s0 }
   0x2   :  { %6859 = sst [smem:[#allocation66_spill]] %s6740_s1 }
   0x3   :  { %6860 = sst [smem:[#allocation67_spill]] %s6741_s2 }
   0x4   :  { %6861 = sst [smem:[#allocation68_spill]] %s6742_s3 }
   0x5   :  { %6862 = sst [smem:[#allocation69_spill]] %s6743_s4 }
   0x6   :  { %6863 = sst [smem:[#allocation70_spill]] %s6744_s5 }
   0x7   :  { %6864 = sst [smem:[#allocation71_spill]] %s6760_s21 }
   0x8   :  { %26 = vsyncpa [#allocation3], 0 }
   0x9   :  { %27 = vsyncpa [#allocation6], 0 }
   0xa   :  { %28 = vsyncpa [#allocation9], 0 }
   0xb   :  { %29 = vsyncpa [#allocation12], 0 }
   0xc   :  { %30 = vsyncpa [#allocation15], 0 }
   0xd   :  { %31 = vsyncpa [#allocation18], 0 }
   0xe   :  { %32 = vsyncpa [#allocation21], 0 }
   0xf   :  { %33 = vsyncpa [#allocation24], 0 }
  0x10   :  { %34 = vsyncpa [#allocation27], 0 }
  0x11   :  { %35 = vsyncpa [#allocation30], 0 }
  0x12   :  { %36 = vsyncpa [#allocation4], 0  ;;  %s5144_s2 = smov [#allocation5]   ;;  %s5145_s26 = smov [#allocation8]  }
  0x13   :  { %s54_s25 = sshll.u32 %s5144_s2, 4  ;;  %s79_s27 = sshll.u32 %s5145_s26, 4  ;;  %s55_s25 = int_to_ptr.vmem [resolvable:$true] %s54_s25  ;;  %s5277_s27 = int_to_ptr.vmem [resolvable:$true] %s79_s27 }
  0x14   :  { %s6865_s29 = sld [smem:[#allocation66_spill]] }
  0x1a   :  { %s4704_s0 = scalar_lea.hbm %s6865_s29, 4096 }
  0x1b   :  { %p4705_p0 = scmp.ne.s32.totalorder %s6865_s29, %s4704_s0  ;;  %p4708_p1 = scmp.lt.u32.totalorder %s4704_s0, %s6865_s29 }
  0x1d   :  { %p4710_p2 = pnand %p4708_p1, %p4705_p0 }
  0x1f   :  { %4713 = shalt.err (!%p4710_p2)
}
  0x20   :  { %s4714_s23 = scalar_lea.vmem %s55_s25, 4096  ;;  %p4719_p4 = scmp.lt.s32.totalorder %s55_s25, %s55_s25 }
  0x21   :  { %p4715_p3 = scmp.ne.s32.totalorder %s55_s25, %s4714_s23  ;;  %p4720_p5 = scmp.lt.s32.totalorder %s4714_s23, %s4714_s23 }
  0x23   :  { %p4721_p6 = por %p4720_p5, %p4719_p4 }
  0x25   :  { %p4722_p7 = pnand %p4721_p6, %p4715_p3 }
  0x27   :  { %4725 = shalt.err (!%p4722_p7)
}
  0x28   :  { %s6767_s1 = smov 128   ;;  %s6769_s24 = smov 8  }
  0x29   :  { %60 = dma.hbm_to_vmem [thread:$0]  %s6865_s29, 4096, %s55_s25, [#allocation6], %s6767_s1, %s6767_s1, %s6769_s24  }
  0x2a   :  { %s6866_s0 = sld [smem:[#allocation68_spill]] }
  0x30   :  { %s4726_s4 = scalar_lea.hbm %s6866_s0, 16 }
  0x31   :  { %p4727_p8 = scmp.ne.s32.totalorder %s6866_s0, %s4726_s4  ;;  %p4730_p9 = scmp.lt.u32.totalorder %s4726_s4, %s6866_s0 }
  0x33   :  { %p4732_p10 = pnand %p4730_p9, %p4727_p8 }
  0x35   :  { %4735 = shalt.err (!%p4732_p10)
}
  0x36   :  { %s4736_s2 = scalar_lea.vmem %s5277_s27, 16  ;;  %s4740_s25 = scalar_lea.vmem %s5277_s27, 32 }
  0x37   :  { %p4737_p11 = scmp.ne.s32.totalorder %s5277_s27, %s4736_s2  ;;  %p4741_p12 = scmp.lt.s32.totalorder %s5277_s27, %s5277_s27 }
  0x38   :  { %p4742_p13 = scmp.lt.s32.totalorder %s4740_s25, %s4736_s2 }
  0x3a   :  { %p4743_p0 = por %p4742_p13, %p4741_p12 }
  0x3c   :  { %p4744_p1 = pnand %p4743_p0, %p4737_p11 }
  0x3e   :  { %4747 = shalt.err (!%p4744_p1)
}
  0x3f   :  { %82 = dma.hbm_to_vmem [thread:$0]  %s6866_s0, 16, %s5277_s27, [#allocation9]  }
  0x40   :  { %s5148_s3 = smov [#allocation11]   ;;  %s5149_s4 = smov [#allocation14]  }
  0x41   :  { %s101_s28 = sshll.u32 %s5148_s3, 4  ;;  %s123_s30 = sshll.u32 %s5149_s4, 4  ;;  %s102_s28 = int_to_ptr.vmem [resolvable:$true] %s101_s28  ;;  %s124_s30 = int_to_ptr.vmem [resolvable:$true] %s123_s30 }
  0x42   :  { %s6867_s23 = sld [smem:[#allocation70_spill]] }
  0x48   :  { %s4748_s1 = scalar_lea.hbm %s6867_s23, 16 }
  0x49   :  { %p4749_p2 = scmp.ne.s32.totalorder %s6867_s23, %s4748_s1  ;;  %p4752_p3 = scmp.lt.u32.totalorder %s4748_s1, %s6867_s23 }
  0x4b   :  { %p4754_p4 = pnand %p4752_p3, %p4749_p2 }
  0x4d   :  { %4757 = shalt.err (!%p4754_p4)
}
  0x4e   :  { %s4758_s27 = scalar_lea.vmem %s102_s28, 16  ;;  %s4762_s0 = scalar_lea.vmem %s102_s28, 32 }
  0x4f   :  { %p4759_p5 = scmp.ne.s32.totalorder %s102_s28, %s4758_s27  ;;  %p4763_p6 = scmp.lt.s32.totalorder %s102_s28, %s102_s28 }
  0x50   :  { %p4764_p7 = scmp.lt.s32.totalorder %s4762_s0, %s4758_s27 }
  0x52   :  { %p4765_p8 = por %p4764_p7, %p4763_p6 }
  0x54   :  { %p4766_p9 = pnand %p4765_p8, %p4759_p5 }
  0x56   :  { %4769 = shalt.err (!%p4766_p9)
}
  0x57   :  { %104 = dma.hbm_to_vmem [thread:$0]  %s6867_s23, 16, %s102_s28, [#allocation12]  }
  0x58   :  { %s4770_s4 = scalar_lea.hbm %s6746_s7, 16 }
  0x59   :  { %p4771_p10 = scmp.ne.s32.totalorder %s6746_s7, %s4770_s4  ;;  %p4774_p11 = scmp.lt.u32.totalorder %s4770_s4, %s6746_s7 }
  0x5b   :  { %p4776_p12 = pnand %p4774_p11, %p4771_p10 }
  0x5d   :  { %4779 = shalt.err (!%p4776_p12)
}
  0x5e   :  { %s4780_s2 = scalar_lea.vmem %s124_s30, 16  ;;  %s4784_s25 = scalar_lea.vmem %s124_s30, 32 }
  0x5f   :  { %p4781_p13 = scmp.ne.s32.totalorder %s124_s30, %s4780_s2  ;;  %p4785_p0 = scmp.lt.s32.totalorder %s124_s30, %s124_s30 }
  0x60   :  { %p4786_p1 = scmp.lt.s32.totalorder %s4784_s25, %s4780_s2 }
  0x62   :  { %p4787_p2 = por %p4786_p1, %p4785_p0 }
  0x64   :  { %p4788_p3 = pnand %p4787_p2, %p4781_p13 }
  0x66   :  { %4791 = shalt.err (!%p4788_p3)
}
  0x67   :  { %126 = dma.hbm_to_vmem [thread:$0]  %s6746_s7, 16, %s124_s30, [#allocation15]  }
  0x68   :  { %s5150_s27 = smov [#allocation17]   ;;  %s5151_s29 = smov [#allocation20]  }
  0x69   :  { %s145_s0 = sshll.u32 %s5150_s27, 4  ;;  %s167_s26 = sshll.u32 %s5151_s29, 4  ;;  %s146_s0 = int_to_ptr.vmem [resolvable:$true] %s145_s0  ;;  %s168_s26 = int_to_ptr.vmem [resolvable:$true] %s167_s26 }
  0x6a   :  { %s4792_s4 = scalar_lea.hbm %s6748_s9, 16 }
  0x6b   :  { %p4793_p4 = scmp.ne.s32.totalorder %s6748_s9, %s4792_s4  ;;  %p4796_p5 = scmp.lt.u32.totalorder %s4792_s4, %s6748_s9 }
  0x6d   :  { %p4798_p6 = pnand %p4796_p5, %p4793_p4 }
  0x6f   :  { %4801 = shalt.err (!%p4798_p6)
}
  0x70   :  { %s4802_s7 = scalar_lea.vmem %s146_s0, 16  ;;  %s4806_s30 = scalar_lea.vmem %s146_s0, 32 }
  0x71   :  { %p4803_p7 = scmp.ne.s32.totalorder %s146_s0, %s4802_s7  ;;  %p4807_p8 = scmp.lt.s32.totalorder %s146_s0, %s146_s0 }
  0x72   :  { %p4808_p9 = scmp.lt.s32.totalorder %s4806_s30, %s4802_s7 }
  0x74   :  { %p4809_p10 = por %p4808_p9, %p4807_p8 }
  0x76   :  { %p4810_p11 = pnand %p4809_p10, %p4803_p7 }
  0x78   :  { %4813 = shalt.err (!%p4810_p11)
}
  0x79   :  { %148 = dma.hbm_to_vmem [thread:$0]  %s6748_s9, 16, %s146_s0, [#allocation18]  }
  0x7a   :  { %s4814_s27 = scalar_lea.hbm %s6750_s11, 16 }
  0x7b   :  { %p4815_p12 = scmp.ne.s32.totalorder %s6750_s11, %s4814_s27  ;;  %p4818_p13 = scmp.lt.u32.totalorder %s4814_s27, %s6750_s11 }
  0x7d   :  { %p4820_p0 = pnand %p4818_p13, %p4815_p12 }
  0x7f   :  { %4823 = shalt.err (!%p4820_p0)
}
  0x80   :  { %s4824_s21 = scalar_lea.vmem %s168_s26, 16  ;;  %s4828_s1 = scalar_lea.vmem %s168_s26, 32 }
  0x81   :  { %p4825_p1 = scmp.ne.s32.totalorder %s168_s26, %s4824_s21  ;;  %p4829_p2 = scmp.lt.s32.totalorder %s168_s26, %s168_s26 }
  0x82   :  { %p4830_p3 = scmp.lt.s32.totalorder %s4828_s1, %s4824_s21 }
  0x84   :  { %p4831_p4 = por %p4830_p3, %p4829_p2 }
  0x86   :  { %p4832_p5 = pnand %p4831_p4, %p4825_p1 }
  0x88   :  { %4835 = shalt.err (!%p4832_p5)
}
  0x89   :  { %170 = dma.hbm_to_vmem [thread:$0]  %s6750_s11, 16, %s168_s26, [#allocation21]  }
  0x8a   :  { %s5152_s5 = smov [#allocation23]   ;;  %s4836_s2 = scalar_lea.hbm %s6752_s13, 16 }
  0x8b   :  { %s189_s22 = sshll.u32 %s5152_s5, 4  ;;  %p4837_p6 = scmp.ne.s32.totalorder %s6752_s13, %s4836_s2  ;;  %s190_s22 = int_to_ptr.vmem [resolvable:$true] %s189_s22 }
  0x8c   :  { %p4840_p7 = scmp.lt.u32.totalorder %s4836_s2, %s6752_s13 }
  0x8e   :  { %p4842_p8 = pnand %p4840_p7, %p4837_p6 }
  0x90   :  { %4845 = shalt.err (!%p4842_p8)
}
  0x91   :  { %s4846_s29 = scalar_lea.vmem %s190_s22, 16  ;;  %s4850_s11 = scalar_lea.vmem %s190_s22, 32 }
  0x92   :  { %p4847_p9 = scmp.ne.s32.totalorder %s190_s22, %s4846_s29  ;;  %p4851_p10 = scmp.lt.s32.totalorder %s190_s22, %s190_s22 }
  0x93   :  { %p4852_p11 = scmp.lt.s32.totalorder %s4850_s11, %s4846_s29 }
  0x95   :  { %p4853_p12 = por %p4852_p11, %p4851_p10 }
  0x97   :  { %p4854_p13 = pnand %p4853_p12, %p4847_p9 }
  0x99   :  { %4857 = shalt.err (!%p4854_p13)
}
  0x9a   :  { %192 = dma.hbm_to_vmem [thread:$0]  %s6752_s13, 16, %s190_s22, [#allocation24]  }
  0x9b   :  { %s5153_s3 = smov [#allocation26]   ;;  %s5154_s21 = smov [#allocation2]  }
  0x9c   :  { %s210_s4 = sshll.u32 %s5153_s3, 4  ;;  %s42_s1 = sshll.u32 %s5154_s21, 4  ;;  %s211_s4 = int_to_ptr.vmem [resolvable:$true] %s210_s4  ;;  %s43_s1 = int_to_ptr.vmem [resolvable:$true] %s42_s1 }
  0x9d   :  { %s4858_s5 = scalar_lea.hbm %s6754_s15, 1024 }
  0x9e   :  { %p4859_p0 = scmp.ne.s32.totalorder %s6754_s15, %s4858_s5  ;;  %p4862_p1 = scmp.lt.u32.totalorder %s4858_s5, %s6754_s15 }
  0xa0   :  { %p4864_p2 = pnand %p4862_p1, %p4859_p0 }
  0xa2   :  { %4867 = shalt.err (!%p4864_p2)
}
  0xa3   :  { %s4868_s13 = scalar_lea.vmem %s211_s4, 1024  ;;  %p4873_p4 = scmp.lt.s32.totalorder %s211_s4, %s211_s4 }
  0xa4   :  { %p4869_p3 = scmp.ne.s32.totalorder %s211_s4, %s4868_s13  ;;  %p4874_p5 = scmp.lt.s32.totalorder %s4868_s13, %s4868_s13 }
  0xa6   :  { %p4875_p6 = por %p4874_p5, %p4873_p4 }
  0xa8   :  { %p4876_p7 = pnand %p4875_p6, %p4869_p3 }
  0xaa   :  { %4879 = shalt.err (!%p4876_p7)
}
  0xab   :  { %s5155_s22 = smov 64   ;;  %s5156_s28 = smov 4  }
  0xac   :  { %216 = dma.hbm_to_vmem [thread:$0]  %s6754_s15, 1024, %s211_s4, [#allocation27], %s5155_s22, %s5155_s22, %s5156_s28  }
  0xad   :  { %s6868_s26 = sld [smem:[#allocation65_spill]] }
  0xb3   :  { %s4880_s24 = scalar_lea.hbm %s6868_s26, 4096 }
  0xb4   :  { %p4881_p8 = scmp.ne.s32.totalorder %s6868_s26, %s4880_s24  ;;  %p4884_p9 = scmp.lt.u32.totalorder %s4880_s24, %s6868_s26 }
  0xb6   :  { %p4886_p10 = pnand %p4884_p9, %p4881_p8 }
  0xb8   :  { %4889 = shalt.err (!%p4886_p10)
}
  0xb9   :  { %s4890_s5 = scalar_lea.vmem %s43_s1, 4096  ;;  %p4895_p12 = scmp.lt.s32.totalorder %s43_s1, %s43_s1 }
  0xba   :  { %p4891_p11 = scmp.ne.s32.totalorder %s43_s1, %s4890_s5  ;;  %p4896_p13 = scmp.lt.s32.totalorder %s4890_s5, %s4890_s5 }
  0xbc   :  { %p4897_p0 = por %p4896_p13, %p4895_p12 }
  0xbe   :  { %p4898_p1 = pnand %p4897_p0, %p4891_p11 }
  0xc0   :  { %4901 = shalt.err (!%p4898_p1)
}
  0xc1   :  { %s6869_s15 = smov 8   ;;  %s6870_s4 = smov 128  }
  0xc2   :  { %48 = dma.hbm_to_vmem [thread:$0]  %s6868_s26, 4096, %s43_s1, [#allocation3], %s6870_s4, %s6870_s4, %s6869_s15  }
  0xc3   :  { %s5157_s2 = smov [#allocation7]   ;;  %s5158_s13 = smov [#allocation10]  }
  0xc4   :  { %s66_s25 = sshll.u32 %s5157_s2, 4  ;;  %s88_s23 = sshll.u32 %s5158_s13, 4  ;;  %s67_s25 = int_to_ptr.vmem [resolvable:$true] %s66_s25  ;;  %s89_s23 = int_to_ptr.vmem [resolvable:$true] %s88_s23 }
  0xc5   :  { %s6871_s11 = sld [smem:[#allocation67_spill]] }
  0xcb   :  { %s4902_s24 = scalar_lea.hbm %s6871_s11, 1024 }
  0xcc   :  { %p4903_p2 = scmp.ne.s32.totalorder %s6871_s11, %s4902_s24  ;;  %p4906_p3 = scmp.lt.u32.totalorder %s4902_s24, %s6871_s11 }
  0xce   :  { %p4908_p4 = pnand %p4906_p3, %p4903_p2 }
  0xd0   :  { %4911 = shalt.err (!%p4908_p4)
}
  0xd1   :  { %s4912_s1 = scalar_lea.vmem %s67_s25, 1024  ;;  %p4917_p6 = scmp.lt.s32.totalorder %s67_s25, %s67_s25 }
  0xd2   :  { %p4913_p5 = scmp.ne.s32.totalorder %s67_s25, %s4912_s1  ;;  %p4918_p7 = scmp.lt.s32.totalorder %s4912_s1, %s4912_s1 }
  0xd4   :  { %p4919_p8 = por %p4918_p7, %p4917_p6 }
  0xd6   :  { %p4920_p9 = pnand %p4919_p8, %p4913_p5 }
  0xd8   :  { %4923 = shalt.err (!%p4920_p9)
}
  0xd9   :  { %72 = dma.hbm_to_vmem [thread:$0]  %s6871_s11, 1024, %s67_s25, [#allocation6], %s5155_s22, %s5155_s22, %s5156_s28  }
  0xda   :  { %s6872_s2 = sld [smem:[#allocation69_spill]] }
  0xe0   :  { %s4924_s13 = scalar_lea.hbm %s6872_s2, 1024 }
  0xe1   :  { %p4925_p10 = scmp.ne.s32.totalorder %s6872_s2, %s4924_s13  ;;  %p4928_p11 = scmp.lt.u32.totalorder %s4924_s13, %s6872_s2 }
  0xe3   :  { %p4930_p12 = pnand %p4928_p11, %p4925_p10 }
  0xe5   :  { %4933 = shalt.err (!%p4930_p12)
}
  0xe6   :  { %s4934_s21 = scalar_lea.vmem %s89_s23, 1024  ;;  %p4939_p0 = scmp.lt.s32.totalorder %s89_s23, %s89_s23 }
  0xe7   :  { %p4935_p13 = scmp.ne.s32.totalorder %s89_s23, %s4934_s21  ;;  %p4940_p1 = scmp.lt.s32.totalorder %s4934_s21, %s4934_s21 }
  0xe9   :  { %p4941_p2 = por %p4940_p1, %p4939_p0 }
  0xeb   :  { %p4942_p3 = pnand %p4941_p2, %p4935_p13 }
  0xed   :  { %4945 = shalt.err (!%p4942_p3)
}
  0xee   :  { %94 = dma.hbm_to_vmem [thread:$0]  %s6872_s2, 1024, %s89_s23, [#allocation9], %s5155_s22, %s5155_s22, %s5156_s28  }
  0xef   :  { %s5159_s9 = smov [#allocation13]   ;;  %s5160_s1 = smov [#allocation16]  }
  0xf0   :  { %s110_s0 = sshll.u32 %s5159_s9, 4  ;;  %s132_s26 = sshll.u32 %s5160_s1, 4  ;;  %s111_s0 = int_to_ptr.vmem [resolvable:$true] %s110_s0  ;;  %s133_s26 = int_to_ptr.vmem [resolvable:$true] %s132_s26 }
  0xf1   :  { %s4946_s30 = scalar_lea.hbm %s6745_s6, 1024 }
  0xf2   :  { %p4947_p4 = scmp.ne.s32.totalorder %s6745_s6, %s4946_s30  ;;  %p4950_p5 = scmp.lt.u32.totalorder %s4946_s30, %s6745_s6 }
  0xf4   :  { %p4952_p6 = pnand %p4950_p5, %p4947_p4 }
  0xf6   :  { %4955 = shalt.err (!%p4952_p6)
}
  0xf7   :  { %s4956_s23 = scalar_lea.vmem %s111_s0, 1024  ;;  %p4961_p8 = scmp.lt.s32.totalorder %s111_s0, %s111_s0 }
  0xf8   :  { %p4957_p7 = scmp.ne.s32.totalorder %s111_s0, %s4956_s23  ;;  %p4962_p9 = scmp.lt.s32.totalorder %s4956_s23, %s4956_s23 }
  0xfa   :  { %p4963_p10 = por %p4962_p9, %p4961_p8 }
  0xfc   :  { %p4964_p11 = pnand %p4963_p10, %p4957_p7 }
  0xfe   :  { %4967 = shalt.err (!%p4964_p11)
}
  0xff   :  { %116 = dma.hbm_to_vmem [thread:$0]  %s6745_s6, 1024, %s111_s0, [#allocation12], %s5155_s22, %s5155_s22, %s5156_s28  }
 0x100   :  { %s4968_s11 = scalar_lea.hbm %s6747_s8, 1024 }
 0x101   :  { %p4969_p12 = scmp.ne.s32.totalorder %s6747_s8, %s4968_s11  ;;  %p4972_p13 = scmp.lt.u32.totalorder %s4968_s11, %s6747_s8 }
 0x103   :  { %p4974_p0 = pnand %p4972_p13, %p4969_p12 }
 0x105   :  { %4977 = shalt.err (!%p4974_p0)
}
 0x106   :  { %s4978_s30 = scalar_lea.vmem %s133_s26, 1024  ;;  %p4983_p2 = scmp.lt.s32.totalorder %s133_s26, %s133_s26 }
 0x107   :  { %p4979_p1 = scmp.ne.s32.totalorder %s133_s26, %s4978_s30  ;;  %p4984_p3 = scmp.lt.s32.totalorder %s4978_s30, %s4978_s30 }
 0x109   :  { %p4985_p4 = por %p4984_p3, %p4983_p2 }
 0x10b   :  { %p4986_p5 = pnand %p4985_p4, %p4979_p1 }
 0x10d   :  { %4989 = shalt.err (!%p4986_p5)
}
 0x10e   :  { %138 = dma.hbm_to_vmem [thread:$0]  %s6747_s8, 1024, %s133_s26, [#allocation15], %s5155_s22, %s5155_s22, %s5156_s28  }
 0x10f   :  { %s5161_s13 = smov [#allocation19]   ;;  %s5162_s29 = smov [#allocation22]  }
 0x110   :  { %s154_s27 = sshll.u32 %s5161_s13, 4  ;;  %s176_s24 = sshll.u32 %s5162_s29, 4  ;;  %s155_s27 = int_to_ptr.vmem [resolvable:$true] %s154_s27  ;;  %s177_s24 = int_to_ptr.vmem [resolvable:$true] %s176_s24 }
 0x111   :  { %s4990_s3 = scalar_lea.hbm %s6749_s10, 1024 }
 0x112   :  { %p4991_p6 = scmp.ne.s32.totalorder %s6749_s10, %s4990_s3  ;;  %p4994_p7 = scmp.lt.u32.totalorder %s4990_s3, %s6749_s10 }
 0x114   :  { %p4996_p8 = pnand %p4994_p7, %p4991_p6 }
 0x116   :  { %4999 = shalt.err (!%p4996_p8)
}
 0x117   :  { %s5000_s8 = scalar_lea.vmem %s155_s27, 1024  ;;  %p5005_p10 = scmp.lt.s32.totalorder %s155_s27, %s155_s27 }
 0x118   :  { %p5001_p9 = scmp.ne.s32.totalorder %s155_s27, %s5000_s8  ;;  %p5006_p11 = scmp.lt.s32.totalorder %s5000_s8, %s5000_s8 }
 0x11a   :  { %p5007_p12 = por %p5006_p11, %p5005_p10 }
 0x11c   :  { %p5008_p13 = pnand %p5007_p12, %p5001_p9 }
 0x11e   :  { %5011 = shalt.err (!%p5008_p13)
}
 0x11f   :  { %160 = dma.hbm_to_vmem [thread:$0]  %s6749_s10, 1024, %s155_s27, [#allocation18], %s5155_s22, %s5155_s22, %s5156_s28  }
 0x120   :  { %s5012_s30 = scalar_lea.hbm %s6751_s12, 1024 }
 0x121   :  { %p5013_p0 = scmp.ne.s32.totalorder %s6751_s12, %s5012_s30  ;;  %p5016_p1 = scmp.lt.u32.totalorder %s5012_s30, %s6751_s12 }
 0x123   :  { %p5018_p2 = pnand %p5016_p1, %p5013_p0 }
 0x125   :  { %5021 = shalt.err (!%p5018_p2)
}
 0x126   :  { %s5022_s23 = scalar_lea.vmem %s177_s24, 1024  ;;  %p5027_p4 = scmp.lt.s32.totalorder %s177_s24, %s177_s24 }
 0x127   :  { %p5023_p3 = scmp.ne.s32.totalorder %s177_s24, %s5022_s23  ;;  %p5028_p5 = scmp.lt.s32.totalorder %s5022_s23, %s5022_s23 }
 0x129   :  { %p5029_p6 = por %p5028_p5, %p5027_p4 }
 0x12b   :  { %p5030_p7 = pnand %p5029_p6, %p5023_p3 }
 0x12d   :  { %5033 = shalt.err (!%p5030_p7)
}
 0x12e   :  { %182 = dma.hbm_to_vmem [thread:$0]  %s6751_s12, 1024, %s177_s24, [#allocation21], %s5155_s22, %s5155_s22, %s5156_s28  }
 0x12f   :  { %s5163_s2 = smov [#allocation25]   ;;  %s5164_s21 = smov [#allocation28]  }
 0x130   :  { %s198_s3 = sshll.u32 %s5163_s2, 4  ;;  %s223_s25 = sshll.u32 %s5164_s21, 4  ;;  %s199_s3 = int_to_ptr.vmem [resolvable:$true] %s198_s3  ;;  %s224_s25 = int_to_ptr.vmem [resolvable:$true] %s223_s25 }
 0x131   :  { %s5034_s8 = scalar_lea.hbm %s6753_s14, 1024 }
 0x132   :  { %p5035_p8 = scmp.ne.s32.totalorder %s6753_s14, %s5034_s8  ;;  %p5038_p9 = scmp.lt.u32.totalorder %s5034_s8, %s6753_s14 }
 0x134   :  { %p5040_p10 = pnand %p5038_p9, %p5035_p8 }
 0x136   :  { %5043 = shalt.err (!%p5040_p10)
}
 0x137   :  { %s5044_s12 = scalar_lea.vmem %s199_s3, 1024  ;;  %p5049_p12 = scmp.lt.s32.totalorder %s199_s3, %s199_s3 }
 0x138   :  { %p5045_p11 = scmp.ne.s32.totalorder %s199_s3, %s5044_s12  ;;  %p5050_p13 = scmp.lt.s32.totalorder %s5044_s12, %s5044_s12 }
 0x13a   :  { %p5051_p0 = por %p5050_p13, %p5049_p12 }
 0x13c   :  { %p5052_p1 = pnand %p5051_p0, %p5045_p11 }
 0x13e   :  { %5055 = shalt.err (!%p5052_p1)
}
 0x13f   :  { %204 = dma.hbm_to_vmem [thread:$0]  %s6753_s14, 1024, %s199_s3, [#allocation24], %s5155_s22, %s5155_s22, %s5156_s28  }
 0x140   :  { %s5056_s13 = scalar_lea.hbm %s6755_s16, 16 }
 0x141   :  { %p5057_p2 = scmp.ne.s32.totalorder %s6755_s16, %s5056_s13  ;;  %p5060_p3 = scmp.lt.u32.totalorder %s5056_s13, %s6755_s16 }
 0x143   :  { %p5062_p4 = pnand %p5060_p3, %p5057_p2 }
 0x145   :  { %5065 = shalt.err (!%p5062_p4)
}
 0x146   :  { %s5066_s2 = scalar_lea.vmem %s224_s25, 16  ;;  %s5070_s21 = scalar_lea.vmem %s224_s25, 32 }
 0x147   :  { %p5067_p5 = scmp.ne.s32.totalorder %s224_s25, %s5066_s2  ;;  %p5071_p6 = scmp.lt.s32.totalorder %s224_s25, %s224_s25 }
 0x148   :  { %p5072_p7 = scmp.lt.s32.totalorder %s5070_s21, %s5066_s2 }
 0x14a   :  { %p5073_p8 = por %p5072_p7, %p5071_p6 }
 0x14c   :  { %p5074_p9 = pnand %p5073_p8, %p5067_p5 }
 0x14e   :  { %5077 = shalt.err (!%p5074_p9)
}
 0x14f   :  { %226 = dma.hbm_to_vmem [thread:$0]  %s6755_s16, 16, %s224_s25, [#allocation27]  }
 0x150   :  { %s5165_s11 = smov [#allocation29]   ;;  %s5078_s1 = scalar_lea.hbm %s6758_s19, 1024 }
 0x151   :  { %s236_s9 = sshll.u32 %s5165_s11, 4  ;;  %p5079_p10 = scmp.ne.s32.totalorder %s6758_s19, %s5078_s1  ;;  %s237_s9 = int_to_ptr.vmem [resolvable:$true] %s236_s9 }
 0x152   :  { %p5082_p11 = scmp.lt.u32.totalorder %s5078_s1, %s6758_s19 }
 0x154   :  { %p5084_p12 = pnand %p5082_p11, %p5079_p10 }
 0x156   :  { %5087 = shalt.err (!%p5084_p12)
}
 0x157   :  { %s5088_s30 = scalar_lea.vmem %s237_s9, 1024  ;;  %p5093_p0 = scmp.lt.s32.totalorder %s237_s9, %s237_s9 }
 0x158   :  { %p5089_p13 = scmp.ne.s32.totalorder %s237_s9, %s5088_s30  ;;  %p5094_p1 = scmp.lt.s32.totalorder %s5088_s30, %s5088_s30 }
 0x15a   :  { %p5095_p2 = por %p5094_p1, %p5093_p0 }
 0x15c   :  { %p5096_p3 = pnand %p5095_p2, %p5089_p13 }
 0x15e   :  { %5099 = shalt.err (!%p5096_p3)
}
 0x15f   :  { %242 = dma.hbm_to_vmem [thread:$0]  %s6758_s19, 1024, %s237_s9, [#allocation30], %s5155_s22, %s5155_s22, %s5156_s28  }
 0x160   :  { %5122 = dma.done.wait [#allocation3], 4096  }
 0x161   :  { %5123 = vsyncadd [#allocation3], 4294963200 }
 0x162   :  { %5124 = dma.done.wait [#allocation6], 5120  }
 0x163   :  { %5125 = vsyncadd [#allocation6], 4294962176 }
 0x164   :  { %5126 = dma.done.wait [#allocation9], 1040  }
 0x165   :  { %5127 = vsyncadd [#allocation9], 4294966256 }
 0x166   :  { %5128 = dma.done.wait [#allocation12], 1040  }
 0x167   :  { %5129 = vsyncadd [#allocation12], 4294966256 }
 0x168   :  { %5130 = dma.done.wait [#allocation15], 1040  }
 0x169   :  { %5131 = vsyncadd [#allocation15], 4294966256 }
 0x16a   :  { %5132 = dma.done.wait [#allocation18], 1040  }
 0x16b   :  { %5133 = vsyncadd [#allocation18], 4294966256 }
 0x16c   :  { %5134 = dma.done.wait [#allocation21], 1040  }
 0x16d   :  { %5135 = vsyncadd [#allocation21], 4294966256 }
 0x16e   :  { %5136 = dma.done.wait [#allocation24], 1040  }
 0x16f   :  { %5137 = vsyncadd [#allocation24], 4294966256 }
 0x170   :  { %5138 = dma.done.wait [#allocation27], 1040  }
 0x171   :  { %5139 = vsyncadd [#allocation27], 4294966256 }
 0x172   :  { %5140 = dma.done.wait [#allocation30], 1024  }
 0x173   :  { %5141 = vsyncadd [#allocation30], 4294966272  ;;  %v4466_v0 = vld [vmem:[#allocation7] sm:$0xff]   ;;  %v4467_v1 = vld [vmem:[#allocation7 + $0x8] sm:$0xff]  }
 0x174   :  { %3931 = vmatprep.subr.bf16.mxu0 %v4466_v0  ;;  %v4468_v2 = vld [vmem:[#allocation7 + $0x10] sm:$0xff]   ;;  %v4469_v3 = vld [vmem:[#allocation7 + $0x18] sm:$0xff]   ;;  %v300_v4 = vld [vmem:[#allocation2] sm:$0xff] }
 0x175   :  { %3932 = vmatpush3.bf16.msra.mxu0 %v4466_v0  ;;  %v301_v5 = vld [vmem:[#allocation2 + $0x8] sm:$0xff]  ;;  %v332_v6 = vld [vmem:[#allocation5] sm:$0xff]  ;;  %v5534_v9 = vld [vmem:[#allocation2 + $0x10] sm:$0xff] }
 0x176   :  { %3933 = vmatprep.subr.bf16.mxu0 %v4467_v1  ;;  %v333_v7 = vld [vmem:[#allocation5 + $0x8] sm:$0xff]  ;;  %v364_v8 = vmul.f32 0.01, %v332_v6  ;;  %v5536_v10 = vld [vmem:[#allocation2 + $0x18] sm:$0xff]  ;;  %v4470_v14 = vld [vmem:[#allocation7 + $0x20] sm:$0xff]  }
 0x177   :  { %v365_v11 = vmul.f32 0.01, %v333_v7  ;;  %v334_v17 = vld [vmem:[#allocation5 + $0x10] sm:$0xff]  ;;  %v4471_v18 = vld [vmem:[#allocation7 + $0x28] sm:$0xff]   ;;  %v335_v19 = vld [vmem:[#allocation5 + $0x18] sm:$0xff] }
 0x178   :  { %v396_v13 = vadd.f32 %v364_v8, %v300_v4  ;;  %v336_v20 = vld [vmem:[#allocation5 + $0x20] sm:$0xff]  ;;  %v337_v21 = vld [vmem:[#allocation5 + $0x28] sm:$0xff]  ;;  %v338_v22 = vld [vmem:[#allocation5 + $0x30] sm:$0xff]  ;;  %v366_v24 = vmul.f32 0.01, %v334_v17 }
 0x179   :  { %3934 = vmatpush3.bf16.msra.mxu0 %v4467_v1  ;;  %v397_v15 = vadd.f32 %v365_v11, %v301_v5  ;;  %v4472_v23 = vld [vmem:[#allocation7 + $0x30] sm:$0xff]   ;;  %v339_v25 = vld [vmem:[#allocation5 + $0x38] sm:$0xff]  ;;  %v340_v26 = vld [vmem:[#allocation5 + $0x40] sm:$0xff]  ;;  %v367_v27 = vmul.f32 0.01, %v335_v19 }
 0x17a   :  { %3935 = vmatprep.subr.bf16.mxu0 %v4468_v2  ;;  %v368_v28 = vmul.f32 0.01, %v336_v20  ;;  %v341_v29 = vld [vmem:[#allocation5 + $0x48] sm:$0xff]  ;;  %v342_v30 = vld [vmem:[#allocation5 + $0x50] sm:$0xff]  ;;  %v369_v31 = vmul.f32 0.01, %v337_v21  ;;  %v398_v58 = vadd.f32 %v366_v24, %v5534_v9 }
 0x17b   :  { %v428_v16 = vpack.c.bf16 %v397_v15, %v396_v13  ;;  %v5540_v32 = vmul.f32 0.01, %v338_v22  ;;  %v343_v33 = vld [vmem:[#allocation5 + $0x58] sm:$0xff]  ;;  %v344_v34 = vld [vmem:[#allocation5 + $0x60] sm:$0xff]  ;;  %v371_v35 = vmul.f32 0.01, %v339_v25  ;;  %v399_v59 = vadd.f32 %v367_v27, %v5536_v10 }
 0x17c   :  { %v5542_v36 = vmul.f32 0.01, %v340_v26  ;;  %v345_v37 = vld [vmem:[#allocation5 + $0x68] sm:$0xff]  ;;  %v346_v38 = vld [vmem:[#allocation5 + $0x70] sm:$0xff]  ;;  %v4473_v39 = vld [vmem:[#allocation7 + $0x38] sm:$0xff]  }
 0x17d   :  { %3936 = vmatpush3.bf16.msra.mxu0 %v4468_v2  ;;  %3947 = vmatprep.mubr.bf16.mxu0 %v428_v16  ;;  %v304_v40 = vld [vmem:[#allocation2 + $0x20] sm:$0xff]  ;;  %v305_v41 = vld [vmem:[#allocation2 + $0x28] sm:$0xff]  ;;  %v373_v42 = vmul.f32 0.01, %v341_v29  ;;  %v5544_v43 = vmul.f32 0.01, %v342_v30  ;;  %v429_v17 = vpack.c.bf16 %v399_v59, %v398_v58 }
 0x17e   :  { %3937 = vmatprep.subr.bf16.mxu0 %v4469_v3  ;;  %v347_v44 = vld [vmem:[#allocation5 + $0x78] sm:$0xff]  ;;  %v348_v45 = vld [vmem:[#allocation5 + $0x80] sm:$0xff]  ;;  %v5546_v46 = vmul.f32 0.01, %v343_v33  ;;  %v5548_v47 = vmul.f32 0.01, %v344_v34  ;;  %v400_v0 = vadd.f32 %v368_v28, %v304_v40  ;;  %v401_v1 = vadd.f32 %v369_v31, %v305_v41 }
 0x17f   :  { %v349_v48 = vld [vmem:[#allocation5 + $0x88] sm:$0xff]  ;;  %v350_v49 = vld [vmem:[#allocation5 + $0x90] sm:$0xff]  ;;  %v5550_v50 = vmul.f32 0.01, %v345_v37  ;;  %v5552_v51 = vmul.f32 0.01, %v346_v38 }
 0x180   :  { %v351_v52 = vld [vmem:[#allocation5 + $0x98] sm:$0xff]  ;;  %v352_v53 = vld [vmem:[#allocation5 + $0xa0] sm:$0xff]  ;;  %v5554_v54 = vmul.f32 0.01, %v347_v44  ;;  %v5556_v55 = vmul.f32 0.01, %v348_v45  ;;  %v430_v22 = vpack.c.bf16 %v401_v1, %v400_v0 }
 0x181   :  { %3938 = vmatpush3.bf16.msra.mxu0 %v4469_v3  ;;  %v353_v56 = vld [vmem:[#allocation5 + $0xa8] sm:$0xff]  ;;  %v354_v57 = vld [vmem:[#allocation5 + $0xb0] sm:$0xff]  ;;  %v5560_v60 = vmul.f32 0.01, %v349_v48  ;;  %v5562_v61 = vmul.f32 0.01, %v350_v49 }
 0x182   :  { %3939 = vmatprep.subr.bf16.mxu0 %v4470_v14  ;;  %v355_v62 = vld [vmem:[#allocation5 + $0xb8] sm:$0xff]  ;;  %v356_v63 = vld [vmem:[#allocation5 + $0xc0] sm:$0xff]  ;;  %v5564_v2 = vmul.f32 0.01, %v351_v52  ;;  %v5566_v3 = vmul.f32 0.01, %v352_v53 }
 0x183   :  { %v357_v4 = vld [vmem:[#allocation5 + $0xc8] sm:$0xff]  ;;  %v5568_v5 = vmul.f32 0.01, %v353_v56  ;;  %v5570_v6 = vmul.f32 0.01, %v354_v57  ;;  %v358_v7 = vld [vmem:[#allocation5 + $0xd0] sm:$0xff] }
 0x184   :  { %v359_v8 = vld [vmem:[#allocation5 + $0xd8] sm:$0xff]  ;;  %v306_v11 = vld [vmem:[#allocation2 + $0x30] sm:$0xff]  ;;  %v5574_v15 = vmul.f32 0.01, %v356_v63  ;;  %v360_v16 = vld [vmem:[#allocation5 + $0xe0] sm:$0xff] }
 0x185   :  { %3940 = vmatpush3.bf16.msra.mxu0 %v4470_v14  ;;  %v307_v13 = vld [vmem:[#allocation2 + $0x38] sm:$0xff]  ;;  %v5572_v14 = vmul.f32 0.01, %v355_v62  ;;  %v5576_v19 = vmul.f32 0.01, %v357_v4  ;;  %v361_v21 = vld [vmem:[#allocation5 + $0xe8] sm:$0xff]  ;;  %v402_v29 = vadd.f32 %v5540_v32, %v306_v11 }
 0x186   :  { %3941 = vmatprep.subr.bf16.mxu0 %v4471_v18  ;;  %v5578_v20 = vmul.f32 0.01, %v358_v7  ;;  %v5582_v24 = vmul.f32 0.01, %v360_v16  ;;  %v309_v25 = vld [vmem:[#allocation2 + $0x48] sm:$0xff]  ;;  %v362_v27 = vld [vmem:[#allocation5 + $0xf0] sm:$0xff]  ;;  %v403_v30 = vadd.f32 %v371_v35, %v307_v13 }
 0x187   :  { %v5584_v26 = vmul.f32 0.01, %v361_v21  ;;  %v4474_v28 = vld [vmem:[#allocation10] sm:$0xff]   ;;  %v4475_v31 = vld [vmem:[#allocation10 + $0x8] sm:$0xff]   ;;  %v405_v34 = vadd.f32 %v373_v42, %v309_v25  ;;  %v363_v37 = vld [vmem:[#allocation5 + $0xf8] sm:$0xff] }
 0x188   :  { %3979 = vmatprep.subr.bf16.mxu1 %v4474_v28  ;;  %v5588_v38 = vmul.f32 0.01, %v362_v27  ;;  %v311_v40 = vld [vmem:[#allocation2 + $0x58] sm:$0xff]  ;;  %v431_v44 = vpack.c.bf16 %v403_v30, %v402_v29  ;;  %v312_v45 = vld [vmem:[#allocation2 + $0x60] sm:$0xff]  ;;  %v313_v48 = vld [vmem:[#allocation2 + $0x68] sm:$0xff] }
 0x189   :  { %3942 = vmatpush3.bf16.msra.mxu0 %v4471_v18  ;;  %v308_v18 = vld [vmem:[#allocation2 + $0x40] sm:$0xff]  ;;  %3980 = vmatpush3.bf16.msra.mxu1 %v4474_v28  ;;  %v4476_v41 = vld [vmem:[#allocation10 + $0x10] sm:$0xff]   ;;  %v5590_v49 = vmul.f32 0.01, %v363_v37  ;;  %v407_v42 = vadd.f32 %v5546_v46, %v311_v40  ;;  %v408_v52 = vadd.f32 %v5548_v47, %v312_v45  ;;  %v409_v53 = vadd.f32 %v5550_v50, %v313_v48  ;;  %v317_v63 = vld [vmem:[#allocation2 + $0x88] sm:$0xff] }
 0x18a   :  { %3943 = vmatprep.subr.bf16.mxu0 %v4472_v23  ;;  %v404_v33 = vadd.f32 %v5542_v36, %v308_v18  ;;  %3981 = vmatprep.subr.bf16.mxu1 %v4475_v31  ;;  %v4477_v35 = vld [vmem:[#allocation10 + $0x18] sm:$0xff]   ;;  %v4478_v56 = vld [vmem:[#allocation10 + $0x20] sm:$0xff]   ;;  %v314_v57 = vld [vmem:[#allocation2 + $0x70] sm:$0xff]  ;;  %v413_v50 = vadd.f32 %v5560_v60, %v317_v63 }
 0x18b   :  { %v315_v58 = vld [vmem:[#allocation2 + $0x78] sm:$0xff]  ;;  %v316_v62 = vld [vmem:[#allocation2 + $0x80] sm:$0xff]  ;;  %v434_v0 = vpack.c.bf16 %v409_v53, %v408_v52  ;;  %v4479_v1 = vld [vmem:[#allocation10 + $0x28] sm:$0xff]  }
 0x18c   :  { %v432_v32 = vpack.c.bf16 %v405_v34, %v404_v33  ;;  %v411_v46 = vadd.f32 %v5554_v54, %v315_v58  ;;  %v412_v47 = vadd.f32 %v5556_v55, %v316_v62  ;;  %v318_v4 = vld [vmem:[#allocation2 + $0x90] sm:$0xff]  ;;  %v319_v7 = vld [vmem:[#allocation2 + $0x98] sm:$0xff]  ;;  %v320_v11 = vld [vmem:[#allocation2 + $0xa0] sm:$0xff] }
 0x18d   :  { %3944 = vmatpush3.bf16.msra.mxu0 %v4472_v23  ;;  %v5580_v23 = vmul.f32 0.01, %v359_v8  ;;  %3982 = vmatpush3.bf16.msra.mxu1 %v4475_v31  ;;  %v321_v13 = vld [vmem:[#allocation2 + $0xa8] sm:$0xff]  ;;  %v416_v54 = vadd.f32 %v5566_v3, %v320_v11  ;;  %v322_v60 = vld [vmem:[#allocation2 + $0xb0] sm:$0xff]  ;;  %v323_v18 = vld [vmem:[#allocation2 + $0xb8] sm:$0xff] }
 0x18e   :  { %3945 = vmatprep.subr.bf16.mxu0 %v4473_v39  ;;  %3983 = vmatprep.subr.bf16.mxu1 %v4476_v41  ;;  %v436_v16 = vpack.c.bf16 %v413_v50, %v412_v47  ;;  %v417_v55 = vadd.f32 %v5568_v5, %v321_v13  ;;  %v325_v25 = vld [vmem:[#allocation2 + $0xc8] sm:$0xff]  ;;  %v418_v28 = vadd.f32 %v5570_v6, %v322_v60  ;;  %v326_v30 = vld [vmem:[#allocation2 + $0xd0] sm:$0xff]  ;;  %v327_v3 = vld [vmem:[#allocation2 + $0xd8] sm:$0xff] }
 0x18f   :  { %v419_v29 = vadd.f32 %v5572_v14, %v323_v18  ;;  %v328_v5 = vld [vmem:[#allocation2 + $0xe0] sm:$0xff]  ;;  %v329_v33 = vld [vmem:[#allocation2 + $0xe8] sm:$0xff]  ;;  %v422_v37 = vadd.f32 %v5578_v20, %v326_v30  ;;  %v330_v40 = vld [vmem:[#allocation2 + $0xf0] sm:$0xff] }
 0x190   :  { %v438_v27 = vpack.c.bf16 %v417_v55, %v416_v54  ;;  %v424_v6 = vadd.f32 %v5582_v24, %v328_v5  ;;  %v425_v14 = vadd.f32 %v5584_v26, %v329_v33  ;;  %v4480_v20 = vld [vmem:[#allocation10 + $0x30] sm:$0xff]   ;;  %v4482_v24 = vld [vmem:[#allocation13] sm:$0xff]  }
 0x191   :  { %3946 = vmatpush3.bf16.msra.mxu0 %v4473_v39  ;;  %v310_v39 = vld [vmem:[#allocation2 + $0x50] sm:$0xff]  ;;  %3984 = vmatpush3.bf16.msra.mxu1 %v4476_v41  ;;  %v439_v31 = vpack.c.bf16 %v419_v29, %v418_v28 }
 0x192   :  { %v406_v36 = vadd.f32 %v5544_v43, %v310_v39  ;;  %3985 = vmatprep.subr.bf16.mxu1 %v4477_v35  ;;  %v410_v43 = vadd.f32 %v5552_v51, %v314_v57  ;;  %v415_v51 = vadd.f32 %v5564_v2, %v319_v7  ;;  %v421_v2 = vadd.f32 %v5576_v19, %v325_v25  ;;  %v4483_v26 = vld [vmem:[#allocation13 + $0x8] sm:$0xff]  }
 0x193   :  { %v423_v39 = vadd.f32 %v5580_v23, %v327_v3  ;;  %v442_v19 = vpack.c.bf16 %v425_v14, %v424_v6  ;;  %v4481_v23 = vld [vmem:[#allocation10 + $0x38] sm:$0xff]   ;;  %4027 = vmatprep.subr.bf16.mxu0 %v4482_v24 }
 0x194   :  { %3948 = vmatmul.mubr.bf16.vlgmr.msra.gmra.mrb[0].mxu0 %v429_v17  ;;  %v433_v59 = vpack.c.bf16 %v407_v42, %v406_v36  ;;  %v435_v8 = vpack.c.bf16 %v411_v46, %v410_v43  ;;  %v414_v17 = vadd.f32 %v5562_v61, %v318_v4  ;;  %v4488_v36 = vld [vmem:[#allocation13 + $0x30] sm:$0xff]   ;;  %v5614_v42 = vld [vmem:[#allocation8] ss:$0 sm:$0xff] }
 0x195   :  { %3951 = vmatprep.mubr.bf16.mxu0 %v430_v22  ;;  %3986 = vmatpush3.bf16.msra.mxu1 %v4477_v35  ;;  %v324_v22 = vld [vmem:[#allocation2 + $0xc0] sm:$0xff]  ;;  %v441_v41 = vpack.c.bf16 %v423_v39, %v422_v37  ;;  %v4487_v35 = vld [vmem:[#allocation13 + $0x28] sm:$0xff]  }
 0x196   :  { %3987 = vmatprep.subr.bf16.mxu1 %v4478_v56  ;;  %v437_v21 = vpack.c.bf16 %v415_v51, %v414_v17  ;;  %v420_v61 = vadd.f32 %v5574_v15, %v324_v22  ;;  %v331_v15 = vld [vmem:[#allocation2 + $0xf8] sm:$0xff]  ;;  %4028 = vmatpush3.bf16.msra.mxu0 %v4482_v24 }
 0x197   :  { %v427_v45 = vadd.f32 %v5590_v49, %v331_v15  ;;  %4029 = vmatprep.subr.bf16.mxu0 %v4483_v26  ;;  %v4486_v49 = vld [vmem:[#allocation13 + $0x20] sm:$0xff]  }
 0x198   :  { %v440_v34 = vpack.c.bf16 %v421_v2, %v420_v61 }
 0x199   :  { %3988 = vmatpush3.bf16.msra.mxu1 %v4478_v56 }
 0x19a   :  { %3989 = vmatprep.subr.bf16.mxu1 %v4479_v1  ;;  %4030 = vmatpush3.bf16.msra.mxu0 %v4483_v26 }
 0x19c   :  { %3952 = vmatmul.mubr.bf16.gmra.mrb[4].mxu0 %v431_v44  ;;  %v426_v44 = vadd.f32 %v5588_v38, %v330_v40  ;;  %v4485_v38 = vld [vmem:[#allocation13 + $0x18] sm:$0xff]  }
 0x19d   :  { %3955 = vmatprep.mubr.bf16.mxu0 %v432_v32  ;;  %3990 = vmatpush3.bf16.msra.mxu1 %v4479_v1  ;;  %v4484_v32 = vld [vmem:[#allocation13 + $0x10] sm:$0xff]  }
 0x19e   :  { %v443_v48 = vpack.c.bf16 %v427_v45, %v426_v44  ;;  %3991 = vmatprep.subr.bf16.mxu1 %v4480_v20  ;;  %4031 = vmatprep.subr.bf16.mxu0 %v4484_v32 }
 0x19f   :  { %4032 = vmatpush3.bf16.msra.mxu0 %v4484_v32 }
 0x1a0   :  { %4033 = vmatprep.subr.bf16.mxu0 %v4485_v38 }
 0x1a1   :  { %3992 = vmatpush3.bf16.msra.mxu1 %v4480_v20 }
 0x1a2   :  { %3993 = vmatprep.subr.bf16.mxu1 %v4481_v23 }
 0x1a3   :  { %4034 = vmatpush3.bf16.msra.mxu0 %v4485_v38 }
 0x1a4   :  { %3956 = vmatmul.mubr.bf16.gmra.mrb[8].mxu0 %v433_v59  ;;  %4035 = vmatprep.subr.bf16.mxu0 %v4486_v49 }
 0x1a5   :  { %3959 = vmatprep.mubr.bf16.mxu0 %v434_v0  ;;  %3994 = vmatpush3.bf16.msra.mxu1 %v4481_v23 }
 0x1a7   :  { %4036 = vmatpush3.bf16.msra.mxu0 %v4486_v49 }
 0x1a8   :  { %4037 = vmatprep.subr.bf16.mxu0 %v4487_v35 }
 0x1ab   :  { %4038 = vmatpush3.bf16.msra.mxu0 %v4487_v35 }
 0x1ac   :  { %3960 = vmatmul.mubr.bf16.gmra.mrb[12].mxu0 %v435_v8  ;;  %4039 = vmatprep.subr.bf16.mxu0 %v4488_v36 }
 0x1ad   :  { %3963 = vmatprep.mubr.bf16.mxu0 %v436_v16 }
 0x1af   :  { %4040 = vmatpush3.bf16.msra.mxu0 %v4488_v36 }
 0x1b4   :  { %3964 = vmatmul.mubr.bf16.gmra.mrb[16].mxu0 %v437_v21 }
 0x1b5   :  { %3967 = vmatprep.mubr.bf16.mxu0 %v438_v27 }
 0x1bc   :  { %3968 = vmatmul.mubr.bf16.gmra.mrb[20].mxu0 %v439_v31 }
 0x1bd   :  { %3971 = vmatprep.mubr.bf16.mxu0 %v440_v34 }
 0x1c4   :  { %3972 = vmatmul.mubr.bf16.gmra.mrb[24].mxu0 %v441_v41 }
 0x1c5   :  { %3975 = vmatprep.mubr.bf16.mxu0 %v442_v19 }
 0x1cc   :  { %3976 = vmatmul.mubr.bf16.gmra.mrb[28].mxu0 %v443_v48 }
 0x267   :  { %v3949_v52 = vpop.f32.mrb[0].mxu0 }
 0x268   :  { %v549_v53 = vpop.f32.mrb[1].mxu0  ;;  %v5620_v58 = vadd.f32 %v3949_v52, %v5614_v42 }
 0x269   :  { %v5617_v56 = vadd.f32 %v5614_v42, %v549_v53  ;;  %v3950_v57 = vpop.f32.mrb[2].mxu0 }
 0x26a   :  { %v5623_v59 = vadd.f32 %v3950_v57, %v5614_v42  ;;  %v552_v62 = vpop.f32.mrb[3].mxu0  ;;  %v6803_v46 = vmax.f32 %v5620_v58, 0.0 }
 0x26b   :  { %v5626_v63 = vadd.f32 %v5614_v42, %v552_v62  ;;  %v6801_v1 = vmax.f32 %v5617_v56, 0.0 }
 0x26c   :  { %v6802_v0 = vmax.f32 %v5623_v59, 0.0 }
 0x26d   :  { %v6800_v43 = vmax.f32 %v5626_v63, 0.0 }
 0x26e   :  { %v709_v4 = vpack.c.bf16 %v6802_v0, %v6803_v46 }
 0x26f   :  { %v3953_v47 = vpop.f32.mrb[4].mxu0  ;;  %v708_v50 = vpack.c.bf16 %v6800_v43, %v6801_v1 }
 0x270   :  { %v5641_v7 = vadd.f32 %v3953_v47, %v5614_v42  ;;  %v565_v8 = vpop.f32.mrb[5].mxu0 }
 0x271   :  { %v5644_v11 = vadd.f32 %v5614_v42, %v565_v8  ;;  %v3954_v13 = vpop.f32.mrb[6].mxu0  ;;  %3995 = vmatprep.mubr.bf16.mxu1 %v708_v50 }
 0x272   :  { %v5647_v16 = vadd.f32 %v3954_v13, %v5614_v42  ;;  %v568_v17 = vpop.f32.mrb[7].mxu0  ;;  %3996 = vmatmul.mubr.bf16.vlgmr.msra.gmra.mrb[0].mxu1 %v709_v4  ;;  %v6799_v54 = vmax.f32 %v5641_v7, 0.0 }
 0x273   :  { %v5650_v51 = vadd.f32 %v5614_v42, %v568_v17  ;;  %v6797_v60 = vmax.f32 %v5644_v11, 0.0 }
 0x274   :  { %v6798_v55 = vmax.f32 %v5647_v16, 0.0 }
 0x275   :  { %v6796_v18 = vmax.f32 %v5650_v51, 0.0 }
 0x276   :  { %v711_v25 = vpack.c.bf16 %v6798_v55, %v6799_v54 }
 0x277   :  { %v710_v21 = vpack.c.bf16 %v6796_v18, %v6797_v60  ;;  %v3957_v22 = vpop.f32.mrb[8].mxu0 }
 0x278   :  { %v5665_v27 = vadd.f32 %v3957_v22, %v5614_v42  ;;  %v581_v28 = vpop.f32.mrb[9].mxu0 }
 0x279   :  { %v5668_v29 = vadd.f32 %v5614_v42, %v581_v28  ;;  %v3958_v61 = vpop.f32.mrb[10].mxu0  ;;  %3999 = vmatprep.mubr.bf16.mxu1 %v710_v21 }
 0x27a   :  { %v5671_v2 = vadd.f32 %v3958_v61, %v5614_v42  ;;  %v584_v30 = vpop.f32.mrb[11].mxu0  ;;  %4000 = vmatmul.mubr.bf16.gmra.mrb[4].mxu1 %v711_v25  ;;  %v6795_v31 = vmax.f32 %v5665_v27, 0.0 }
 0x27b   :  { %6873 = vst [vmem:[#allocation43_spill] sm:$0xff] %v5668_v29  ;;  %v5674_v3 = vadd.f32 %v5614_v42, %v584_v30  ;;  %v6793_v33 = vmax.f32 %v5668_v29, 0.0 }
 0x27c   :  { %v6794_v5 = vmax.f32 %v5671_v2, 0.0 }
 0x27d   :  { %6874 = vst [vmem:[#allocation44_spill] sm:$0xff] %v5674_v3  ;;  %v6792_v34 = vmax.f32 %v5674_v3, 0.0 }
 0x27e   :  { %v713_v6 = vpack.c.bf16 %v6794_v5, %v6795_v31 }
 0x27f   :  { %v712_v37 = vpack.c.bf16 %v6792_v34, %v6793_v33  ;;  %v3961_v39 = vpop.f32.mrb[12].mxu0 }
 0x280   :  { %v5689_v14 = vadd.f32 %v3961_v39, %v5614_v42  ;;  %v597_v40 = vpop.f32.mrb[13].mxu0 }
 0x281   :  { %v5692_v15 = vadd.f32 %v5614_v42, %v597_v40  ;;  %v3962_v41 = vpop.f32.mrb[14].mxu0  ;;  %4003 = vmatprep.mubr.bf16.mxu1 %v712_v37 }
 0x282   :  { %6875 = vst [vmem:[#allocation45_spill] sm:$0xff] %v5689_v14  ;;  %v5695_v19 = vadd.f32 %v3962_v41, %v5614_v42  ;;  %v600_v44 = vpop.f32.mrb[15].mxu0  ;;  %4004 = vmatmul.mubr.bf16.gmra.mrb[8].mxu1 %v713_v6  ;;  %v6791_v48 = vmax.f32 %v5689_v14, 0.0 }
 0x283   :  { %6876 = vst [vmem:[#allocation46_spill] sm:$0xff] %v5692_v15  ;;  %v5698_v45 = vadd.f32 %v5614_v42, %v600_v44  ;;  %v6789_v23 = vmax.f32 %v5692_v15, 0.0 }
 0x284   :  { %6877 = vst [vmem:[#allocation47_spill] sm:$0xff] %v5695_v19  ;;  %v6790_v20 = vmax.f32 %v5695_v19, 0.0 }
 0x285   :  { %6878 = vst [vmem:[#allocation48_spill] sm:$0xff] %v5698_v45  ;;  %v6788_v24 = vmax.f32 %v5698_v45, 0.0 }
 0x286   :  { %v715_v38 = vpack.c.bf16 %v6790_v20, %v6791_v48 }
 0x287   :  { %v714_v26 = vpack.c.bf16 %v6788_v24, %v6789_v23  ;;  %v3965_v32 = vpop.f32.mrb[16].mxu0 }
 0x288   :  { %v5713_v49 = vadd.f32 %v3965_v32, %v5614_v42  ;;  %v613_v35 = vpop.f32.mrb[17].mxu0 }
 0x289   :  { %v5716_v36 = vadd.f32 %v5614_v42, %v613_v35  ;;  %v3966_v52 = vpop.f32.mrb[18].mxu0  ;;  %4007 = vmatprep.mubr.bf16.mxu1 %v714_v26 }
 0x28a   :  { %6879 = vst [vmem:[#allocation49_spill] sm:$0xff] %v5713_v49  ;;  %v5719_v53 = vadd.f32 %v3966_v52, %v5614_v42  ;;  %v616_v57 = vpop.f32.mrb[19].mxu0  ;;  %4008 = vmatmul.mubr.bf16.gmra.mrb[12].mxu1 %v715_v38  ;;  %v6787_v47 = vmax.f32 %v5713_v49, 0.0 }
 0x28b   :  { %6880 = vst [vmem:[#allocation50_spill] sm:$0xff] %v5716_v36  ;;  %v5722_v62 = vadd.f32 %v5614_v42, %v616_v57  ;;  %v6781_v4 = vmax.f32 %v5716_v36, 0.0 }
 0x28c   :  { %6881 = vst [vmem:[#allocation51_spill] sm:$0xff] %v5719_v53  ;;  %v6786_v50 = vmax.f32 %v5719_v53, 0.0 }
 0x28d   :  { %6882 = vst [vmem:[#allocation52_spill] sm:$0xff] %v5722_v62  ;;  %v6776_v8 = vmax.f32 %v5722_v62, 0.0  ;;  %v4501_v62 = vld [vmem:[#allocation19 + $0x18] sm:$0xff]  }
 0x28e   :  { %v717_v21 = vpack.c.bf16 %v6786_v50, %v6787_v47 }
 0x28f   :  { %v716_v13 = vpack.c.bf16 %v6776_v8, %v6781_v4  ;;  %v3969_v17 = vpop.f32.mrb[20].mxu0  ;;  %v4493_v4 = vld [vmem:[#allocation16 + $0x18] sm:$0xff]  }
 0x290   :  { %v5737_v22 = vadd.f32 %v3969_v17, %v5614_v42  ;;  %v629_v25 = vpop.f32.mrb[21].mxu0 }
 0x291   :  { %v5740_v28 = vadd.f32 %v5614_v42, %v629_v25  ;;  %v3970_v61 = vpop.f32.mrb[22].mxu0  ;;  %4011 = vmatprep.mubr.bf16.mxu1 %v716_v13 }
 0x292   :  { %6883 = vst [vmem:[#allocation53_spill] sm:$0xff] %v5737_v22  ;;  %v5743_v30 = vadd.f32 %v3970_v61, %v5614_v42  ;;  %v632_v37 = vpop.f32.mrb[23].mxu0  ;;  %4012 = vmatmul.mubr.bf16.gmra.mrb[16].mxu1 %v717_v21  ;;  %v6775_v6 = vmax.f32 %v5737_v22, 0.0 }
 0x293   :  { %6884 = vst [vmem:[#allocation54_spill] sm:$0xff] %v5740_v28  ;;  %v5746_v39 = vadd.f32 %v5614_v42, %v632_v37  ;;  %v6773_v41 = vmax.f32 %v5740_v28, 0.0 }
 0x294   :  { %6885 = vst [vmem:[#allocation55_spill] sm:$0xff] %v5743_v30  ;;  %v6774_v40 = vmax.f32 %v5743_v30, 0.0 }
 0x295   :  { %6886 = vst [vmem:[#allocation56_spill] sm:$0xff] %v5746_v39  ;;  %v6772_v44 = vmax.f32 %v5746_v39, 0.0 }
 0x296   :  { %v719_v38 = vpack.c.bf16 %v6774_v40, %v6775_v6 }
 0x297   :  { %v718_v26 = vpack.c.bf16 %v6772_v44, %v6773_v41  ;;  %v3973_v32 = vpop.f32.mrb[24].mxu0 }
 0x298   :  { %v5761_v35 = vadd.f32 %v3973_v32, %v5614_v42  ;;  %v645_v52 = vpop.f32.mrb[25].mxu0 }
 0x299   :  { %v5764_v57 = vadd.f32 %v5614_v42, %v645_v52  ;;  %v3974_v13 = vpop.f32.mrb[26].mxu0  ;;  %4015 = vmatprep.mubr.bf16.mxu1 %v718_v26 }
 0x29a   :  { %6887 = vst [vmem:[#allocation57_spill] sm:$0xff] %v5761_v35  ;;  %v5767_v17 = vadd.f32 %v3974_v13, %v5614_v42  ;;  %v648_v21 = vpop.f32.mrb[27].mxu0  ;;  %4016 = vmatmul.mubr.bf16.gmra.mrb[20].mxu1 %v719_v38  ;;  %v6780_v61 = vmax.f32 %v5761_v35, 0.0 }
 0x29b   :  { %6888 = vst [vmem:[#allocation58_spill] sm:$0xff] %v5764_v57  ;;  %v5770_v25 = vadd.f32 %v5614_v42, %v648_v21  ;;  %v6778_v32 = vmax.f32 %v5764_v57, 0.0 }
 0x29c   :  { %6889 = vst [vmem:[#allocation59_spill] sm:$0xff] %v5767_v17  ;;  %v6779_v37 = vmax.f32 %v5767_v17, 0.0 }
 0x29d   :  { %6890 = vst [vmem:[#allocation60_spill] sm:$0xff] %v5770_v25  ;;  %v6777_v44 = vmax.f32 %v5770_v25, 0.0 }
 0x29e   :  { %v721_v38 = vpack.c.bf16 %v6779_v37, %v6780_v61 }
 0x29f   :  { %v720_v26 = vpack.c.bf16 %v6777_v44, %v6778_v32  ;;  %v3977_v52 = vpop.f32.mrb[28].mxu0 }
 0x2a0   :  { %v5785_v13 = vadd.f32 %v3977_v52, %v5614_v42  ;;  %v661_v21 = vpop.f32.mrb[29].mxu0 }
 0x2a1   :  { %v5788_v41 = vadd.f32 %v5614_v42, %v661_v21  ;;  %v3978_v40 = vpop.f32.mrb[30].mxu0  ;;  %4019 = vmatprep.mubr.bf16.mxu1 %v720_v26  ;;  %v4492_v21 = vld [vmem:[#allocation16 + $0x10] sm:$0xff]  }
 0x2a2   :  { %6891 = vst [vmem:[#allocation61_spill] sm:$0xff] %v5785_v13  ;;  %v5791_v6 = vadd.f32 %v3978_v40, %v5614_v42  ;;  %v664_v8 = vpop.f32.mrb[31].mxu0  ;;  %4020 = vmatmul.mubr.bf16.gmra.mrb[24].mxu1 %v721_v38  ;;  %v6785_v32 = vmax.f32 %v5785_v13, 0.0  ;;  %v4491_v38 = vld [vmem:[#allocation16 + $0x8] sm:$0xff]  }
 0x2a3   :  { %6892 = vst [vmem:[#allocation62_spill] sm:$0xff] %v5788_v41  ;;  %v5794_v44 = vadd.f32 %v5614_v42, %v664_v8  ;;  %v6783_v52 = vmax.f32 %v5788_v41, 0.0  ;;  %v4489_v42 = vld [vmem:[#allocation13 + $0x38] sm:$0xff]   ;;  %v4490_v8 = vld [vmem:[#allocation16] sm:$0xff]  }
 0x2a4   :  { %6893 = vst [vmem:[#allocation63_spill] sm:$0xff] %v5791_v6  ;;  %v6784_v37 = vmax.f32 %v5791_v6, 0.0  ;;  %4041 = vmatprep.subr.bf16.mxu0 %v4489_v42  ;;  %4075 = vmatprep.subr.bf16.mxu1 %v4490_v8 }
 0x2a5   :  { %6894 = vst [vmem:[#allocation64_spill] sm:$0xff] %v5794_v44  ;;  %v6782_v61 = vmax.f32 %v5794_v44, 0.0  ;;  %4042 = vmatpush3.bf16.msra.mxu0 %v4489_v42  ;;  %4076 = vmatpush3.bf16.msra.mxu1 %v4490_v8 }
 0x2a6   :  { %v723_v40 = vpack.c.bf16 %v6784_v37, %v6785_v32  ;;  %4077 = vmatprep.subr.bf16.mxu1 %v4491_v38 }
 0x2a7   :  { %v722_v26 = vpack.c.bf16 %v6782_v61, %v6783_v52  ;;  %v4494_v61 = vld [vmem:[#allocation16 + $0x20] sm:$0xff]   ;;  %v4495_v52 = vld [vmem:[#allocation16 + $0x28] sm:$0xff]  }
 0x2a9   :  { %4023 = vmatprep.mubr.bf16.mxu1 %v722_v26  ;;  %4078 = vmatpush3.bf16.msra.mxu1 %v4491_v38  ;;  %v4496_v26 = vld [vmem:[#allocation16 + $0x30] sm:$0xff]  }
 0x2aa   :  { %4024 = vmatmul.mubr.bf16.gmra.mrb[28].mxu1 %v723_v40  ;;  %4079 = vmatprep.subr.bf16.mxu1 %v4492_v21  ;;  %v5808_v40 = vld [vmem:[#allocation11] ss:$0 sm:$0xff] }
 0x2ad   :  { %4080 = vmatpush3.bf16.msra.mxu1 %v4492_v21 }
 0x2ae   :  { %4081 = vmatprep.subr.bf16.mxu1 %v4493_v4 }
 0x2b1   :  { %4082 = vmatpush3.bf16.msra.mxu1 %v4493_v4 }
 0x2b2   :  { %4083 = vmatprep.subr.bf16.mxu1 %v4494_v61 }
 0x2b5   :  { %4084 = vmatpush3.bf16.msra.mxu1 %v4494_v61 }
 0x2b6   :  { %4085 = vmatprep.subr.bf16.mxu1 %v4495_v52 }
 0x2b9   :  { %4086 = vmatpush3.bf16.msra.mxu1 %v4495_v52 }
 0x2ba   :  { %4087 = vmatprep.subr.bf16.mxu1 %v4496_v26 }
 0x2bd   :  { %4088 = vmatpush3.bf16.msra.mxu1 %v4496_v26 }
 0x345   :  { %v3997_v42 = vpop.f32.mrb[0].mxu1 }
 0x346   :  { %v829_v8 = vpop.f32.mrb[1].mxu1  ;;  %v5814_v21 = vadd.f32 %v3997_v42, %v5808_v40 }
 0x347   :  { %v5811_v38 = vadd.f32 %v5808_v40, %v829_v8  ;;  %v3998_v37 = vpop.f32.mrb[2].mxu1 }
 0x348   :  { %v5817_v4 = vadd.f32 %v3998_v37, %v5808_v40  ;;  %v832_v61 = vpop.f32.mrb[3].mxu1  ;;  %v6815_v8 = vmax.f32 %v5814_v21, 0.0 }
 0x349   :  { %v5820_v32 = vadd.f32 %v5808_v40, %v832_v61  ;;  %v6813_v26 = vmax.f32 %v5811_v38, 0.0 }
 0x34a   :  { %v6814_v52 = vmax.f32 %v5817_v4, 0.0 }
 0x34b   :  { %v6812_v50 = vmax.f32 %v5820_v32, 0.0 }
 0x34c   :  { %v989_v37 = vpack.c.bf16 %v6814_v52, %v6815_v8 }
 0x34d   :  { %v988_v42 = vpack.c.bf16 %v6812_v50, %v6813_v26  ;;  %v4001_v47 = vpop.f32.mrb[4].mxu1 }
 0x34e   :  { %v845_v61 = vpop.f32.mrb[5].mxu1  ;;  %v5838_v20 = vadd.f32 %v4001_v47, %v5808_v40 }
 0x34f   :  { %v5835_v24 = vadd.f32 %v5808_v40, %v845_v61  ;;  %v4002_v23 = vpop.f32.mrb[6].mxu1  ;;  %4043 = vmatprep.mubr.bf16.mxu0 %v988_v42 }
 0x350   :  { %v5841_v48 = vadd.f32 %v4002_v23, %v5808_v40  ;;  %v848_v34 = vpop.f32.mrb[7].mxu1  ;;  %4044 = vmatmul.mubr.bf16.vlgmr.msra.gmra.mrb[32].mxu0 %v989_v37  ;;  %v6807_v18 = vmax.f32 %v5838_v20, 0.0 }
 0x351   :  { %v5844_v33 = vadd.f32 %v5808_v40, %v848_v34  ;;  %v6805_v31 = vmax.f32 %v5835_v24, 0.0 }
 0x352   :  { %v6806_v5 = vmax.f32 %v5841_v48, 0.0 }
 0x353   :  { %v6804_v61 = vmax.f32 %v5844_v33, 0.0 }
 0x354   :  { %v991_v34 = vpack.c.bf16 %v6806_v5, %v6807_v18 }
 0x355   :  { %v990_v47 = vpack.c.bf16 %v6804_v61, %v6805_v31  ;;  %v4005_v23 = vpop.f32.mrb[8].mxu1 }
 0x356   :  { %v861_v42 = vpop.f32.mrb[9].mxu1  ;;  %v5862_v55 = vadd.f32 %v4005_v23, %v5808_v40 }
 0x357   :  { %v5859_v37 = vadd.f32 %v5808_v40, %v861_v42  ;;  %v4006_v60 = vpop.f32.mrb[10].mxu1  ;;  %4047 = vmatprep.mubr.bf16.mxu0 %v990_v47 }
 0x358   :  { %v5865_v54 = vadd.f32 %v4006_v60, %v5808_v40  ;;  %v864_v43 = vpop.f32.mrb[11].mxu1  ;;  %4048 = vmatmul.mubr.bf16.gmra.mrb[36].mxu0 %v991_v34  ;;  %v6811_v12 = vmax.f32 %v5862_v55, 0.0 }
 0x359   :  { %v5868_v1 = vadd.f32 %v5808_v40, %v864_v43  ;;  %v6809_v46 = vmax.f32 %v5859_v37, 0.0 }
 0x35a   :  { %v6810_v0 = vmax.f32 %v5865_v54, 0.0 }
 0x35b   :  { %v6808_v42 = vmax.f32 %v5868_v1, 0.0 }
 0x35c   :  { %v993_v43 = vpack.c.bf16 %v6810_v0, %v6811_v12 }
 0x35d   :  { %v992_v47 = vpack.c.bf16 %v6808_v42, %v6809_v46  ;;  %v4009_v60 = vpop.f32.mrb[12].mxu1 }
 0x35e   :  { %v877_v23 = vpop.f32.mrb[13].mxu1  ;;  %v5886_v31 = vadd.f32 %v4009_v60, %v5808_v40 }
 0x35f   :  { %v5883_v34 = vadd.f32 %v5808_v40, %v877_v23  ;;  %v4010_v61 = vpop.f32.mrb[14].mxu1  ;;  %4051 = vmatprep.mubr.bf16.mxu0 %v992_v47 }
 0x360   :  { %v5889_v5 = vadd.f32 %v4010_v61, %v5808_v40  ;;  %v880_v18 = vpop.f32.mrb[15].mxu1  ;;  %4052 = vmatmul.mubr.bf16.gmra.mrb[40].mxu0 %v993_v43  ;;  %v6819_v12 = vmax.f32 %v5886_v31, 0.0 }
 0x361   :  { %v5892_v42 = vadd.f32 %v5808_v40, %v880_v18  ;;  %v6817_v0 = vmax.f32 %v5883_v34, 0.0 }
 0x362   :  { %v6818_v46 = vmax.f32 %v5889_v5, 0.0 }
 0x363   :  { %v6816_v23 = vmax.f32 %v5892_v42, 0.0 }
 0x364   :  { %v995_v18 = vpack.c.bf16 %v6818_v46, %v6819_v12 }
 0x365   :  { %v994_v47 = vpack.c.bf16 %v6816_v23, %v6817_v0  ;;  %v4013_v61 = vpop.f32.mrb[16].mxu1 }
 0x366   :  { %v893_v60 = vpop.f32.mrb[17].mxu1  ;;  %v5910_v26 = vadd.f32 %v4013_v61, %v5808_v40 }
 0x367   :  { %v5907_v43 = vadd.f32 %v5808_v40, %v893_v60  ;;  %v4014_v50 = vpop.f32.mrb[18].mxu1  ;;  %4055 = vmatprep.mubr.bf16.mxu0 %v994_v47 }
 0x368   :  { %v5913_v52 = vadd.f32 %v4014_v50, %v5808_v40  ;;  %v896_v8 = vpop.f32.mrb[19].mxu1  ;;  %4056 = vmatmul.mubr.bf16.gmra.mrb[44].mxu0 %v995_v18  ;;  %v6827_v12 = vmax.f32 %v5910_v26, 0.0 }
 0x369   :  { %v5916_v23 = vadd.f32 %v5808_v40, %v896_v8  ;;  %v6825_v46 = vmax.f32 %v5907_v43, 0.0 }
 0x36a   :  { %v6826_v0 = vmax.f32 %v5913_v52, 0.0 }
 0x36b   :  { %v6824_v60 = vmax.f32 %v5916_v23, 0.0 }
 0x36c   :  { %v997_v8 = vpack.c.bf16 %v6826_v0, %v6827_v12 }
 0x36d   :  { %v996_v47 = vpack.c.bf16 %v6824_v60, %v6825_v46  ;;  %v4017_v50 = vpop.f32.mrb[20].mxu1 }
 0x36e   :  { %v909_v61 = vpop.f32.mrb[21].mxu1  ;;  %v5934_v41 = vadd.f32 %v4017_v50, %v5808_v40 }
 0x36f   :  { %v5931_v18 = vadd.f32 %v5808_v40, %v909_v61  ;;  %v4018_v44 = vpop.f32.mrb[22].mxu1  ;;  %4059 = vmatprep.mubr.bf16.mxu0 %v996_v47 }
 0x370   :  { %v5937_v6 = vadd.f32 %v4018_v44, %v5808_v40  ;;  %v912_v13 = vpop.f32.mrb[23].mxu1  ;;  %4060 = vmatmul.mubr.bf16.gmra.mrb[48].mxu0 %v997_v8  ;;  %v6835_v12 = vmax.f32 %v5934_v41, 0.0 }
 0x371   :  { %v5940_v60 = vadd.f32 %v5808_v40, %v912_v13  ;;  %v6833_v0 = vmax.f32 %v5931_v18, 0.0 }
 0x372   :  { %v6834_v46 = vmax.f32 %v5937_v6, 0.0 }
 0x373   :  { %v6832_v61 = vmax.f32 %v5940_v60, 0.0 }
 0x374   :  { %v999_v13 = vpack.c.bf16 %v6834_v46, %v6835_v12 }
 0x375   :  { %v998_v47 = vpack.c.bf16 %v6832_v61, %v6833_v0  ;;  %v4021_v44 = vpop.f32.mrb[24].mxu1 }
 0x376   :  { %v925_v50 = vpop.f32.mrb[25].mxu1  ;;  %v5958_v57 = vadd.f32 %v4021_v44, %v5808_v40 }
 0x377   :  { %v5955_v8 = vadd.f32 %v5808_v40, %v925_v50  ;;  %v4022_v25 = vpop.f32.mrb[26].mxu1  ;;  %4063 = vmatprep.mubr.bf16.mxu0 %v998_v47 }
 0x378   :  { %v5961_v17 = vadd.f32 %v4022_v25, %v5808_v40  ;;  %v928_v35 = vpop.f32.mrb[27].mxu1  ;;  %4064 = vmatmul.mubr.bf16.gmra.mrb[52].mxu0 %v999_v13  ;;  %v6843_v12 = vmax.f32 %v5958_v57, 0.0 }
 0x379   :  { %v5964_v61 = vadd.f32 %v5808_v40, %v928_v35  ;;  %v6841_v46 = vmax.f32 %v5955_v8, 0.0 }
 0x37a   :  { %v6842_v0 = vmax.f32 %v5961_v17, 0.0 }
 0x37b   :  { %v6840_v50 = vmax.f32 %v5964_v61, 0.0 }
 0x37c   :  { %v1001_v35 = vpack.c.bf16 %v6842_v0, %v6843_v12 }
 0x37d   :  { %v1000_v47 = vpack.c.bf16 %v6840_v50, %v6841_v46  ;;  %v4025_v25 = vpop.f32.mrb[28].mxu1 }
 0x37e   :  { %v941_v44 = vpop.f32.mrb[29].mxu1  ;;  %v5982_v28 = vadd.f32 %v4025_v25, %v5808_v40  ;;  %v4499_v25 = vld [vmem:[#allocation19 + $0x8] sm:$0xff]  }
 0x37f   :  { %v5979_v13 = vadd.f32 %v5808_v40, %v941_v44  ;;  %v4026_v39 = vpop.f32.mrb[30].mxu1  ;;  %4067 = vmatprep.mubr.bf16.mxu0 %v1000_v47 }
 0x380   :  { %v5985_v30 = vadd.f32 %v4026_v39, %v5808_v40  ;;  %v944_v22 = vpop.f32.mrb[31].mxu1  ;;  %4068 = vmatmul.mubr.bf16.gmra.mrb[56].mxu0 %v1001_v35  ;;  %v6848_v12 = vmax.f32 %v5982_v28, 0.0  ;;  %v4500_v35 = vld [vmem:[#allocation19 + $0x10] sm:$0xff]  }
 0x381   :  { %v5988_v50 = vadd.f32 %v5808_v40, %v944_v22  ;;  %v6846_v0 = vmax.f32 %v5979_v13, 0.0  ;;  %v4497_v22 = vld [vmem:[#allocation16 + $0x38] sm:$0xff]   ;;  %v4498_v40 = vld [vmem:[#allocation19] sm:$0xff]  }
 0x382   :  { %v6847_v46 = vmax.f32 %v5985_v30, 0.0  ;;  %4089 = vmatprep.subr.bf16.mxu1 %v4497_v22  ;;  %4123 = vmatprep.subr.bf16.mxu0 %v4498_v40 }
 0x383   :  { %v6845_v44 = vmax.f32 %v5988_v50, 0.0  ;;  %4090 = vmatpush3.bf16.msra.mxu1 %v4497_v22  ;;  %4124 = vmatpush3.bf16.msra.mxu0 %v4498_v40 }
 0x384   :  { %v1003_v39 = vpack.c.bf16 %v6847_v46, %v6848_v12  ;;  %4125 = vmatprep.subr.bf16.mxu0 %v4499_v25 }
 0x385   :  { %v1002_v47 = vpack.c.bf16 %v6845_v44, %v6846_v0  ;;  %v4502_v44 = vld [vmem:[#allocation19 + $0x20] sm:$0xff]   ;;  %v4503_v0 = vld [vmem:[#allocation19 + $0x28] sm:$0xff]  }
 0x387   :  { %4071 = vmatprep.mubr.bf16.mxu0 %v1002_v47  ;;  %4126 = vmatpush3.bf16.msra.mxu0 %v4499_v25  ;;  %v4504_v47 = vld [vmem:[#allocation19 + $0x30] sm:$0xff]  }
 0x388   :  { %4072 = vmatmul.mubr.bf16.gmra.mrb[60].mxu0 %v1003_v39  ;;  %4127 = vmatprep.subr.bf16.mxu0 %v4500_v35  ;;  %v6002_v39 = vld [vmem:[#allocation14] ss:$0 sm:$0xff] }
 0x38b   :  { %4128 = vmatpush3.bf16.msra.mxu0 %v4500_v35 }
 0x38c   :  { %4129 = vmatprep.subr.bf16.mxu0 %v4501_v62 }
 0x38f   :  { %4130 = vmatpush3.bf16.msra.mxu0 %v4501_v62 }
 0x390   :  { %4131 = vmatprep.subr.bf16.mxu0 %v4502_v44 }
 0x393   :  { %4132 = vmatpush3.bf16.msra.mxu0 %v4502_v44 }
 0x394   :  { %4133 = vmatprep.subr.bf16.mxu0 %v4503_v0 }
 0x397   :  { %4134 = vmatpush3.bf16.msra.mxu0 %v4503_v0 }
 0x398   :  { %4135 = vmatprep.subr.bf16.mxu0 %v4504_v47 }
 0x39b   :  { %4136 = vmatpush3.bf16.msra.mxu0 %v4504_v47 }
 0x423   :  { %v4045_v22 = vpop.f32.mrb[32].mxu0 }
 0x424   :  { %v1118_v40 = vadd.f32 %v4045_v22, %v6002_v39  ;;  %v1109_v25 = vpop.f32.mrb[33].mxu0 }
 0x425   :  { %v1110_v46 = vadd.f32 %v6002_v39, %v1109_v25  ;;  %v4046_v35 = vpop.f32.mrb[34].mxu0 }
 0x426   :  { %v1121_v12 = vadd.f32 %v4046_v35, %v6002_v39  ;;  %v1112_v62 = vpop.f32.mrb[35].mxu0  ;;  %v1238_v44 = vmax.f32 %v1118_v40, 0.0 }
 0x427   :  { %v1113_v36 = vadd.f32 %v6002_v39, %v1112_v62  ;;  %v1236_v49 = vmax.f32 %v1110_v46, 0.0 }
 0x428   :  { %v1239_v53 = vmax.f32 %v1121_v12, 0.0 }
 0x429   :  { %v1237_v0 = vmax.f32 %v1113_v36, 0.0 }
 0x42a   :  { %v1269_v45 = vpack.c.bf16 %v1239_v53, %v1238_v44 }
 0x42b   :  { %v1268_v47 = vpack.c.bf16 %v1237_v0, %v1236_v49  ;;  %v4049_v15 = vpop.f32.mrb[36].mxu0 }
 0x42c   :  { %v1134_v19 = vadd.f32 %v4049_v15, %v6002_v39  ;;  %v1125_v14 = vpop.f32.mrb[37].mxu0 }
 0x42d   :  { %v1126_v22 = vadd.f32 %v6002_v39, %v1125_v14  ;;  %v4050_v3 = vpop.f32.mrb[38].mxu0  ;;  %4091 = vmatprep.mubr.bf16.mxu1 %v1268_v47 }
 0x42e   :  { %v1137_v25 = vadd.f32 %v4050_v3, %v6002_v39  ;;  %v1128_v35 = vpop.f32.mrb[39].mxu0  ;;  %4092 = vmatmul.mubr.bf16.vlgmr.msra.gmra.mrb[32].mxu1 %v1269_v45  ;;  %v1242_v40 = vmax.f32 %v1134_v19, 0.0 }
 0x42f   :  { %v1129_v62 = vadd.f32 %v6002_v39, %v1128_v35  ;;  %v1240_v46 = vmax.f32 %v1126_v22, 0.0 }
 0x430   :  { %v1243_v12 = vmax.f32 %v1137_v25, 0.0 }
 0x431   :  { %v1241_v36 = vmax.f32 %v1129_v62, 0.0 }
 0x432   :  { %v1271_v53 = vpack.c.bf16 %v1243_v12, %v1242_v40 }
 0x433   :  { %v1270_v49 = vpack.c.bf16 %v1241_v36, %v1240_v46  ;;  %v4053_v44 = vpop.f32.mrb[40].mxu0 }
 0x434   :  { %v1150_v15 = vadd.f32 %v4053_v44, %v6002_v39  ;;  %v1141_v0 = vpop.f32.mrb[41].mxu0 }
 0x435   :  { %v1142_v14 = vadd.f32 %v6002_v39, %v1141_v0  ;;  %v4054_v29 = vpop.f32.mrb[42].mxu0  ;;  %4095 = vmatprep.mubr.bf16.mxu1 %v1270_v49 }
 0x436   :  { %v1153_v3 = vadd.f32 %v4054_v29, %v6002_v39  ;;  %v1144_v47 = vpop.f32.mrb[43].mxu0  ;;  %4096 = vmatmul.mubr.bf16.gmra.mrb[36].mxu1 %v1271_v53  ;;  %v1246_v19 = vmax.f32 %v1150_v15, 0.0 }
 0x437   :  { %v1145_v45 = vadd.f32 %v6002_v39, %v1144_v47  ;;  %v1244_v22 = vmax.f32 %v1142_v14, 0.0 }
 0x438   :  { %v1247_v25 = vmax.f32 %v1153_v3, 0.0 }
 0x439   :  { %v1245_v35 = vmax.f32 %v1145_v45, 0.0 }
 0x43a   :  { %v1273_v62 = vpack.c.bf16 %v1247_v25, %v1246_v19 }
 0x43b   :  { %v1272_v40 = vpack.c.bf16 %v1245_v35, %v1244_v22  ;;  %v4057_v12 = vpop.f32.mrb[44].mxu0 }
 0x43c   :  { %v1166_v46 = vadd.f32 %v4057_v12, %v6002_v39  ;;  %v1157_v36 = vpop.f32.mrb[45].mxu0 }
 0x43d   :  { %v1158_v44 = vadd.f32 %v6002_v39, %v1157_v36  ;;  %v4058_v0 = vpop.f32.mrb[46].mxu0  ;;  %4099 = vmatprep.mubr.bf16.mxu1 %v1272_v40 }
 0x43e   :  { %v1169_v29 = vadd.f32 %v4058_v0, %v6002_v39  ;;  %v1160_v49 = vpop.f32.mrb[47].mxu0  ;;  %4100 = vmatmul.mubr.bf16.gmra.mrb[40].mxu1 %v1273_v62  ;;  %v1250_v15 = vmax.f32 %v1166_v46, 0.0 }
 0x43f   :  { %v1161_v53 = vadd.f32 %v6002_v39, %v1160_v49  ;;  %v1248_v14 = vmax.f32 %v1158_v44, 0.0 }
 0x440   :  { %v1251_v3 = vmax.f32 %v1169_v29, 0.0 }
 0x441   :  { %v1249_v47 = vmax.f32 %v1161_v53, 0.0 }
 0x442   :  { %v1275_v45 = vpack.c.bf16 %v1251_v3, %v1250_v15 }
 0x443   :  { %v1274_v19 = vpack.c.bf16 %v1249_v47, %v1248_v14  ;;  %v4061_v25 = vpop.f32.mrb[48].mxu0 }
 0x444   :  { %v1182_v22 = vadd.f32 %v4061_v25, %v6002_v39  ;;  %v1173_v35 = vpop.f32.mrb[49].mxu0 }
 0x445   :  { %v1174_v12 = vadd.f32 %v6002_v39, %v1173_v35  ;;  %v4062_v36 = vpop.f32.mrb[50].mxu0  ;;  %4103 = vmatprep.mubr.bf16.mxu1 %v1274_v19 }
 0x446   :  { %v1185_v40 = vadd.f32 %v4062_v36, %v6002_v39  ;;  %v1176_v0 = vpop.f32.mrb[51].mxu0  ;;  %4104 = vmatmul.mubr.bf16.gmra.mrb[44].mxu1 %v1275_v45  ;;  %v1254_v46 = vmax.f32 %v1182_v22, 0.0 }
 0x447   :  { %v1177_v62 = vadd.f32 %v6002_v39, %v1176_v0  ;;  %v1252_v44 = vmax.f32 %v1174_v12, 0.0 }
 0x448   :  { %v1255_v29 = vmax.f32 %v1185_v40, 0.0 }
 0x449   :  { %v1253_v49 = vmax.f32 %v1177_v62, 0.0 }
 0x44a   :  { %v1277_v53 = vpack.c.bf16 %v1255_v29, %v1254_v46 }
 0x44b   :  { %v1276_v15 = vpack.c.bf16 %v1253_v49, %v1252_v44  ;;  %v4065_v3 = vpop.f32.mrb[52].mxu0 }
 0x44c   :  { %v1198_v14 = vadd.f32 %v4065_v3, %v6002_v39  ;;  %v1189_v47 = vpop.f32.mrb[53].mxu0 }
 0x44d   :  { %v1190_v25 = vadd.f32 %v6002_v39, %v1189_v47  ;;  %v4066_v35 = vpop.f32.mrb[54].mxu0  ;;  %4107 = vmatprep.mubr.bf16.mxu1 %v1276_v15 }
 0x44e   :  { %v1201_v19 = vadd.f32 %v4066_v35, %v6002_v39  ;;  %v1192_v36 = vpop.f32.mrb[55].mxu0  ;;  %4108 = vmatmul.mubr.bf16.gmra.mrb[48].mxu1 %v1277_v53  ;;  %v1258_v22 = vmax.f32 %v1198_v14, 0.0 }
 0x44f   :  { %v1193_v45 = vadd.f32 %v6002_v39, %v1192_v36  ;;  %v1256_v12 = vmax.f32 %v1190_v25, 0.0 }
 0x450   :  { %v1259_v40 = vmax.f32 %v1201_v19, 0.0 }
 0x451   :  { %v1257_v0 = vmax.f32 %v1193_v45, 0.0 }
 0x452   :  { %v1279_v62 = vpack.c.bf16 %v1259_v40, %v1258_v22 }
 0x453   :  { %v1278_v46 = vpack.c.bf16 %v1257_v0, %v1256_v12  ;;  %v4069_v29 = vpop.f32.mrb[56].mxu0 }
 0x454   :  { %v1214_v44 = vadd.f32 %v4069_v29, %v6002_v39  ;;  %v1205_v49 = vpop.f32.mrb[57].mxu0 }
 0x455   :  { %v1206_v3 = vadd.f32 %v6002_v39, %v1205_v49  ;;  %v4070_v47 = vpop.f32.mrb[58].mxu0  ;;  %4111 = vmatprep.mubr.bf16.mxu1 %v1278_v46 }
 0x456   :  { %v1217_v15 = vadd.f32 %v4070_v47, %v6002_v39  ;;  %v1208_v35 = vpop.f32.mrb[59].mxu0  ;;  %4112 = vmatmul.mubr.bf16.gmra.mrb[52].mxu1 %v1279_v62  ;;  %v1262_v14 = vmax.f32 %v1214_v44, 0.0 }
 0x457   :  { %v1209_v53 = vadd.f32 %v6002_v39, %v1208_v35  ;;  %v1260_v25 = vmax.f32 %v1206_v3, 0.0 }
 0x458   :  { %v1263_v19 = vmax.f32 %v1217_v15, 0.0 }
 0x459   :  { %v1261_v36 = vmax.f32 %v1209_v53, 0.0 }
 0x45a   :  { %v1281_v45 = vpack.c.bf16 %v1263_v19, %v1262_v14  ;;  %v4505_v19 = vld [vmem:[#allocation19 + $0x38] sm:$0xff]  }
 0x45b   :  { %v1280_v22 = vpack.c.bf16 %v1261_v36, %v1260_v25  ;;  %v4073_v40 = vpop.f32.mrb[60].mxu0  ;;  %4137 = vmatprep.subr.bf16.mxu0 %v4505_v19  ;;  %v4506_v25 = vld [vmem:[#allocation22] sm:$0xff]   ;;  %v4507_v36 = vld [vmem:[#allocation22 + $0x8] sm:$0xff]  }
 0x45c   :  { %v1230_v12 = vadd.f32 %v4073_v40, %v6002_v39  ;;  %v1221_v0 = vpop.f32.mrb[61].mxu0  ;;  %4138 = vmatpush3.bf16.msra.mxu0 %v4505_v19  ;;  %4171 = vmatprep.subr.bf16.mxu1 %v4506_v25  ;;  %v4511_v40 = vld [vmem:[#allocation22 + $0x28] sm:$0xff]  }
 0x45d   :  { %v1222_v29 = vadd.f32 %v6002_v39, %v1221_v0  ;;  %v4074_v49 = vpop.f32.mrb[62].mxu0  ;;  %4115 = vmatprep.mubr.bf16.mxu1 %v1280_v22  ;;  %4172 = vmatpush3.bf16.msra.mxu1 %v4506_v25  ;;  %v4508_v22 = vld [vmem:[#allocation22 + $0x10] sm:$0xff]   ;;  %v6036_v0 = vld [vmem:[#allocation17] ss:$0 sm:$0xff]  ;;  %v6895_v25 = vmax.f32 %v5814_v21, 0.0 }
 0x45e   :  { %v1233_v46 = vadd.f32 %v4074_v49, %v6002_v39  ;;  %v1224_v47 = vpop.f32.mrb[63].mxu0  ;;  %4116 = vmatmul.mubr.bf16.gmra.mrb[56].mxu1 %v1281_v45  ;;  %v1266_v44 = vmax.f32 %v1230_v12, 0.0  ;;  %4173 = vmatprep.subr.bf16.mxu1 %v4507_v36  ;;  %v4510_v45 = vld [vmem:[#allocation22 + $0x20] sm:$0xff]   ;;  %v4512_v12 = vld [vmem:[#allocation22 + $0x30] sm:$0xff]  }
 0x45f   :  { %v1225_v62 = vadd.f32 %v6002_v39, %v1224_v47  ;;  %v1264_v3 = vmax.f32 %v1222_v29, 0.0  ;;  %v4509_v39 = vld [vmem:[#allocation22 + $0x18] sm:$0xff]  }
 0x460   :  { %v1267_v15 = vmax.f32 %v1233_v46, 0.0 }
 0x461   :  { %v1265_v35 = vmax.f32 %v1225_v62, 0.0  ;;  %4174 = vmatpush3.bf16.msra.mxu1 %v4507_v36 }
 0x462   :  { %v1283_v53 = vpack.c.bf16 %v1267_v15, %v1266_v44  ;;  %4175 = vmatprep.subr.bf16.mxu1 %v4508_v22 }
 0x463   :  { %v1282_v14 = vpack.c.bf16 %v1265_v35, %v1264_v3 }
 0x465   :  { %4119 = vmatprep.mubr.bf16.mxu1 %v1282_v14  ;;  %4176 = vmatpush3.bf16.msra.mxu1 %v4508_v22  ;;  %v6896_v22 = vmax.f32 %v5817_v4, 0.0 }
 0x466   :  { %4120 = vmatmul.mubr.bf16.gmra.mrb[60].mxu1 %v1283_v53  ;;  %4177 = vmatprep.subr.bf16.mxu1 %v4509_v39 }
 0x469   :  { %4178 = vmatpush3.bf16.msra.mxu1 %v4509_v39 }
 0x46a   :  { %4179 = vmatprep.subr.bf16.mxu1 %v4510_v45 }
 0x46d   :  { %4180 = vmatpush3.bf16.msra.mxu1 %v4510_v45  ;;  %v6897_v45 = vmax.f32 %v5811_v38, 0.0 }
 0x46e   :  { %4181 = vmatprep.subr.bf16.mxu1 %v4511_v40 }
 0x471   :  { %4182 = vmatpush3.bf16.msra.mxu1 %v4511_v40 }
 0x472   :  { %4183 = vmatprep.subr.bf16.mxu1 %v4512_v12 }
 0x475   :  { %4184 = vmatpush3.bf16.msra.mxu1 %v4512_v12  ;;  %v6898_v12 = vmax.f32 %v5820_v32, 0.0 }
 0x501   :  { %v4093_v29 = vpop.f32.mrb[32].mxu1 }
 0x502   :  { %v1398_v49 = vadd.f32 %v4093_v29, %v6036_v0  ;;  %v1389_v46 = vpop.f32.mrb[33].mxu1 }
 0x503   :  { %v1390_v47 = vadd.f32 %v6036_v0, %v1389_v46  ;;  %v4094_v62 = vpop.f32.mrb[34].mxu1 }
 0x504   :  { %v1518_v44 = vmax.f32 %v1398_v49, 0.0  ;;  %v1401_v15 = vadd.f32 %v4094_v62, %v6036_v0  ;;  %v1392_v3 = vpop.f32.mrb[35].mxu1 }
 0x505   :  { %v1516_v35 = vmax.f32 %v1390_v47, 0.0  ;;  %v1393_v53 = vadd.f32 %v6036_v0, %v1392_v3 }
 0x506   :  { %v1519_v14 = vmax.f32 %v1401_v15, 0.0  ;;  %v1550_v36 = vadd.f32 %v1518_v44, %v6895_v25 }
 0x507   :  { %v1517_v19 = vmax.f32 %v1393_v53, 0.0  ;;  %v1548_v40 = vadd.f32 %v1516_v35, %v6897_v45 }
 0x508   :  { %v1551_v39 = vadd.f32 %v1519_v14, %v6896_v22 }
 0x509   :  { %v1549_v29 = vadd.f32 %v1517_v19, %v6898_v12  ;;  %v4097_v49 = vpop.f32.mrb[36].mxu1  ;;  %v6899_v19 = vmax.f32 %v5838_v20, 0.0 }
 0x50a   :  { %v1581_v46 = vpack.c.bf16 %v1551_v39, %v1550_v36  ;;  %v1414_v47 = vadd.f32 %v4097_v49, %v6036_v0  ;;  %v1405_v62 = vpop.f32.mrb[37].mxu1  ;;  %v6900_v36 = vmax.f32 %v5841_v48, 0.0  ;;  %v6901_v39 = vmax.f32 %v5835_v24, 0.0 }
 0x50b   :  { %v1406_v15 = vadd.f32 %v6036_v0, %v1405_v62  ;;  %v4098_v3 = vpop.f32.mrb[38].mxu1  ;;  %v1580_v53 = vpack.c.bf16 %v1549_v29, %v1548_v40  ;;  %v6902_v40 = vmax.f32 %v5844_v33, 0.0 }
 0x50c   :  { %v1522_v21 = vmax.f32 %v1414_v47, 0.0  ;;  %v1417_v44 = vadd.f32 %v4098_v3, %v6036_v0  ;;  %v1408_v4 = vpop.f32.mrb[39].mxu1 }
 0x50d   :  { %v1520_v14 = vmax.f32 %v1406_v15, 0.0  ;;  %v1409_v38 = vadd.f32 %v6036_v0, %v1408_v4  ;;  %4139 = vmatprep.mubr.bf16.mxu0 %v1580_v53  ;;  %v6903_v4 = vmax.f32 %v5862_v55, 0.0 }
 0x50e   :  { %v1523_v35 = vmax.f32 %v1417_v44, 0.0  ;;  %4140 = vmatmul.mubr.bf16.vlgmr.msra.gmra.mrb[64].mxu0 %v1581_v46  ;;  %v1554_v25 = vadd.f32 %v1522_v21, %v6899_v19 }
 0x50f   :  { %v1521_v32 = vmax.f32 %v1409_v38, 0.0  ;;  %v1552_v45 = vadd.f32 %v1520_v14, %v6901_v39  ;;  %v6904_v38 = vmax.f32 %v5865_v54, 0.0 }
 0x510   :  { %v1555_v22 = vadd.f32 %v1523_v35, %v6900_v36 }
 0x511   :  { %v1553_v12 = vadd.f32 %v1521_v32, %v6902_v40  ;;  %v4101_v29 = vpop.f32.mrb[40].mxu1  ;;  %v6905_v32 = vmax.f32 %v5859_v37, 0.0 }
 0x512   :  { %v1430_v49 = vadd.f32 %v4101_v29, %v6036_v0  ;;  %v1421_v47 = vpop.f32.mrb[41].mxu1  ;;  %v1583_v62 = vpack.c.bf16 %v1555_v22, %v1554_v25  ;;  %v6906_v25 = vmax.f32 %v5868_v1, 0.0 }
 0x513   :  { %v1422_v46 = vadd.f32 %v6036_v0, %v1421_v47  ;;  %v4102_v15 = vpop.f32.mrb[42].mxu1  ;;  %v1582_v3 = vpack.c.bf16 %v1553_v12, %v1552_v45 }
 0x514   :  { %v1526_v20 = vmax.f32 %v1430_v49, 0.0  ;;  %v1433_v53 = vadd.f32 %v4102_v15, %v6036_v0  ;;  %v1424_v48 = vpop.f32.mrb[43].mxu1  ;;  %v6907_v15 = vmax.f32 %v5886_v31, 0.0 }
 0x515   :  { %v1524_v21 = vmax.f32 %v1422_v46, 0.0  ;;  %v1425_v24 = vadd.f32 %v6036_v0, %v1424_v48  ;;  %4143 = vmatprep.mubr.bf16.mxu0 %v1582_v3  ;;  %v6909_v48 = vmax.f32 %v5883_v34, 0.0 }
 0x516   :  { %v1527_v44 = vmax.f32 %v1433_v53, 0.0  ;;  %4144 = vmatmul.mubr.bf16.gmra.mrb[68].mxu0 %v1583_v62  ;;  %v1558_v14 = vadd.f32 %v1526_v20, %v6903_v4  ;;  %v6908_v20 = vmax.f32 %v5889_v5, 0.0 }
 0x517   :  { %v1525_v33 = vmax.f32 %v1425_v24, 0.0  ;;  %v1556_v19 = vadd.f32 %v1524_v21, %v6905_v32  ;;  %v6910_v24 = vmax.f32 %v5892_v42, 0.0 }
 0x518   :  { %v1559_v35 = vadd.f32 %v1527_v44, %v6904_v38 }
 0x519   :  { %v1557_v36 = vadd.f32 %v1525_v33, %v6906_v25  ;;  %v4105_v22 = vpop.f32.mrb[44].mxu1 }
 0x51a   :  { %v1446_v39 = vadd.f32 %v4105_v22, %v6036_v0  ;;  %v1437_v45 = vpop.f32.mrb[45].mxu1  ;;  %v1585_v40 = vpack.c.bf16 %v1559_v35, %v1558_v14 }
 0x51b   :  { %v1438_v12 = vadd.f32 %v6036_v0, %v1437_v45  ;;  %v4106_v29 = vpop.f32.mrb[46].mxu1  ;;  %v1584_v49 = vpack.c.bf16 %v1557_v36, %v1556_v19 }
 0x51c   :  { %v1530_v55 = vmax.f32 %v1446_v39, 0.0  ;;  %v1449_v47 = vadd.f32 %v4106_v29, %v6036_v0  ;;  %v1440_v54 = vpop.f32.mrb[47].mxu1  ;;  %v6911_v39 = vmax.f32 %v5910_v26, 0.0  ;;  %v6913_v29 = vmax.f32 %v5907_v43, 0.0 }
 0x51d   :  { %v1528_v62 = vmax.f32 %v1438_v12, 0.0  ;;  %v1441_v37 = vadd.f32 %v6036_v0, %v1440_v54  ;;  %4147 = vmatprep.mubr.bf16.mxu0 %v1584_v49 }
 0x51e   :  { %v1531_v46 = vmax.f32 %v1449_v47, 0.0  ;;  %4148 = vmatmul.mubr.bf16.gmra.mrb[72].mxu0 %v1585_v40  ;;  %v1562_v3 = vadd.f32 %v1530_v55, %v6907_v15  ;;  %v6912_v40 = vmax.f32 %v5913_v52, 0.0  ;;  %v6914_v55 = vmax.f32 %v5916_v23, 0.0 }
 0x51f   :  { %v1529_v1 = vmax.f32 %v1441_v37, 0.0  ;;  %v1560_v21 = vadd.f32 %v1528_v62, %v6909_v48 }
 0x520   :  { %v1563_v53 = vadd.f32 %v1531_v46, %v6908_v20 }
 0x521   :  { %v1561_v44 = vadd.f32 %v1529_v1, %v6910_v24  ;;  %v4109_v33 = vpop.f32.mrb[48].mxu1 }
 0x522   :  { %v1462_v4 = vadd.f32 %v4109_v33, %v6036_v0  ;;  %v1453_v14 = vpop.f32.mrb[49].mxu1  ;;  %v1587_v38 = vpack.c.bf16 %v1563_v53, %v1562_v3 }
 0x523   :  { %v1454_v35 = vadd.f32 %v6036_v0, %v1453_v14  ;;  %v4110_v32 = vpop.f32.mrb[50].mxu1  ;;  %v1586_v19 = vpack.c.bf16 %v1561_v44, %v1560_v21  ;;  %v6915_v21 = vmax.f32 %v5934_v41, 0.0  ;;  %v6916_v44 = vmax.f32 %v5937_v6, 0.0 }
 0x524   :  { %v1534_v31 = vmax.f32 %v1462_v4, 0.0  ;;  %v1465_v25 = vadd.f32 %v4110_v32, %v6036_v0  ;;  %v1456_v5 = vpop.f32.mrb[51].mxu1  ;;  %v6917_v4 = vmax.f32 %v5931_v18, 0.0 }
 0x525   :  { %v1532_v36 = vmax.f32 %v1454_v35, 0.0  ;;  %v1457_v34 = vadd.f32 %v6036_v0, %v1456_v5  ;;  %4151 = vmatprep.mubr.bf16.mxu0 %v1586_v19 }
 0x526   :  { %v1535_v22 = vmax.f32 %v1465_v25, 0.0  ;;  %4152 = vmatmul.mubr.bf16.gmra.mrb[76].mxu0 %v1587_v38  ;;  %v1566_v45 = vadd.f32 %v1534_v31, %v6911_v39  ;;  %v6918_v38 = vmax.f32 %v5940_v60, 0.0 }
 0x527   :  { %v1533_v42 = vmax.f32 %v1457_v34, 0.0  ;;  %v1564_v49 = vadd.f32 %v1532_v36, %v6913_v29 }
 0x528   :  { %v1567_v12 = vadd.f32 %v1535_v22, %v6912_v40 }
 0x529   :  { %v1565_v47 = vadd.f32 %v1533_v42, %v6914_v55  ;;  %v4113_v54 = vpop.f32.mrb[52].mxu1 }
 0x52a   :  { %v1478_v62 = vadd.f32 %v4113_v54, %v6036_v0  ;;  %v1469_v37 = vpop.f32.mrb[53].mxu1  ;;  %v1589_v46 = vpack.c.bf16 %v1567_v12, %v1566_v45  ;;  %v6919_v45 = vmax.f32 %v5958_v57, 0.0  ;;  %v6920_v12 = vmax.f32 %v5961_v17, 0.0 }
 0x52b   :  { %v1470_v1 = vadd.f32 %v6036_v0, %v1469_v37  ;;  %v4114_v15 = vpop.f32.mrb[54].mxu1  ;;  %v1588_v3 = vpack.c.bf16 %v1565_v47, %v1564_v49  ;;  %v6921_v49 = vmax.f32 %v5955_v8, 0.0  ;;  %v6922_v47 = vmax.f32 %v5964_v61, 0.0 }
 0x52c   :  { %v1538_v26 = vmax.f32 %v1478_v62, 0.0  ;;  %v1481_v20 = vadd.f32 %v4114_v15, %v6036_v0  ;;  %v1472_v52 = vpop.f32.mrb[55].mxu1 }
 0x52d   :  { %v1536_v53 = vmax.f32 %v1470_v1, 0.0  ;;  %v1473_v43 = vadd.f32 %v6036_v0, %v1472_v52  ;;  %4155 = vmatprep.mubr.bf16.mxu0 %v1588_v3 }
 0x52e   :  { %v1539_v48 = vmax.f32 %v1481_v20, 0.0  ;;  %4156 = vmatmul.mubr.bf16.gmra.mrb[80].mxu0 %v1589_v46  ;;  %v1570_v24 = vadd.f32 %v1538_v26, %v6915_v21 }
 0x52f   :  { %v1537_v23 = vmax.f32 %v1473_v43, 0.0  ;;  %v1568_v14 = vadd.f32 %v1536_v53, %v6917_v4  ;;  %v6923_v43 = vmax.f32 %v5982_v28, 0.0  ;;  %v4674_v28 = vld [vmem:[#allocation2] sm:$0xff] }
 0x530   :  { %v1571_v33 = vadd.f32 %v1539_v48, %v6916_v44 }
 0x531   :  { %v1569_v35 = vadd.f32 %v1537_v23, %v6918_v38  ;;  %v4117_v32 = vpop.f32.mrb[56].mxu1  ;;  %v6924_v23 = vmax.f32 %v5985_v30, 0.0  ;;  %v4516_v30 = vld [vmem:[#allocation26 + $0x10] sm:$0xff]  }
 0x532   :  { %v1494_v19 = vadd.f32 %v4117_v32, %v6036_v0  ;;  %v1485_v31 = vpop.f32.mrb[57].mxu1  ;;  %v1591_v25 = vpack.c.bf16 %v1571_v33, %v1570_v24  ;;  %v6925_v24 = vmax.f32 %v5979_v13, 0.0  ;;  %v6926_v33 = vmax.f32 %v5988_v50, 0.0  ;;  %v4515_v32 = vld [vmem:[#allocation26 + $0x8] sm:$0xff]   ;;  %v4517_v50 = vld [vmem:[#allocation26 + $0x18] sm:$0xff]   ;;  %v4518_v13 = vld [vmem:[#allocation26 + $0x20] sm:$0xff]  }
 0x533   :  { %v1486_v5 = vadd.f32 %v6036_v0, %v1485_v31  ;;  %v4118_v36 = vpop.f32.mrb[58].mxu1  ;;  %v1590_v34 = vpack.c.bf16 %v1569_v35, %v1568_v14  ;;  %v4514_v35 = vld [vmem:[#allocation26] sm:$0xff]  }
 0x534   :  { %v1542_v41 = vmax.f32 %v1494_v19, 0.0  ;;  %v1497_v22 = vadd.f32 %v4118_v36, %v6036_v0  ;;  %v1488_v6 = vpop.f32.mrb[59].mxu1  ;;  %v4675_v19 = vld [vmem:[#allocation2 + $0x8] sm:$0xff]  ;;  %4219 = vmatprep.subr.bf16.mxu0 %v4514_v35 }
 0x535   :  { %v1540_v42 = vmax.f32 %v1486_v5, 0.0  ;;  %v1489_v18 = vadd.f32 %v6036_v0, %v1488_v6  ;;  %4159 = vmatprep.mubr.bf16.mxu0 %v1590_v34  ;;  %v2172_v31 = vpack.c.bf16 %v4675_v19, %v4674_v28  ;;  %4220 = vmatpush3.bf16.msra.mxu0 %v4514_v35  ;;  %v4520_v5 = vld [vmem:[#allocation26 + $0x30] sm:$0xff]   ;;  %v4521_v36 = vld [vmem:[#allocation26 + $0x38] sm:$0xff]   ;;  %v4522_v34 = vld [vmem:[#allocation25] sm:$0xff]  }
 0x536   :  { %v1543_v39 = vmax.f32 %v1497_v22, 0.0  ;;  %4160 = vmatmul.mubr.bf16.gmra.mrb[84].mxu0 %v1591_v25  ;;  %v1574_v40 = vadd.f32 %v1542_v41, %v6919_v45  ;;  %4221 = vmatprep.subr.bf16.mxu0 %v4515_v32  ;;  %v4519_v25 = vld [vmem:[#allocation26 + $0x28] sm:$0xff]   ;;  %v4676_v41 = vld [vmem:[#allocation2 + $0x20] sm:$0xff]  ;;  %v4677_v22 = vld [vmem:[#allocation2 + $0x28] sm:$0xff] }
 0x537   :  { %v1541_v60 = vmax.f32 %v1489_v18, 0.0  ;;  %v1572_v55 = vadd.f32 %v1540_v42, %v6921_v49  ;;  %v2174_v6 = vpack.c.bf16 %v4677_v22, %v4676_v41  ;;  %v4523_v42 = vld [vmem:[#allocation25 + $0x8] sm:$0xff]   ;;  %v6927_v18 = vpack.c.bf16 %v5536_v10, %v5534_v9  ;;  %v4692_v35 = vld [vmem:[#allocation2 + $0xa0] sm:$0xff] }
 0x538   :  { %v1575_v29 = vadd.f32 %v1543_v39, %v6920_v12  ;;  %v4524_v39 = vld [vmem:[#allocation25 + $0x10] sm:$0xff]   ;;  %v4682_v9 = vld [vmem:[#allocation2 + $0x50] sm:$0xff] }
 0x539   :  { %v1573_v54 = vadd.f32 %v1541_v60, %v6922_v47  ;;  %v4121_v62 = vpop.f32.mrb[60].mxu1  ;;  %4222 = vmatpush3.bf16.msra.mxu0 %v4515_v32  ;;  %v4678_v60 = vld [vmem:[#allocation2 + $0x30] sm:$0xff]  ;;  %v4679_v45 = vld [vmem:[#allocation2 + $0x38] sm:$0xff]  ;;  %v4680_v12 = vld [vmem:[#allocation2 + $0x40] sm:$0xff] }
 0x53a   :  { %v1510_v37 = vadd.f32 %v4121_v62, %v6036_v0  ;;  %v1501_v46 = vpop.f32.mrb[61].mxu1  ;;  %v1593_v1 = vpack.c.bf16 %v1575_v29, %v1574_v40  ;;  %4223 = vmatprep.subr.bf16.mxu0 %v4516_v30  ;;  %v2175_v40 = vpack.c.bf16 %v4679_v45, %v4678_v60  ;;  %v4681_v29 = vld [vmem:[#allocation2 + $0x48] sm:$0xff]  ;;  %v4683_v10 = vld [vmem:[#allocation2 + $0x58] sm:$0xff]  ;;  %v4684_v62 = vld [vmem:[#allocation2 + $0x60] sm:$0xff] }
 0x53b   :  { %v1502_v15 = vadd.f32 %v6036_v0, %v1501_v46  ;;  %v4122_v3 = vpop.f32.mrb[62].mxu1  ;;  %v1592_v26 = vpack.c.bf16 %v1573_v54, %v1572_v55  ;;  %v2176_v49 = vpack.c.bf16 %v4681_v29, %v4680_v12  ;;  %v4525_v55 = vld [vmem:[#allocation25 + $0x18] sm:$0xff]   ;;  %v4526_v47 = vld [vmem:[#allocation25 + $0x20] sm:$0xff]   ;;  %v2177_v54 = vpack.c.bf16 %v4683_v10, %v4682_v9 }
 0x53c   :  { %v1546_v57 = vmax.f32 %v1510_v37, 0.0  ;;  %v1513_v20 = vadd.f32 %v4122_v3, %v6036_v0  ;;  %v1504_v17 = vpop.f32.mrb[63].mxu1  ;;  %v4685_v37 = vld [vmem:[#allocation2 + $0x68] sm:$0xff]  ;;  %v4686_v3 = vld [vmem:[#allocation2 + $0x70] sm:$0xff] }
 0x53d   :  { %v1544_v52 = vmax.f32 %v1502_v15, 0.0  ;;  %v1505_v8 = vadd.f32 %v6036_v0, %v1504_v17  ;;  %4163 = vmatprep.mubr.bf16.mxu0 %v1592_v26  ;;  %v4513_v0 = vld [vmem:[#allocation22 + $0x38] sm:$0xff]   ;;  %4224 = vmatpush3.bf16.msra.mxu0 %v4516_v30  ;;  %v2178_v46 = vpack.c.bf16 %v4685_v37, %v4684_v62  ;;  %v4687_v26 = vld [vmem:[#allocation2 + $0x78] sm:$0xff]  ;;  %v6928_v30 = vmax.f32 %v5620_v58, 0.0  ;;  %v4694_v12 = vld [vmem:[#allocation2 + $0xb0] sm:$0xff] }
 0x53e   :  { %v1547_v53 = vmax.f32 %v1513_v20, 0.0  ;;  %4164 = vmatmul.mubr.bf16.gmra.mrb[88].mxu0 %v1593_v1  ;;  %v1578_v48 = vadd.f32 %v1546_v57, %v6923_v43  ;;  %4185 = vmatprep.subr.bf16.mxu1 %v4513_v0  ;;  %v4527_v1 = vld [vmem:[#allocation25 + $0x28] sm:$0xff]   ;;  %v4528_v15 = vld [vmem:[#allocation25 + $0x30] sm:$0xff]   ;;  %v2179_v57 = vpack.c.bf16 %v4687_v26, %v4686_v3  ;;  %v4689_v17 = vld [vmem:[#allocation2 + $0x88] sm:$0xff]  ;;  %v6932_v62 = vmax.f32 %v5641_v7, 0.0 }
 0x53f   :  { %v1545_v61 = vmax.f32 %v1505_v8, 0.0  ;;  %v1576_v44 = vadd.f32 %v1544_v52, %v6925_v24  ;;  %4186 = vmatpush3.bf16.msra.mxu1 %v4513_v0  ;;  %4225 = vmatprep.subr.bf16.mxu0 %v4517_v50  ;;  %v4688_v20 = vld [vmem:[#allocation2 + $0x80] sm:$0xff]  ;;  %v6137_v8 = vld [vmem:[#allocation20] ss:$0 sm:$0xff]  ;;  %v6935_v26 = vmax.f32 %v5650_v51, 0.0 }
 0x540   :  { %v1579_v21 = vadd.f32 %v1547_v53, %v6924_v23  ;;  %v2180_v52 = vpack.c.bf16 %v4689_v17, %v4688_v20  ;;  %v4693_v32 = vld [vmem:[#allocation2 + $0xa8] sm:$0xff] }
 0x541   :  { %v1577_v4 = vadd.f32 %v1545_v61, %v6926_v33  ;;  %4226 = vmatpush3.bf16.msra.mxu0 %v4517_v50  ;;  %v4690_v33 = vld [vmem:[#allocation2 + $0x90] sm:$0xff]  ;;  %v2182_v28 = vpack.c.bf16 %v4693_v32, %v4692_v35 }
 0x542   :  { %v1595_v14 = vpack.c.bf16 %v1579_v21, %v1578_v48  ;;  %4227 = vmatprep.subr.bf16.mxu0 %v4518_v13  ;;  %v6938_v32 = vld [vmem:[#allocation43_spill] sm:$0xff] }
 0x543   :  { %v1594_v38 = vpack.c.bf16 %v1577_v4, %v1576_v44  ;;  %v4691_v4 = vld [vmem:[#allocation2 + $0x98] sm:$0xff] }
 0x545   :  { %4167 = vmatprep.mubr.bf16.mxu0 %v1594_v38  ;;  %4228 = vmatpush3.bf16.msra.mxu0 %v4518_v13  ;;  %v6929_v13 = vmax.f32 %v5623_v59, 0.0 }
 0x546   :  { %4168 = vmatmul.mubr.bf16.gmra.mrb[92].mxu0 %v1595_v14  ;;  %4229 = vmatprep.subr.bf16.mxu0 %v4519_v25  ;;  %v2181_v14 = vpack.c.bf16 %v4691_v4, %v4690_v33 }
 0x547   :  { %4235 = vmatprep.mubr.bf16.mxu0 %v2172_v31 }
 0x549   :  { %4230 = vmatpush3.bf16.msra.mxu0 %v4519_v25 }
 0x54a   :  { %4231 = vmatprep.subr.bf16.mxu0 %v4520_v5 }
 0x54d   :  { %4232 = vmatpush3.bf16.msra.mxu0 %v4520_v5  ;;  %v6930_v5 = vmax.f32 %v5617_v56, 0.0  ;;  %v4695_v56 = vld [vmem:[#allocation2 + $0xb8] sm:$0xff] }
 0x54e   :  { %4233 = vmatprep.subr.bf16.mxu0 %v4521_v36  ;;  %v2183_v29 = vpack.c.bf16 %v4695_v56, %v4694_v12 }
 0x551   :  { %4234 = vmatpush3.bf16.msra.mxu0 %v4521_v36 }
 0x552   :  { %4267 = vmatprep.subr.bf16.mxu0 %v4522_v34 }
 0x554   :  { %4236 = vmatmul.mubr.bf16.vlgmr.msra.gmra.mrb[96].mxu0 %v6927_v18 }
 0x555   :  { %4268 = vmatpush3.bf16.msra.mxu0 %v4522_v34  ;;  %4239 = vmatprep.mubr.bf16.mxu0 %v2174_v6  ;;  %v6931_v34 = vmax.f32 %v5626_v63, 0.0 }
 0x556   :  { %4269 = vmatprep.subr.bf16.mxu0 %v4523_v42 }
 0x559   :  { %4270 = vmatpush3.bf16.msra.mxu0 %v4523_v42 }
 0x55a   :  { %4271 = vmatprep.subr.bf16.mxu0 %v4524_v39 }
 0x55c   :  { %4240 = vmatmul.mubr.bf16.gmra.mrb[100].mxu0 %v2175_v40 }
 0x55d   :  { %4243 = vmatprep.mubr.bf16.mxu0 %v2176_v49  ;;  %4272 = vmatpush3.bf16.msra.mxu0 %v4524_v39 }
 0x55e   :  { %4273 = vmatprep.subr.bf16.mxu0 %v4525_v55 }
 0x561   :  { %4274 = vmatpush3.bf16.msra.mxu0 %v4525_v55  ;;  %v4696_v55 = vld [vmem:[#allocation2 + $0xc0] sm:$0xff] }
 0x562   :  { %4275 = vmatprep.subr.bf16.mxu0 %v4526_v47 }
 0x564   :  { %4244 = vmatmul.mubr.bf16.gmra.mrb[104].mxu0 %v2177_v54 }
 0x565   :  { %4247 = vmatprep.mubr.bf16.mxu0 %v2178_v46  ;;  %4276 = vmatpush3.bf16.msra.mxu0 %v4526_v47  ;;  %v4697_v47 = vld [vmem:[#allocation2 + $0xc8] sm:$0xff]  ;;  %v6933_v46 = vmax.f32 %v5647_v16, 0.0 }
 0x566   :  { %4277 = vmatprep.subr.bf16.mxu0 %v4527_v1  ;;  %v2184_v9 = vpack.c.bf16 %v4697_v47, %v4696_v55  ;;  %v6948_v55 = vld [vmem:[#allocation48_spill] sm:$0xff] }
 0x567   :  { %v6949_v47 = vmax.f32 %v6948_v55, 0.0 }
 0x569   :  { %4278 = vmatpush3.bf16.msra.mxu0 %v4527_v1 }
 0x56a   :  { %4279 = vmatprep.subr.bf16.mxu0 %v4528_v15 }
 0x56c   :  { %4248 = vmatmul.mubr.bf16.gmra.mrb[108].mxu0 %v2179_v57 }
 0x56d   :  { %4251 = vmatprep.mubr.bf16.mxu0 %v2180_v52  ;;  %4280 = vmatpush3.bf16.msra.mxu0 %v4528_v15  ;;  %v6934_v15 = vmax.f32 %v5644_v11, 0.0  ;;  %v4699_v11 = vld [vmem:[#allocation2 + $0xd8] sm:$0xff] }
 0x574   :  { %4252 = vmatmul.mubr.bf16.gmra.mrb[112].mxu0 %v2181_v14  ;;  %v6936_v14 = vmax.f32 %v5665_v27, 0.0 }
 0x575   :  { %4255 = vmatprep.mubr.bf16.mxu0 %v2182_v28  ;;  %v6939_v28 = vmax.f32 %v6938_v32, 0.0 }
 0x57c   :  { %4256 = vmatmul.mubr.bf16.gmra.mrb[116].mxu0 %v2183_v29  ;;  %v6946_v29 = vld [vmem:[#allocation46_spill] sm:$0xff] }
 0x57d   :  { %4259 = vmatprep.mubr.bf16.mxu0 %v2184_v9 }
 0x5e1   :  { %v4141_v53 = vpop.f32.mrb[64].mxu0 }
 0x5e2   :  { %v1710_v61 = vadd.f32 %v4141_v53, %v6137_v8  ;;  %v1701_v43 = vpop.f32.mrb[65].mxu0 }
 0x5e3   :  { %v1702_v48 = vadd.f32 %v6137_v8, %v1701_v43  ;;  %v4142_v23 = vpop.f32.mrb[66].mxu0 }
 0x5e4   :  { %v1830_v21 = vmax.f32 %v1710_v61, 0.0  ;;  %v1713_v24 = vadd.f32 %v4142_v23, %v6137_v8  ;;  %v1704_v44 = vpop.f32.mrb[67].mxu0 }
 0x5e5   :  { %v1828_v38 = vmax.f32 %v1702_v48, 0.0  ;;  %v1705_v0 = vadd.f32 %v6137_v8, %v1704_v44 }
 0x5e6   :  { %v1831_v19 = vmax.f32 %v1713_v24, 0.0  ;;  %v1862_v50 = vadd.f32 %v1830_v21, %v6928_v30  ;;  %v4698_v21 = vld [vmem:[#allocation2 + $0xd0] sm:$0xff] }
 0x5e7   :  { %v1829_v31 = vmax.f32 %v1705_v0, 0.0  ;;  %v1860_v36 = vadd.f32 %v1828_v38, %v6930_v5  ;;  %v2185_v24 = vpack.c.bf16 %v4699_v11, %v4698_v21  ;;  %v6937_v0 = vmax.f32 %v5671_v2, 0.0  ;;  %v6954_v21 = vld [vmem:[#allocation50_spill] sm:$0xff] }
 0x5e8   :  { %v1863_v25 = vadd.f32 %v1831_v19, %v6929_v13  ;;  %v6955_v11 = vmax.f32 %v6954_v21, 0.0 }
 0x5e9   :  { %v1861_v41 = vadd.f32 %v1829_v31, %v6931_v34  ;;  %v4145_v22 = vpop.f32.mrb[68].mxu0  ;;  %4260 = vmatmul.mubr.bf16.gmra.mrb[120].mxu0 %v2185_v24  ;;  %v6940_v31 = vld [vmem:[#allocation44_spill] sm:$0xff] }
 0x5ea   :  { %v1893_v6 = vpack.c.bf16 %v1863_v25, %v1862_v50  ;;  %v1726_v42 = vadd.f32 %v4145_v22, %v6137_v8  ;;  %v1717_v18 = vpop.f32.mrb[69].mxu0  ;;  %v6941_v30 = vmax.f32 %v6940_v31, 0.0 }
 0x5eb   :  { %v1718_v39 = vadd.f32 %v6137_v8, %v1717_v18  ;;  %v4146_v58 = vpop.f32.mrb[70].mxu0  ;;  %v1892_v60 = vpack.c.bf16 %v1861_v41, %v1860_v36 }
 0x5ec   :  { %v1834_v45 = vmax.f32 %v1726_v42, 0.0  ;;  %v1729_v59 = vadd.f32 %v4146_v58, %v6137_v8  ;;  %v1720_v40 = vpop.f32.mrb[71].mxu0 }
 0x5ed   :  { %v1832_v49 = vmax.f32 %v1718_v39, 0.0  ;;  %v1721_v63 = vadd.f32 %v6137_v8, %v1720_v40  ;;  %4187 = vmatprep.mubr.bf16.mxu1 %v1892_v60  ;;  %v6942_v60 = vld [vmem:[#allocation45_spill] sm:$0xff]  ;;  %v6944_v40 = vld [vmem:[#allocation47_spill] sm:$0xff] }
 0x5ee   :  { %v1835_v10 = vmax.f32 %v1729_v59, 0.0  ;;  %4188 = vmatmul.mubr.bf16.vlgmr.msra.gmra.mrb[64].mxu1 %v1893_v6  ;;  %v1866_v37 = vadd.f32 %v1834_v45, %v6932_v62  ;;  %v6943_v45 = vmax.f32 %v6942_v60, 0.0  ;;  %v6945_v12 = vmax.f32 %v6944_v40, 0.0 }
 0x5ef   :  { %v1833_v54 = vmax.f32 %v1721_v63, 0.0  ;;  %v1864_v3 = vadd.f32 %v1832_v49, %v6934_v15  ;;  %v6947_v49 = vmax.f32 %v6946_v29, 0.0 }
 0x5f0   :  { %v1867_v1 = vadd.f32 %v1835_v10, %v6933_v46 }
 0x5f1   :  { %v1865_v57 = vadd.f32 %v1833_v54, %v6935_v26  ;;  %v4149_v20 = vpop.f32.mrb[72].mxu0 }
 0x5f2   :  { %v1742_v17 = vadd.f32 %v4149_v20, %v6137_v8  ;;  %v1733_v52 = vpop.f32.mrb[73].mxu0  ;;  %v1895_v53 = vpack.c.bf16 %v1867_v1, %v1866_v37 }
 0x5f3   :  { %v1734_v61 = vadd.f32 %v6137_v8, %v1733_v52  ;;  %v4150_v7 = vpop.f32.mrb[74].mxu0  ;;  %v1894_v43 = vpack.c.bf16 %v1865_v57, %v1864_v3 }
 0x5f4   :  { %v1838_v48 = vmax.f32 %v1742_v17, 0.0  ;;  %v1745_v16 = vadd.f32 %v4150_v7, %v6137_v8  ;;  %v1736_v23 = vpop.f32.mrb[75].mxu0 }
 0x5f5   :  { %v1836_v44 = vmax.f32 %v1734_v61, 0.0  ;;  %v1737_v51 = vadd.f32 %v6137_v8, %v1736_v23  ;;  %4191 = vmatprep.mubr.bf16.mxu1 %v1894_v43  ;;  %v6950_v61 = vld [vmem:[#allocation49_spill] sm:$0xff] }
 0x5f6   :  { %v1839_v33 = vmax.f32 %v1745_v16, 0.0  ;;  %4192 = vmatmul.mubr.bf16.gmra.mrb[68].mxu1 %v1895_v53  ;;  %v1870_v38 = vadd.f32 %v1838_v48, %v6936_v14  ;;  %v6951_v7 = vmax.f32 %v6950_v61, 0.0  ;;  %v6952_v48 = vld [vmem:[#allocation51_spill] sm:$0xff] }
 0x5f7   :  { %v1837_v4 = vmax.f32 %v1737_v51, 0.0  ;;  %v1868_v19 = vadd.f32 %v1836_v44, %v6939_v28  ;;  %v6953_v16 = vmax.f32 %v6952_v48, 0.0  ;;  %v6956_v44 = vld [vmem:[#allocation52_spill] sm:$0xff] }
 0x5f8   :  { %v1871_v35 = vadd.f32 %v1839_v33, %v6937_v0  ;;  %v6957_v51 = vmax.f32 %v6956_v44, 0.0 }
 0x5f9   :  { %v1869_v50 = vadd.f32 %v1837_v4, %v6941_v30  ;;  %v4153_v13 = vpop.f32.mrb[76].mxu0 }
 0x5fa   :  { %v1758_v25 = vadd.f32 %v4153_v13, %v6137_v8  ;;  %v1749_v5 = vpop.f32.mrb[77].mxu0  ;;  %v1897_v36 = vpack.c.bf16 %v1871_v35, %v1870_v38 }
 0x5fb   :  { %v1750_v34 = vadd.f32 %v6137_v8, %v1749_v5  ;;  %v4154_v41 = vpop.f32.mrb[78].mxu0  ;;  %v1896_v27 = vpack.c.bf16 %v1869_v50, %v1868_v19 }
 0x5fc   :  { %v1842_v22 = vmax.f32 %v1758_v25, 0.0  ;;  %v1761_v2 = vadd.f32 %v4154_v41, %v6137_v8  ;;  %v1752_v6 = vpop.f32.mrb[79].mxu0 }
 0x5fd   :  { %v1840_v42 = vmax.f32 %v1750_v34, 0.0  ;;  %v1753_v18 = vadd.f32 %v6137_v8, %v1752_v6  ;;  %4195 = vmatprep.mubr.bf16.mxu1 %v1896_v27  ;;  %v6960_v27 = vld [vmem:[#allocation55_spill] sm:$0xff]  ;;  %v6962_v6 = vld [vmem:[#allocation54_spill] sm:$0xff] }
 0x5fe   :  { %v1843_v39 = vmax.f32 %v1761_v2, 0.0  ;;  %4196 = vmatmul.mubr.bf16.gmra.mrb[72].mxu1 %v1897_v36  ;;  %v1874_v59 = vadd.f32 %v1842_v22, %v6943_v45  ;;  %v6958_v36 = vld [vmem:[#allocation53_spill] sm:$0xff]  ;;  %v6961_v22 = vmax.f32 %v6960_v27, 0.0  ;;  %v4701_v27 = vld [vmem:[#allocation2 + $0xe8] sm:$0xff] }
 0x5ff   :  { %v1841_v58 = vmax.f32 %v1753_v18, 0.0  ;;  %v1872_v63 = vadd.f32 %v1840_v42, %v6947_v49  ;;  %v6959_v34 = vmax.f32 %v6958_v36, 0.0  ;;  %v6963_v42 = vmax.f32 %v6962_v6, 0.0  ;;  %v4703_v6 = vld [vmem:[#allocation2 + $0xf8] sm:$0xff] }
 0x600   :  { %v1875_v56 = vadd.f32 %v1843_v39, %v6945_v12  ;;  %v6964_v39 = vld [vmem:[#allocation56_spill] sm:$0xff] }
 0x601   :  { %v1873_v9 = vadd.f32 %v1841_v58, %v6949_v47  ;;  %v4157_v10 = vpop.f32.mrb[80].mxu0  ;;  %v6965_v58 = vmax.f32 %v6964_v39, 0.0  ;;  %v4530_v39 = vld [vmem:[%s6756_s17] sm:$0xff]  }
 0x602   :  { %v1774_v54 = vadd.f32 %v4157_v10, %v6137_v8  ;;  %v1765_v62 = vpop.f32.mrb[81].mxu0  ;;  %v1899_v37 = vpack.c.bf16 %v1875_v56, %v1874_v59  ;;  %4315 = vmatprep.subr.bf16.mxu1 %v4530_v39 }
 0x603   :  { %v1766_v46 = vadd.f32 %v6137_v8, %v1765_v62  ;;  %v4158_v1 = vpop.f32.mrb[82].mxu0  ;;  %v1898_v15 = vpack.c.bf16 %v1873_v9, %v1872_v63  ;;  %4316 = vmatpush3.bf16.msra.mxu1 %v4530_v39 }
 0x604   :  { %v1846_v3 = vmax.f32 %v1774_v54, 0.0  ;;  %v1777_v26 = vadd.f32 %v4158_v1, %v6137_v8  ;;  %v1768_v57 = vpop.f32.mrb[83].mxu0 }
 0x605   :  { %v1844_v20 = vmax.f32 %v1766_v46, 0.0  ;;  %v1769_v17 = vadd.f32 %v6137_v8, %v1768_v57  ;;  %4199 = vmatprep.mubr.bf16.mxu1 %v1898_v15  ;;  %v6968_v15 = vld [vmem:[#allocation59_spill] sm:$0xff]  ;;  %v6970_v57 = vld [vmem:[#allocation58_spill] sm:$0xff] }
 0x606   :  { %v1847_v52 = vmax.f32 %v1777_v26, 0.0  ;;  %4200 = vmatmul.mubr.bf16.gmra.mrb[76].mxu1 %v1899_v37  ;;  %v1878_v43 = vadd.f32 %v1846_v3, %v6951_v7  ;;  %v6966_v37 = vld [vmem:[#allocation57_spill] sm:$0xff]  ;;  %v6969_v3 = vmax.f32 %v6968_v15, 0.0 }
 0x607   :  { %v1845_v53 = vmax.f32 %v1769_v17, 0.0  ;;  %v1876_v24 = vadd.f32 %v1844_v20, %v6955_v11  ;;  %v6967_v46 = vmax.f32 %v6966_v37, 0.0  ;;  %v6971_v20 = vmax.f32 %v6970_v57, 0.0 }
 0x608   :  { %v1879_v23 = vadd.f32 %v1847_v52, %v6953_v16  ;;  %v6972_v52 = vld [vmem:[#allocation60_spill] sm:$0xff] }
 0x609   :  { %v1877_v33 = vadd.f32 %v1845_v53, %v6957_v51  ;;  %v4161_v4 = vpop.f32.mrb[84].mxu0  ;;  %v6973_v53 = vmax.f32 %v6972_v52, 0.0 }
 0x60a   :  { %v1790_v14 = vadd.f32 %v4161_v4, %v6137_v8  ;;  %v1781_v38 = vpop.f32.mrb[85].mxu0  ;;  %v1901_v0 = vpack.c.bf16 %v1879_v23, %v1878_v43 }
 0x60b   :  { %v1782_v35 = vadd.f32 %v6137_v8, %v1781_v38  ;;  %v4162_v32 = vpop.f32.mrb[86].mxu0  ;;  %v1900_v28 = vpack.c.bf16 %v1877_v33, %v1876_v24 }
 0x60c   :  { %v1850_v19 = vmax.f32 %v1790_v14, 0.0  ;;  %v1793_v31 = vadd.f32 %v4162_v32, %v6137_v8  ;;  %v1784_v30 = vpop.f32.mrb[87].mxu0 }
 0x60d   :  { %v1848_v50 = vmax.f32 %v1782_v35, 0.0  ;;  %v1785_v13 = vadd.f32 %v6137_v8, %v1784_v30  ;;  %4203 = vmatprep.mubr.bf16.mxu1 %v1900_v28  ;;  %v6976_v28 = vld [vmem:[#allocation63_spill] sm:$0xff]  ;;  %v6978_v30 = vld [vmem:[#allocation62_spill] sm:$0xff] }
 0x60e   :  { %v1851_v25 = vmax.f32 %v1793_v31, 0.0  ;;  %4204 = vmatmul.mubr.bf16.gmra.mrb[80].mxu1 %v1901_v0  ;;  %v1882_v41 = vadd.f32 %v1850_v19, %v6959_v34  ;;  %v6974_v0 = vld [vmem:[#allocation61_spill] sm:$0xff]  ;;  %v6977_v19 = vmax.f32 %v6976_v28, 0.0 }
 0x60f   :  { %v1849_v5 = vmax.f32 %v1785_v13, 0.0  ;;  %v1880_v18 = vadd.f32 %v1848_v50, %v6963_v42  ;;  %v6975_v35 = vmax.f32 %v6974_v0, 0.0  ;;  %v6979_v50 = vmax.f32 %v6978_v30, 0.0 }
 0x610   :  { %v1883_v2 = vadd.f32 %v1851_v25, %v6961_v22  ;;  %v6980_v25 = vld [vmem:[#allocation64_spill] sm:$0xff] }
 0x611   :  { %v1881_v60 = vadd.f32 %v1849_v5, %v6965_v58  ;;  %v4165_v45 = vpop.f32.mrb[88].mxu0  ;;  %v6981_v5 = vmax.f32 %v6980_v25, 0.0  ;;  %v4531_v58 = vld [vmem:[%s6756_s17 + $0x8] sm:$0xff]  }
 0x612   :  { %v1806_v59 = vadd.f32 %v4165_v45, %v6137_v8  ;;  %v1797_v40 = vpop.f32.mrb[89].mxu0  ;;  %v1903_v12 = vpack.c.bf16 %v1883_v2, %v1882_v41  ;;  %v4702_v2 = vld [vmem:[#allocation2 + $0xf0] sm:$0xff]  ;;  %4317 = vmatprep.subr.bf16.mxu1 %v4531_v58  ;;  %v4533_v45 = vld [vmem:[%s6756_s17 + $0x18] sm:$0xff]  }
 0x613   :  { %v1798_v56 = vadd.f32 %v6137_v8, %v1797_v40  ;;  %v4166_v29 = vpop.f32.mrb[90].mxu0  ;;  %v1902_v49 = vpack.c.bf16 %v1881_v60, %v1880_v18  ;;  %v2187_v42 = vpack.c.bf16 %v4703_v6, %v4702_v2  ;;  %v4529_v18 = vld [vmem:[#allocation25 + $0x38] sm:$0xff]   ;;  %v4532_v60 = vld [vmem:[%s6756_s17 + $0x10] sm:$0xff]   ;;  %4318 = vmatpush3.bf16.msra.mxu1 %v4531_v58 }
 0x614   :  { %v1854_v63 = vmax.f32 %v1806_v59, 0.0  ;;  %v1809_v55 = vadd.f32 %v4166_v29, %v6137_v8  ;;  %v1800_v47 = vpop.f32.mrb[91].mxu0  ;;  %4281 = vmatprep.subr.bf16.mxu0 %v4529_v18  ;;  %4319 = vmatprep.subr.bf16.mxu1 %v4532_v60  ;;  %v4534_v59 = vld [vmem:[%s6756_s17 + $0x20] sm:$0xff]   ;;  %v4535_v40 = vld [vmem:[%s6756_s17 + $0x28] sm:$0xff]  }
 0x615   :  { %v1852_v9 = vmax.f32 %v1798_v56, 0.0  ;;  %v1801_v10 = vadd.f32 %v6137_v8, %v1800_v47  ;;  %4207 = vmatprep.mubr.bf16.mxu1 %v1902_v49  ;;  %4282 = vmatpush3.bf16.msra.mxu0 %v4529_v18  ;;  %v6256_v29 = vld [vmem:[#allocation23] ss:$0 sm:$0xff] }
 0x616   :  { %v1855_v54 = vmax.f32 %v1809_v55, 0.0  ;;  %4208 = vmatmul.mubr.bf16.gmra.mrb[84].mxu1 %v1903_v12  ;;  %v1886_v1 = vadd.f32 %v1854_v63, %v6967_v46  ;;  %v4536_v12 = vld [vmem:[%s6756_s17 + $0x30] sm:$0xff]  }
 0x617   :  { %v1853_v62 = vmax.f32 %v1801_v10, 0.0  ;;  %v1884_v17 = vadd.f32 %v1852_v9, %v6971_v20  ;;  %4320 = vmatpush3.bf16.msra.mxu1 %v4532_v60 }
 0x618   :  { %v1887_v26 = vadd.f32 %v1855_v54, %v6969_v3  ;;  %4321 = vmatprep.subr.bf16.mxu1 %v4533_v45 }
 0x619   :  { %v1885_v61 = vadd.f32 %v1853_v62, %v6973_v53  ;;  %v4169_v7 = vpop.f32.mrb[92].mxu0 }
 0x61a   :  { %v1822_v43 = vadd.f32 %v4169_v7, %v6137_v8  ;;  %v1813_v48 = vpop.f32.mrb[93].mxu0  ;;  %v1905_v16 = vpack.c.bf16 %v1887_v26, %v1886_v1 }
 0x61b   :  { %v1814_v23 = vadd.f32 %v6137_v8, %v1813_v48  ;;  %v4170_v21 = vpop.f32.mrb[94].mxu0  ;;  %v1904_v11 = vpack.c.bf16 %v1885_v61, %v1884_v17  ;;  %4322 = vmatpush3.bf16.msra.mxu1 %v4533_v45 }
 0x61c   :  { %v1858_v24 = vmax.f32 %v1822_v43, 0.0  ;;  %v1825_v44 = vadd.f32 %v4170_v21, %v6137_v8  ;;  %v1816_v51 = vpop.f32.mrb[95].mxu0  ;;  %4323 = vmatprep.subr.bf16.mxu1 %v4534_v59 }
 0x61d   :  { %v1856_v33 = vmax.f32 %v1814_v23, 0.0  ;;  %v1817_v4 = vadd.f32 %v6137_v8, %v1816_v51  ;;  %4211 = vmatprep.mubr.bf16.mxu1 %v1904_v11  ;;  %v4700_v8 = vld [vmem:[#allocation2 + $0xe0] sm:$0xff] }
 0x61e   :  { %v1859_v14 = vmax.f32 %v1825_v44, 0.0  ;;  %4212 = vmatmul.mubr.bf16.gmra.mrb[88].mxu1 %v1905_v16  ;;  %v1890_v32 = vadd.f32 %v1858_v24, %v6975_v35  ;;  %v2186_v22 = vpack.c.bf16 %v4701_v27, %v4700_v8 }
 0x61f   :  { %v1857_v38 = vmax.f32 %v1817_v4, 0.0  ;;  %v1888_v13 = vadd.f32 %v1856_v33, %v6979_v50  ;;  %4324 = vmatpush3.bf16.msra.mxu1 %v4534_v59 }
 0x620   :  { %v1891_v31 = vadd.f32 %v1859_v14, %v6977_v19  ;;  %4263 = vmatprep.mubr.bf16.mxu0 %v2186_v22  ;;  %4325 = vmatprep.subr.bf16.mxu1 %v4535_v40 }
 0x621   :  { %v1889_v36 = vadd.f32 %v1857_v38, %v6981_v5  ;;  %4264 = vmatmul.mubr.bf16.gmra.mrb[124].mxu0 %v2187_v42 }
 0x622   :  { %v1907_v34 = vpack.c.bf16 %v1891_v31, %v1890_v32 }
 0x623   :  { %v1906_v41 = vpack.c.bf16 %v1889_v36, %v1888_v13  ;;  %4326 = vmatpush3.bf16.msra.mxu1 %v4535_v40 }
 0x624   :  { %4327 = vmatprep.subr.bf16.mxu1 %v4536_v12 }
 0x625   :  { %4215 = vmatprep.mubr.bf16.mxu1 %v1906_v41 }
 0x626   :  { %4216 = vmatmul.mubr.bf16.gmra.mrb[92].mxu1 %v1907_v34 }
 0x627   :  { %4328 = vmatpush3.bf16.msra.mxu1 %v4536_v12 }
 0x6c1   :  { %v4189_v56 = vpop.f32.mrb[64].mxu1 }
 0x6c2   :  { %v2013_v49 = vpop.f32.mrb[65].mxu1  ;;  %v2022_v55 = vadd.f32 %v4189_v56, %v6256_v29 }
 0x6c3   :  { %v4190_v63 = vpop.f32.mrb[66].mxu1  ;;  %v2014_v10 = vadd.f32 %v6256_v29, %v2013_v49 }
 0x6c4   :  { %v2025_v47 = vadd.f32 %v4190_v63, %v6256_v29  ;;  %v2016_v9 = vpop.f32.mrb[67].mxu1 }
 0x6c5   :  { %v2017_v54 = vadd.f32 %v6256_v29, %v2016_v9 }
 0x6c6   :  { %v2141_v62 = vpack.c.bf16 %v2025_v47, %v2022_v55 }
 0x6c7   :  { %v2140_v37 = vpack.c.bf16 %v2017_v54, %v2014_v10 }
 0x6c9   :  { %v4193_v46 = vpop.f32.mrb[68].mxu1  ;;  %4283 = vmatprep.mubr.bf16.mxu0 %v2140_v37 }
 0x6ca   :  { %v2029_v1 = vpop.f32.mrb[69].mxu1  ;;  %4284 = vmatmul.mubr.bf16.vlgmr.msra.gmra.mrb[96].mxu0 %v2141_v62  ;;  %v2038_v3 = vadd.f32 %v4193_v46, %v6256_v29 }
 0x6cb   :  { %v4194_v15 = vpop.f32.mrb[70].mxu1  ;;  %v2030_v20 = vadd.f32 %v6256_v29, %v2029_v1 }
 0x6cc   :  { %v2041_v26 = vadd.f32 %v4194_v15, %v6256_v29  ;;  %v2032_v57 = vpop.f32.mrb[71].mxu1 }
 0x6cd   :  { %v2033_v17 = vadd.f32 %v6256_v29, %v2032_v57 }
 0x6ce   :  { %v2143_v52 = vpack.c.bf16 %v2041_v26, %v2038_v3 }
 0x6cf   :  { %v2142_v53 = vpack.c.bf16 %v2033_v17, %v2030_v20  ;;  %v4537_v17 = vld [vmem:[%s6756_s17 + $0x38] sm:$0xff]  }
 0x6d0   :  { %4329 = vmatprep.subr.bf16.mxu1 %v4537_v17 }
 0x6d1   :  { %v4197_v61 = vpop.f32.mrb[72].mxu1  ;;  %4287 = vmatprep.mubr.bf16.mxu0 %v2142_v53  ;;  %4330 = vmatpush3.bf16.msra.mxu1 %v4537_v17  ;;  %v6293_v53 = vld [vmem:[#allocation28] ss:$0 sm:$0xff] }
 0x6d2   :  { %v2045_v7 = vpop.f32.mrb[73].mxu1  ;;  %4288 = vmatmul.mubr.bf16.gmra.mrb[100].mxu0 %v2143_v52  ;;  %v2054_v48 = vadd.f32 %v4197_v61, %v6256_v29  ;;  %v4538_v52 = vld [vmem:[#allocation29] sm:$0xff]  }
 0x6d3   :  { %v4198_v43 = vpop.f32.mrb[74].mxu1  ;;  %v2046_v21 = vadd.f32 %v6256_v29, %v2045_v7  ;;  %4363 = vmatprep.subr.bf16.mxu1 %v4538_v52 }
 0x6d4   :  { %v2057_v16 = vadd.f32 %v4198_v43, %v6256_v29  ;;  %v2048_v23 = vpop.f32.mrb[75].mxu1 }
 0x6d5   :  { %v2049_v11 = vadd.f32 %v6256_v29, %v2048_v23 }
 0x6d6   :  { %v2145_v24 = vpack.c.bf16 %v2057_v16, %v2054_v48 }
 0x6d7   :  { %v2144_v44 = vpack.c.bf16 %v2049_v11, %v2046_v21 }
 0x6d9   :  { %v4201_v51 = vpop.f32.mrb[76].mxu1  ;;  %4291 = vmatprep.mubr.bf16.mxu0 %v2144_v44 }
 0x6da   :  { %v2061_v33 = vpop.f32.mrb[77].mxu1  ;;  %4292 = vmatmul.mubr.bf16.gmra.mrb[104].mxu0 %v2145_v24  ;;  %v2070_v14 = vadd.f32 %v4201_v51, %v6256_v29 }
 0x6db   :  { %v4202_v4 = vpop.f32.mrb[78].mxu1  ;;  %v2062_v35 = vadd.f32 %v6256_v29, %v2061_v33 }
 0x6dc   :  { %v2073_v38 = vadd.f32 %v4202_v4, %v6256_v29  ;;  %v2064_v0 = vpop.f32.mrb[79].mxu1 }
 0x6dd   :  { %v2065_v32 = vadd.f32 %v6256_v29, %v2064_v0 }
 0x6de   :  { %v2147_v28 = vpack.c.bf16 %v2073_v38, %v2070_v14 }
 0x6df   :  { %v2146_v19 = vpack.c.bf16 %v2065_v32, %v2062_v35  ;;  %v4539_v35 = vld [vmem:[#allocation29 + $0x8] sm:$0xff]  }
 0x6e1   :  { %v4205_v31 = vpop.f32.mrb[80].mxu1  ;;  %4295 = vmatprep.mubr.bf16.mxu0 %v2146_v19 }
 0x6e2   :  { %v2077_v30 = vpop.f32.mrb[81].mxu1  ;;  %4296 = vmatmul.mubr.bf16.gmra.mrb[108].mxu0 %v2147_v28  ;;  %v2086_v13 = vadd.f32 %v4205_v31, %v6256_v29 }
 0x6e3   :  { %v4206_v50 = vpop.f32.mrb[82].mxu1  ;;  %v2078_v36 = vadd.f32 %v6256_v29, %v2077_v30 }
 0x6e4   :  { %v2089_v25 = vadd.f32 %v4206_v50, %v6256_v29  ;;  %v2080_v5 = vpop.f32.mrb[83].mxu1 }
 0x6e5   :  { %v2081_v34 = vadd.f32 %v6256_v29, %v2080_v5 }
 0x6e6   :  { %v2149_v41 = vpack.c.bf16 %v2089_v25, %v2086_v13  ;;  %v4540_v25 = vld [vmem:[#allocation29 + $0x10] sm:$0xff]  }
 0x6e7   :  { %v2148_v8 = vpack.c.bf16 %v2081_v34, %v2078_v36 }
 0x6e9   :  { %v4209_v27 = vpop.f32.mrb[84].mxu1  ;;  %4299 = vmatprep.mubr.bf16.mxu0 %v2148_v8 }
 0x6ea   :  { %v2093_v22 = vpop.f32.mrb[85].mxu1  ;;  %4300 = vmatmul.mubr.bf16.gmra.mrb[112].mxu0 %v2149_v41  ;;  %v2102_v6 = vadd.f32 %v4209_v27, %v6256_v29 }
 0x6eb   :  { %v4210_v2 = vpop.f32.mrb[86].mxu1  ;;  %v2094_v39 = vadd.f32 %v6256_v29, %v2093_v22 }
 0x6ec   :  { %v2105_v42 = vadd.f32 %v4210_v2, %v6256_v29  ;;  %v2096_v18 = vpop.f32.mrb[87].mxu1  ;;  %v4541_v2 = vld [vmem:[#allocation29 + $0x18] sm:$0xff]  }
 0x6ed   :  { %v2097_v58 = vadd.f32 %v6256_v29, %v2096_v18 }
 0x6ee   :  { %v2151_v60 = vpack.c.bf16 %v2105_v42, %v2102_v6 }
 0x6ef   :  { %v2150_v45 = vpack.c.bf16 %v2097_v58, %v2094_v39 }
 0x6f1   :  { %v4213_v59 = vpop.f32.mrb[88].mxu1  ;;  %4303 = vmatprep.mubr.bf16.mxu0 %v2150_v45 }
 0x6f2   :  { %v2109_v40 = vpop.f32.mrb[89].mxu1  ;;  %4304 = vmatmul.mubr.bf16.gmra.mrb[116].mxu0 %v2151_v60  ;;  %v2118_v56 = vadd.f32 %v4213_v59, %v6256_v29  ;;  %v4542_v59 = vld [vmem:[#allocation29 + $0x20] sm:$0xff]  }
 0x6f3   :  { %v4214_v12 = vpop.f32.mrb[90].mxu1  ;;  %v2110_v55 = vadd.f32 %v6256_v29, %v2109_v40 }
 0x6f4   :  { %v2121_v49 = vadd.f32 %v4214_v12, %v6256_v29  ;;  %v2112_v63 = vpop.f32.mrb[91].mxu1 }
 0x6f5   :  { %v2113_v47 = vadd.f32 %v6256_v29, %v2112_v63 }
 0x6f6   :  { %v2153_v9 = vpack.c.bf16 %v2121_v49, %v2118_v56 }
 0x6f7   :  { %v2152_v10 = vpack.c.bf16 %v2113_v47, %v2110_v55 }
 0x6f9   :  { %v4217_v54 = vpop.f32.mrb[92].mxu1  ;;  %4307 = vmatprep.mubr.bf16.mxu0 %v2152_v10 }
 0x6fa   :  { %v2125_v62 = vpop.f32.mrb[93].mxu1  ;;  %4308 = vmatmul.mubr.bf16.gmra.mrb[120].mxu0 %v2153_v9  ;;  %v2134_v46 = vadd.f32 %v4217_v54, %v6256_v29  ;;  %v4543_v9 = vld [vmem:[#allocation29 + $0x28] sm:$0xff]  }
 0x6fb   :  { %v4218_v37 = vpop.f32.mrb[94].mxu1  ;;  %v2126_v3 = vadd.f32 %v6256_v29, %v2125_v62 }
 0x6fc   :  { %v2137_v1 = vadd.f32 %v4218_v37, %v6256_v29  ;;  %v2128_v15 = vpop.f32.mrb[95].mxu1 }
 0x6fd   :  { %v2129_v26 = vadd.f32 %v6256_v29, %v2128_v15 }
 0x6fe   :  { %v2155_v57 = vpack.c.bf16 %v2137_v1, %v2134_v46 }
 0x6ff   :  { %v2154_v20 = vpack.c.bf16 %v2129_v26, %v2126_v3  ;;  %v4544_v3 = vld [vmem:[#allocation29 + $0x30] sm:$0xff]  }
 0x701   :  { %4311 = vmatprep.mubr.bf16.mxu0 %v2154_v20 }
 0x702   :  { %4312 = vmatmul.mubr.bf16.gmra.mrb[124].mxu0 %v2155_v57 }
 0x79d   :  { %v4285_v61 = vpop.f32.mrb[96].mxu0 }
 0x79e   :  { %v2631_v7 = vadd.f32 %v4285_v61, %v6293_v53  ;;  %v2495_v43 = vpop.f32.mrb[97].mxu0 }
 0x79f   :  { %v2629_v29 = vadd.f32 %v6293_v53, %v2495_v43  ;;  %v4286_v48 = vpop.f32.mrb[98].mxu0 }
 0x7a0   :  { %v2632_v16 = vadd.f32 %v4286_v48, %v6293_v53  ;;  %v2498_v23 = vpop.f32.mrb[99].mxu0  ;;  %v2663_v11 = vmax.f32 %v2631_v7, 0.0 }
 0x7a1   :  { %v2630_v21 = vadd.f32 %v6293_v53, %v2498_v23  ;;  %v2661_v44 = vmax.f32 %v2629_v29, 0.0 }
 0x7a2   :  { %v2664_v24 = vmax.f32 %v2632_v16, 0.0 }
 0x7a3   :  { %v2662_v51 = vmax.f32 %v2630_v21, 0.0 }
 0x7a4   :  { %v2694_v33 = vpack.c.bf16 %v2664_v24, %v2663_v11 }
 0x7a5   :  { %v2693_v4 = vpack.c.bf16 %v2662_v51, %v2661_v44  ;;  %v4289_v14 = vpop.f32.mrb[100].mxu0 }
 0x7a6   :  { %v2635_v38 = vadd.f32 %v4289_v14, %v6293_v53  ;;  %v2511_v0 = vpop.f32.mrb[101].mxu0 }
 0x7a7   :  { %v2633_v32 = vadd.f32 %v6293_v53, %v2511_v0  ;;  %v4290_v28 = vpop.f32.mrb[102].mxu0  ;;  %4331 = vmatprep.mubr.bf16.mxu1 %v2693_v4 }
 0x7a8   :  { %v2636_v19 = vadd.f32 %v4290_v28, %v6293_v53  ;;  %v2514_v31 = vpop.f32.mrb[103].mxu0  ;;  %4332 = vmatmul.mubr.bf16.vlgmr.msra.gmra.mrb[96].mxu1 %v2694_v33  ;;  %v2667_v50 = vmax.f32 %v2635_v38, 0.0 }
 0x7a9   :  { %v2634_v30 = vadd.f32 %v6293_v53, %v2514_v31  ;;  %4364 = vmatpush3.bf16.msra.mxu1 %v4538_v52  ;;  %v2665_v5 = vmax.f32 %v2633_v32, 0.0 }
 0x7aa   :  { %v2668_v13 = vmax.f32 %v2636_v19, 0.0  ;;  %4365 = vmatprep.subr.bf16.mxu1 %v4539_v35 }
 0x7ab   :  { %v2666_v36 = vmax.f32 %v2634_v30, 0.0 }
 0x7ac   :  { %v2696_v34 = vpack.c.bf16 %v2668_v13, %v2667_v50 }
 0x7ad   :  { %v2695_v41 = vpack.c.bf16 %v2666_v36, %v2665_v5  ;;  %v4293_v8 = vpop.f32.mrb[104].mxu0  ;;  %4366 = vmatpush3.bf16.msra.mxu1 %v4539_v35 }
 0x7ae   :  { %v2639_v27 = vadd.f32 %v4293_v8, %v6293_v53  ;;  %v2527_v22 = vpop.f32.mrb[105].mxu0  ;;  %4367 = vmatprep.subr.bf16.mxu1 %v4540_v25 }
 0x7af   :  { %v2637_v6 = vadd.f32 %v6293_v53, %v2527_v22  ;;  %v4294_v42 = vpop.f32.mrb[106].mxu0  ;;  %4335 = vmatprep.mubr.bf16.mxu1 %v2695_v41 }
 0x7b0   :  { %v2640_v18 = vadd.f32 %v4294_v42, %v6293_v53  ;;  %v2530_v39 = vpop.f32.mrb[107].mxu0  ;;  %4336 = vmatmul.mubr.bf16.gmra.mrb[100].mxu1 %v2696_v34  ;;  %v2671_v60 = vmax.f32 %v2639_v27, 0.0 }
 0x7b1   :  { %v2638_v58 = vadd.f32 %v6293_v53, %v2530_v39  ;;  %4368 = vmatpush3.bf16.msra.mxu1 %v4540_v25  ;;  %v2669_v40 = vmax.f32 %v2637_v6, 0.0 }
 0x7b2   :  { %v2672_v45 = vmax.f32 %v2640_v18, 0.0  ;;  %4369 = vmatprep.subr.bf16.mxu1 %v4541_v2 }
 0x7b3   :  { %v2670_v12 = vmax.f32 %v2638_v58, 0.0 }
 0x7b4   :  { %v2698_v56 = vpack.c.bf16 %v2672_v45, %v2671_v60 }
 0x7b5   :  { %v2697_v49 = vpack.c.bf16 %v2670_v12, %v2669_v40  ;;  %v4297_v63 = vpop.f32.mrb[108].mxu0  ;;  %4370 = vmatpush3.bf16.msra.mxu1 %v4541_v2 }
 0x7b6   :  { %v2643_v55 = vadd.f32 %v4297_v63, %v6293_v53  ;;  %v2543_v47 = vpop.f32.mrb[109].mxu0  ;;  %4371 = vmatprep.subr.bf16.mxu1 %v4542_v59 }
 0x7b7   :  { %v2641_v10 = vadd.f32 %v6293_v53, %v2543_v47  ;;  %v4298_v54 = vpop.f32.mrb[110].mxu0  ;;  %4339 = vmatprep.mubr.bf16.mxu1 %v2697_v49 }
 0x7b8   :  { %v2644_v62 = vadd.f32 %v4298_v54, %v6293_v53  ;;  %v2546_v37 = vpop.f32.mrb[111].mxu0  ;;  %4340 = vmatmul.mubr.bf16.gmra.mrb[104].mxu1 %v2698_v56  ;;  %v2675_v1 = vmax.f32 %v2643_v55, 0.0 }
 0x7b9   :  { %v2642_v46 = vadd.f32 %v6293_v53, %v2546_v37  ;;  %4372 = vmatpush3.bf16.msra.mxu1 %v4542_v59  ;;  %v2673_v26 = vmax.f32 %v2641_v10, 0.0 }
 0x7ba   :  { %v2676_v15 = vmax.f32 %v2644_v62, 0.0  ;;  %4373 = vmatprep.subr.bf16.mxu1 %v4543_v9 }
 0x7bb   :  { %v2674_v57 = vmax.f32 %v2642_v46, 0.0 }
 0x7bc   :  { %v2700_v20 = vpack.c.bf16 %v2676_v15, %v2675_v1  ;;  %v4545_v1 = vld [vmem:[#allocation29 + $0x38] sm:$0xff]   ;;  %v6330_v15 = vld [vmem:[%s6757_s18] ss:$0 sm:$0xff] }
 0x7bd   :  { %v2699_v17 = vpack.c.bf16 %v2674_v57, %v2673_v26  ;;  %v4301_v52 = vpop.f32.mrb[112].mxu0  ;;  %4374 = vmatpush3.bf16.msra.mxu1 %v4543_v9 }
 0x7be   :  { %v2647_v61 = vadd.f32 %v4301_v52, %v6293_v53  ;;  %v2559_v7 = vpop.f32.mrb[113].mxu0  ;;  %4375 = vmatprep.subr.bf16.mxu1 %v4544_v3 }
 0x7bf   :  { %v2645_v43 = vadd.f32 %v6293_v53, %v2559_v7  ;;  %v4302_v29 = vpop.f32.mrb[114].mxu0  ;;  %4343 = vmatprep.mubr.bf16.mxu1 %v2699_v17 }
 0x7c0   :  { %v2648_v48 = vadd.f32 %v4302_v29, %v6293_v53  ;;  %v2562_v16 = vpop.f32.mrb[115].mxu0  ;;  %4344 = vmatmul.mubr.bf16.gmra.mrb[108].mxu1 %v2700_v20  ;;  %v2679_v21 = vmax.f32 %v2647_v61, 0.0 }
 0x7c1   :  { %v2646_v23 = vadd.f32 %v6293_v53, %v2562_v16  ;;  %4376 = vmatpush3.bf16.msra.mxu1 %v4544_v3  ;;  %v2677_v24 = vmax.f32 %v2645_v43, 0.0 }
 0x7c2   :  { %v2680_v11 = vmax.f32 %v2648_v48, 0.0  ;;  %4377 = vmatprep.subr.bf16.mxu1 %v4545_v1 }
 0x7c3   :  { %v2678_v44 = vmax.f32 %v2646_v23, 0.0 }
 0x7c4   :  { %v2702_v51 = vpack.c.bf16 %v2680_v11, %v2679_v21 }
 0x7c5   :  { %v2701_v33 = vpack.c.bf16 %v2678_v44, %v2677_v24  ;;  %v4305_v4 = vpop.f32.mrb[116].mxu0  ;;  %4378 = vmatpush3.bf16.msra.mxu1 %v4545_v1 }
 0x7c6   :  { %v2651_v14 = vadd.f32 %v4305_v4, %v6293_v53  ;;  %v2575_v38 = vpop.f32.mrb[117].mxu0 }
 0x7c7   :  { %v2649_v0 = vadd.f32 %v6293_v53, %v2575_v38  ;;  %v4306_v35 = vpop.f32.mrb[118].mxu0  ;;  %4347 = vmatprep.mubr.bf16.mxu1 %v2701_v33 }
 0x7c8   :  { %v2652_v32 = vadd.f32 %v4306_v35, %v6293_v53  ;;  %v2578_v28 = vpop.f32.mrb[119].mxu0  ;;  %4348 = vmatmul.mubr.bf16.gmra.mrb[112].mxu1 %v2702_v51  ;;  %v2683_v31 = vmax.f32 %v2651_v14, 0.0 }
 0x7c9   :  { %v2650_v19 = vadd.f32 %v6293_v53, %v2578_v28  ;;  %v2681_v50 = vmax.f32 %v2649_v0, 0.0 }
 0x7ca   :  { %v2684_v30 = vmax.f32 %v2652_v32, 0.0 }
 0x7cb   :  { %v2682_v13 = vmax.f32 %v2650_v19, 0.0 }
 0x7cc   :  { %v2704_v25 = vpack.c.bf16 %v2684_v30, %v2683_v31 }
 0x7cd   :  { %v2703_v5 = vpack.c.bf16 %v2682_v13, %v2681_v50  ;;  %v4309_v36 = vpop.f32.mrb[120].mxu0 }
 0x7ce   :  { %v2655_v34 = vadd.f32 %v4309_v36, %v6293_v53  ;;  %v2591_v41 = vpop.f32.mrb[121].mxu0 }
 0x7cf   :  { %v2653_v8 = vadd.f32 %v6293_v53, %v2591_v41  ;;  %v4310_v27 = vpop.f32.mrb[122].mxu0  ;;  %4351 = vmatprep.mubr.bf16.mxu1 %v2703_v5 }
 0x7d0   :  { %v2656_v22 = vadd.f32 %v4310_v27, %v6293_v53  ;;  %v2594_v2 = vpop.f32.mrb[123].mxu0  ;;  %4352 = vmatmul.mubr.bf16.gmra.mrb[116].mxu1 %v2704_v25  ;;  %v2687_v42 = vmax.f32 %v2655_v34, 0.0 }
 0x7d1   :  { %v2654_v6 = vadd.f32 %v6293_v53, %v2594_v2  ;;  %v2685_v39 = vmax.f32 %v2653_v8, 0.0 }
 0x7d2   :  { %v2688_v18 = vmax.f32 %v2656_v22, 0.0 }
 0x7d3   :  { %v2686_v58 = vmax.f32 %v2654_v6, 0.0 }
 0x7d4   :  { %v2706_v60 = vpack.c.bf16 %v2688_v18, %v2687_v42 }
 0x7d5   :  { %v2705_v45 = vpack.c.bf16 %v2686_v58, %v2685_v39  ;;  %v4313_v59 = vpop.f32.mrb[124].mxu0 }
 0x7d6   :  { %v2659_v40 = vadd.f32 %v4313_v59, %v6293_v53  ;;  %v2607_v12 = vpop.f32.mrb[125].mxu0 }
 0x7d7   :  { %v2657_v56 = vadd.f32 %v6293_v53, %v2607_v12  ;;  %v4314_v49 = vpop.f32.mrb[126].mxu0  ;;  %4355 = vmatprep.mubr.bf16.mxu1 %v2705_v45 }
 0x7d8   :  { %v2660_v63 = vadd.f32 %v4314_v49, %v6293_v53  ;;  %v2610_v55 = vpop.f32.mrb[127].mxu0  ;;  %4356 = vmatmul.mubr.bf16.gmra.mrb[120].mxu1 %v2706_v60  ;;  %v2691_v9 = vmax.f32 %v2659_v40, 0.0 }
 0x7d9   :  { %v2658_v47 = vadd.f32 %v6293_v53, %v2610_v55  ;;  %v2689_v54 = vmax.f32 %v2657_v56, 0.0 }
 0x7da   :  { %v2692_v10 = vmax.f32 %v2660_v63, 0.0 }
 0x7db   :  { %v2690_v62 = vmax.f32 %v2658_v47, 0.0 }
 0x7dc   :  { %v2708_v37 = vpack.c.bf16 %v2692_v10, %v2691_v9 }
 0x7dd   :  { %v2707_v46 = vpack.c.bf16 %v2690_v62, %v2689_v54 }
 0x7df   :  { %4359 = vmatprep.mubr.bf16.mxu1 %v2707_v46 }
 0x7e0   :  { %4360 = vmatmul.mubr.bf16.gmra.mrb[124].mxu1 %v2708_v37 }
 0x87b   :  { %v4333_v3 = vpop.f32.mrb[96].mxu1 }
 0x87c   :  { %v2823_v26 = vadd.f32 %v4333_v3, %v6330_v15  ;;  %v2814_v53 = vpop.f32.mrb[97].mxu1 }
 0x87d   :  { %v2815_v57 = vadd.f32 %v6330_v15, %v2814_v53  ;;  %v4334_v20 = vpop.f32.mrb[98].mxu1 }
 0x87e   :  { %v2826_v17 = vadd.f32 %v4334_v20, %v6330_v15  ;;  %v2817_v52 = vpop.f32.mrb[99].mxu1  ;;  %v2943_v7 = vmax.f32 %v2823_v26, 0.0 }
 0x87f   :  { %v2818_v61 = vadd.f32 %v6330_v15, %v2817_v52  ;;  %v2941_v29 = vmax.f32 %v2815_v57, 0.0 }
 0x880   :  { %v2944_v43 = vmax.f32 %v2826_v17, 0.0 }
 0x881   :  { %v2942_v48 = vmax.f32 %v2818_v61, 0.0 }
 0x882   :  { %v2974_v16 = vpack.c.bf16 %v2944_v43, %v2943_v7 }
 0x883   :  { %v2973_v23 = vpack.c.bf16 %v2942_v48, %v2941_v29  ;;  %v4337_v21 = vpop.f32.mrb[100].mxu1 }
 0x884   :  { %v2839_v11 = vadd.f32 %v4337_v21, %v6330_v15  ;;  %v2830_v24 = vpop.f32.mrb[101].mxu1 }
 0x885   :  { %v2831_v44 = vadd.f32 %v6330_v15, %v2830_v24  ;;  %v4338_v51 = vpop.f32.mrb[102].mxu1  ;;  %4379 = vmatprep.mubr.bf16.mxu1 %v2973_v23 }
 0x886   :  { %v2842_v33 = vadd.f32 %v4338_v51, %v6330_v15  ;;  %v2833_v4 = vpop.f32.mrb[103].mxu1  ;;  %4380 = vmatmul.mubr.bf16.vlgmr.msra.gmra.mrb[128].mxu1 %v2974_v16  ;;  %v2947_v38 = vmax.f32 %v2839_v11, 0.0 }
 0x887   :  { %v2834_v14 = vadd.f32 %v6330_v15, %v2833_v4  ;;  %v2945_v35 = vmax.f32 %v2831_v44, 0.0 }
 0x888   :  { %v2948_v0 = vmax.f32 %v2842_v33, 0.0 }
 0x889   :  { %v2946_v32 = vmax.f32 %v2834_v14, 0.0 }
 0x88a   :  { %v2976_v28 = vpack.c.bf16 %v2948_v0, %v2947_v38 }
 0x88b   :  { %v2975_v19 = vpack.c.bf16 %v2946_v32, %v2945_v35  ;;  %v4341_v31 = vpop.f32.mrb[104].mxu1 }
 0x88c   :  { %v2855_v30 = vadd.f32 %v4341_v31, %v6330_v15  ;;  %v2846_v50 = vpop.f32.mrb[105].mxu1 }
 0x88d   :  { %v2847_v13 = vadd.f32 %v6330_v15, %v2846_v50  ;;  %v4342_v25 = vpop.f32.mrb[106].mxu1  ;;  %4383 = vmatprep.mubr.bf16.mxu1 %v2975_v19 }
 0x88e   :  { %v2858_v5 = vadd.f32 %v4342_v25, %v6330_v15  ;;  %v2849_v36 = vpop.f32.mrb[107].mxu1  ;;  %4384 = vmatmul.mubr.bf16.gmra.mrb[132].mxu1 %v2976_v28  ;;  %v2951_v41 = vmax.f32 %v2855_v30, 0.0 }
 0x88f   :  { %v2850_v34 = vadd.f32 %v6330_v15, %v2849_v36  ;;  %v2949_v27 = vmax.f32 %v2847_v13, 0.0 }
 0x890   :  { %v2952_v8 = vmax.f32 %v2858_v5, 0.0 }
 0x891   :  { %v2950_v22 = vmax.f32 %v2850_v34, 0.0 }
 0x892   :  { %v2978_v2 = vpack.c.bf16 %v2952_v8, %v2951_v41 }
 0x893   :  { %v2977_v6 = vpack.c.bf16 %v2950_v22, %v2949_v27  ;;  %v4345_v42 = vpop.f32.mrb[108].mxu1 }
 0x894   :  { %v2871_v18 = vadd.f32 %v4345_v42, %v6330_v15  ;;  %v2862_v39 = vpop.f32.mrb[109].mxu1 }
 0x895   :  { %v2863_v58 = vadd.f32 %v6330_v15, %v2862_v39  ;;  %v4346_v60 = vpop.f32.mrb[110].mxu1  ;;  %4387 = vmatprep.mubr.bf16.mxu1 %v2977_v6 }
 0x896   :  { %v2874_v45 = vadd.f32 %v4346_v60, %v6330_v15  ;;  %v2865_v59 = vpop.f32.mrb[111].mxu1  ;;  %4388 = vmatmul.mubr.bf16.gmra.mrb[136].mxu1 %v2978_v2  ;;  %v2955_v12 = vmax.f32 %v2871_v18, 0.0 }
 0x897   :  { %v2866_v40 = vadd.f32 %v6330_v15, %v2865_v59  ;;  %v2953_v49 = vmax.f32 %v2863_v58, 0.0 }
 0x898   :  { %v2956_v56 = vmax.f32 %v2874_v45, 0.0 }
 0x899   :  { %v2954_v63 = vmax.f32 %v2866_v40, 0.0  ;;  %v3221_v40 = vlaneseq }
 0x89a   :  { %v2980_v55 = vpack.c.bf16 %v2956_v56, %v2955_v12  ;;  %v6369_v56 = vld [vmem:[%s6759_s20] ss:$0 sm:$0xff]  ;;  %s5166_s20 = smov [#allocation31]  }
 0x89b   :  { %v2979_v47 = vpack.c.bf16 %v2954_v63, %v2953_v49  ;;  %v4349_v9 = vpop.f32.mrb[112].mxu1  ;;  %v6364_v12 = vand.u32 127, %v3221_v40  ;;  %s3581_s1 = sshll.u32 %s5166_s20, 4  ;;  %s3582_s1 = int_to_ptr.vmem [resolvable:$true] %s3581_s1 }
 0x89c   :  { %v2887_v10 = vadd.f32 %v4349_v9, %v6330_v15  ;;  %v2878_v54 = vpop.f32.mrb[113].mxu1  ;;  %s5100_s5 = scalar_lea.vmem %s3582_s1, 4096  ;;  %p5105_p5 = scmp.lt.s32.totalorder %s3582_s1, %s3582_s1 }
 0x89d   :  { %v2879_v62 = vadd.f32 %v6330_v15, %v2878_v54  ;;  %v4350_v37 = vpop.f32.mrb[114].mxu1  ;;  %4391 = vmatprep.mubr.bf16.mxu1 %v2979_v47  ;;  %vm3223_vm0 = vcmp.lt.s32.totalorder %v6364_v12, 5  ;;  %p5101_p4 = scmp.ne.s32.totalorder %s3582_s1, %s5100_s5  ;;  %p5106_p6 = scmp.lt.s32.totalorder %s5100_s5, %s5100_s5 }
 0x89e   :  { %v2890_v46 = vadd.f32 %v4350_v37, %v6330_v15  ;;  %v2881_v1 = vpop.f32.mrb[115].mxu1  ;;  %4392 = vmatmul.mubr.bf16.gmra.mrb[140].mxu1 %v2980_v55  ;;  %v2959_v26 = vmax.f32 %v2887_v10, 0.0 }
 0x89f   :  { %v2882_v3 = vadd.f32 %v6330_v15, %v2881_v1  ;;  %v2957_v57 = vmax.f32 %v2879_v62, 0.0  ;;  %p5107_p7 = por %p5106_p6, %p5105_p5 }
 0x8a0   :  { %v2960_v53 = vmax.f32 %v2890_v46, 0.0 }
 0x8a1   :  { %v2958_v20 = vmax.f32 %v2882_v3, 0.0  ;;  %p5108_p8 = pnand %p5107_p7, %p5101_p4 }
 0x8a2   :  { %v2982_v17 = vpack.c.bf16 %v2960_v53, %v2959_v26 }
 0x8a3   :  { %v2981_v52 = vpack.c.bf16 %v2958_v20, %v2957_v57  ;;  %v4353_v61 = vpop.f32.mrb[116].mxu1 }
 0x8a4   :  { %v2903_v7 = vadd.f32 %v4353_v61, %v6330_v15  ;;  %v2894_v43 = vpop.f32.mrb[117].mxu1 }
 0x8a5   :  { %v2895_v29 = vadd.f32 %v6330_v15, %v2894_v43  ;;  %v4354_v48 = vpop.f32.mrb[118].mxu1  ;;  %4395 = vmatprep.mubr.bf16.mxu1 %v2981_v52 }
 0x8a6   :  { %v2906_v16 = vadd.f32 %v4354_v48, %v6330_v15  ;;  %v2897_v23 = vpop.f32.mrb[119].mxu1  ;;  %4396 = vmatmul.mubr.bf16.gmra.mrb[144].mxu1 %v2982_v17  ;;  %v2963_v11 = vmax.f32 %v2903_v7, 0.0 }
 0x8a7   :  { %v2898_v21 = vadd.f32 %v6330_v15, %v2897_v23  ;;  %v2961_v44 = vmax.f32 %v2895_v29, 0.0 }
 0x8a8   :  { %v2964_v24 = vmax.f32 %v2906_v16, 0.0 }
 0x8a9   :  { %v2962_v51 = vmax.f32 %v2898_v21, 0.0 }
 0x8aa   :  { %v2984_v33 = vpack.c.bf16 %v2964_v24, %v2963_v11 }
 0x8ab   :  { %v2983_v4 = vpack.c.bf16 %v2962_v51, %v2961_v44  ;;  %v4357_v14 = vpop.f32.mrb[120].mxu1 }
 0x8ac   :  { %v2919_v38 = vadd.f32 %v4357_v14, %v6330_v15  ;;  %v2910_v0 = vpop.f32.mrb[121].mxu1 }
 0x8ad   :  { %v2911_v35 = vadd.f32 %v6330_v15, %v2910_v0  ;;  %v4358_v32 = vpop.f32.mrb[122].mxu1  ;;  %4399 = vmatprep.mubr.bf16.mxu1 %v2983_v4 }
 0x8ae   :  { %v2922_v28 = vadd.f32 %v4358_v32, %v6330_v15  ;;  %v2913_v19 = vpop.f32.mrb[123].mxu1  ;;  %4400 = vmatmul.mubr.bf16.gmra.mrb[148].mxu1 %v2984_v33  ;;  %v2967_v30 = vmax.f32 %v2919_v38, 0.0 }
 0x8af   :  { %v2914_v31 = vadd.f32 %v6330_v15, %v2913_v19  ;;  %v2965_v13 = vmax.f32 %v2911_v35, 0.0 }
 0x8b0   :  { %v2968_v50 = vmax.f32 %v2922_v28, 0.0 }
 0x8b1   :  { %v2966_v25 = vmax.f32 %v2914_v31, 0.0 }
 0x8b2   :  { %v2986_v5 = vpack.c.bf16 %v2968_v50, %v2967_v30 }
 0x8b3   :  { %v2985_v36 = vpack.c.bf16 %v2966_v25, %v2965_v13  ;;  %v4361_v34 = vpop.f32.mrb[124].mxu1 }
 0x8b4   :  { %v2935_v41 = vadd.f32 %v4361_v34, %v6330_v15  ;;  %v2926_v8 = vpop.f32.mrb[125].mxu1 }
 0x8b5   :  { %v2927_v27 = vadd.f32 %v6330_v15, %v2926_v8  ;;  %v4362_v22 = vpop.f32.mrb[126].mxu1  ;;  %4403 = vmatprep.mubr.bf16.mxu1 %v2985_v36 }
 0x8b6   :  { %v2938_v2 = vadd.f32 %v4362_v22, %v6330_v15  ;;  %v2929_v6 = vpop.f32.mrb[127].mxu1  ;;  %4404 = vmatmul.mubr.bf16.gmra.mrb[152].mxu1 %v2986_v5  ;;  %v2971_v18 = vmax.f32 %v2935_v41, 0.0 }
 0x8b7   :  { %v2930_v42 = vadd.f32 %v6330_v15, %v2929_v6  ;;  %v2969_v58 = vmax.f32 %v2927_v27, 0.0 }
 0x8b8   :  { %v2972_v39 = vmax.f32 %v2938_v2, 0.0 }
 0x8b9   :  { %v2970_v60 = vmax.f32 %v2930_v42, 0.0 }
 0x8ba   :  { %v2988_v45 = vpack.c.bf16 %v2972_v39, %v2971_v18 }
 0x8bb   :  { %v2987_v59 = vpack.c.bf16 %v2970_v60, %v2969_v58 }
 0x8bd   :  { %4407 = vmatprep.mubr.bf16.mxu1 %v2987_v59 }
 0x8be   :  { %4408 = vmatmul.mubr.bf16.gmra.mrb[156].mxu1 %v2988_v45 }
 0x959   :  { %v4381_v49 = vpop.f32.mrb[128].mxu1 }
 0x95a   :  { %v3103_v15 = vadd.f32 %v4381_v49, %v6369_v56  ;;  %v3094_v63 = vpop.f32.mrb[129].mxu1 }
 0x95b   :  { %v3095_v55 = vadd.f32 %v6369_v56, %v3094_v63  ;;  %v4382_v47 = vpop.f32.mrb[130].mxu1 }
 0x95c   :  { %v3106_v9 = vadd.f32 %v4382_v47, %v6369_v56  ;;  %v3097_v10 = vpop.f32.mrb[131].mxu1  ;;  %v6377_v54 = vsel %vm3223_vm0, %v3103_v15, -1e+30 }
 0x95d   :  { %v3098_v62 = vadd.f32 %v6369_v56, %v3097_v10  ;;  %3260 = vmax.xlane.f32.xlu1 %v6377_v54  ;;  %v6383_v37 = vsel %vm3223_vm0, %v3095_v55, -1e+30 }
 0x95e   :  { %3256 = vmax.xlane.f32.xlu0 %v6383_v37  ;;  %v6388_v46 = vsel %vm3223_vm0, %v3106_v9, -1e+30 }
 0x95f   :  { %v6393_v3 = vsel %vm3223_vm0, %v3098_v62, -1e+30 }
 0x961   :  { %3262 = vmax.xlane.f32.xlu1 %v6388_v46  ;;  %v4385_v1 = vpop.f32.mrb[132].mxu1 }
 0x962   :  { %v3119_v26 = vadd.f32 %v4385_v1, %v6369_v56  ;;  %v3110_v53 = vpop.f32.mrb[133].mxu1  ;;  %3258 = vmax.xlane.f32.xlu0 %v6393_v3 }
 0x963   :  { %v4386_v57 = vpop.f32.mrb[134].mxu1  ;;  %v3111_v61 = vadd.f32 %v6369_v56, %v3110_v53 }
 0x964   :  { %v3122_v20 = vadd.f32 %v4386_v57, %v6369_v56  ;;  %v3113_v17 = vpop.f32.mrb[135].mxu1  ;;  %v6400_v52 = vsel %vm3223_vm0, %v3119_v26, -1e+30 }
 0x965   :  { %v3114_v7 = vadd.f32 %v6369_v56, %v3113_v17  ;;  %v6412_v48 = vsel %vm3223_vm0, %v3111_v61, -1e+30 }
 0x966   :  { %3268 = vmax.xlane.f32.xlu0 %v6400_v52  ;;  %v6407_v43 = vsel %vm3223_vm0, %v3122_v20, -1e+30 }
 0x967   :  { %3270 = vmax.xlane.f32.xlu1 %v6407_v43  ;;  %v6418_v21 = vsel %vm3223_vm0, %v3114_v7, -1e+30 }
 0x969   :  { %v4389_v29 = vpop.f32.mrb[136].mxu1 }
 0x96a   :  { %v3135_v16 = vadd.f32 %v4389_v29, %v6369_v56  ;;  %v3126_v23 = vpop.f32.mrb[137].mxu1  ;;  %3264 = vmax.xlane.f32.xlu0 %v6412_v48 }
 0x96b   :  { %v4390_v11 = vpop.f32.mrb[138].mxu1  ;;  %3266 = vmax.xlane.f32.xlu1 %v6418_v21  ;;  %v3127_v33 = vadd.f32 %v6369_v56, %v3126_v23 }
 0x96c   :  { %v3138_v24 = vadd.f32 %v4390_v11, %v6369_v56  ;;  %v3129_v44 = vpop.f32.mrb[139].mxu1  ;;  %v6424_v51 = vsel %vm3223_vm0, %v3135_v16, -1e+30 }
 0x96d   :  { %v3130_v4 = vadd.f32 %v6369_v56, %v3129_v44  ;;  %v6436_v0 = vsel %vm3223_vm0, %v3127_v33, -1e+30 }
 0x96e   :  { %3276 = vmax.xlane.f32.xlu0 %v6424_v51  ;;  %v6431_v14 = vsel %vm3223_vm0, %v3138_v24, -1e+30 }
 0x96f   :  { %3278 = vmax.xlane.f32.xlu1 %v6431_v14  ;;  %v6442_v28 = vsel %vm3223_vm0, %v3130_v4, -1e+30 }
 0x971   :  { %v4393_v38 = vpop.f32.mrb[140].mxu1 }
 0x972   :  { %v3151_v35 = vadd.f32 %v4393_v38, %v6369_v56  ;;  %v3142_v32 = vpop.f32.mrb[141].mxu1  ;;  %3272 = vmax.xlane.f32.xlu0 %v6436_v0 }
 0x973   :  { %v4394_v19 = vpop.f32.mrb[142].mxu1  ;;  %3274 = vmax.xlane.f32.xlu1 %v6442_v28  ;;  %v3143_v13 = vadd.f32 %v6369_v56, %v3142_v32 }
 0x974   :  { %v3154_v31 = vadd.f32 %v4394_v19, %v6369_v56  ;;  %v3145_v30 = vpop.f32.mrb[143].mxu1  ;;  %v6448_v50 = vsel %vm3223_vm0, %v3151_v35, -1e+30 }
 0x975   :  { %v3146_v25 = vadd.f32 %v6369_v56, %v3145_v30  ;;  %v6460_v34 = vsel %vm3223_vm0, %v3143_v13, -1e+30 }
 0x976   :  { %3284 = vmax.xlane.f32.xlu0 %v6448_v50  ;;  %v6455_v5 = vsel %vm3223_vm0, %v3154_v31, -1e+30 }
 0x977   :  { %3286 = vmax.xlane.f32.xlu1 %v6455_v5  ;;  %v6466_v27 = vsel %vm3223_vm0, %v3146_v25, -1e+30 }
 0x979   :  { %v4397_v36 = vpop.f32.mrb[144].mxu1 }
 0x97a   :  { %v3167_v41 = vadd.f32 %v4397_v36, %v6369_v56  ;;  %v3158_v8 = vpop.f32.mrb[145].mxu1  ;;  %3280 = vmax.xlane.f32.xlu0 %v6460_v34 }
 0x97b   :  { %v4398_v22 = vpop.f32.mrb[146].mxu1  ;;  %3282 = vmax.xlane.f32.xlu1 %v6466_v27  ;;  %v3159_v18 = vadd.f32 %v6369_v56, %v3158_v8 }
 0x97c   :  { %v3170_v2 = vadd.f32 %v4398_v22, %v6369_v56  ;;  %v3161_v6 = vpop.f32.mrb[147].mxu1  ;;  %v6472_v42 = vsel %vm3223_vm0, %v3167_v41, -1e+30 }
 0x97d   :  { %v3162_v39 = vadd.f32 %v6369_v56, %v3161_v6  ;;  %v6484_v45 = vsel %vm3223_vm0, %v3159_v18, -1e+30 }
 0x97e   :  { %3292 = vmax.xlane.f32.xlu0 %v6472_v42  ;;  %v6479_v58 = vsel %vm3223_vm0, %v3170_v2, -1e+30 }
 0x97f   :  { %3294 = vmax.xlane.f32.xlu1 %v6479_v58  ;;  %v6490_v49 = vsel %vm3223_vm0, %v3162_v39, -1e+30 }
 0x981   :  { %v4401_v60 = vpop.f32.mrb[148].mxu1 }
 0x982   :  { %v3183_v59 = vadd.f32 %v4401_v60, %v6369_v56  ;;  %v3174_v40 = vpop.f32.mrb[149].mxu1  ;;  %3288 = vmax.xlane.f32.xlu0 %v6484_v45 }
 0x983   :  { %v4402_v15 = vpop.f32.mrb[150].mxu1  ;;  %3290 = vmax.xlane.f32.xlu1 %v6490_v49  ;;  %v3175_v9 = vadd.f32 %v6369_v56, %v3174_v40 }
 0x984   :  { %v3186_v63 = vadd.f32 %v4402_v15, %v6369_v56  ;;  %v3177_v55 = vpop.f32.mrb[151].mxu1  ;;  %v6496_v47 = vsel %vm3223_vm0, %v3183_v59, -1e+30 }
 0x985   :  { %v3178_v10 = vadd.f32 %v6369_v56, %v3177_v55  ;;  %v6508_v26 = vsel %vm3223_vm0, %v3175_v9, -1e+30 }
 0x986   :  { %3300 = vmax.xlane.f32.xlu0 %v6496_v47  ;;  %v6503_v62 = vsel %vm3223_vm0, %v3186_v63, -1e+30 }
 0x987   :  { %3302 = vmax.xlane.f32.xlu1 %v6503_v62  ;;  %v6514_v20 = vsel %vm3223_vm0, %v3178_v10, -1e+30 }
 0x989   :  { %v4405_v1 = vpop.f32.mrb[152].mxu1 }
 0x98a   :  { %v3199_v53 = vadd.f32 %v4405_v1, %v6369_v56  ;;  %v3190_v57 = vpop.f32.mrb[153].mxu1  ;;  %3296 = vmax.xlane.f32.xlu0 %v6508_v26 }
 0x98b   :  { %v4406_v17 = vpop.f32.mrb[154].mxu1  ;;  %3298 = vmax.xlane.f32.xlu1 %v6514_v20  ;;  %v3191_v16 = vadd.f32 %v6369_v56, %v3190_v57 }
 0x98c   :  { %v3202_v61 = vadd.f32 %v4406_v17, %v6369_v56  ;;  %v3193_v7 = vpop.f32.mrb[155].mxu1  ;;  %v6520_v29 = vsel %vm3223_vm0, %v3199_v53, -1e+30 }
 0x98d   :  { %v3194_v23 = vadd.f32 %v6369_v56, %v3193_v7  ;;  %v6532_v44 = vsel %vm3223_vm0, %v3191_v16, -1e+30 }
 0x98e   :  { %3308 = vmax.xlane.f32.xlu0 %v6520_v29  ;;  %v6527_v11 = vsel %vm3223_vm0, %v3202_v61, -1e+30 }
 0x98f   :  { %3310 = vmax.xlane.f32.xlu1 %v6527_v11  ;;  %v6537_v4 = vsel %vm3223_vm0, %v3194_v23, -1e+30 }
 0x991   :  { %v4409_v24 = vpop.f32.mrb[156].mxu1 }
 0x992   :  { %3304 = vmax.xlane.f32.xlu0 %v6532_v44  ;;  %v3206_v33 = vpop.f32.mrb[157].mxu1  ;;  %v3215_v19 = vadd.f32 %v4409_v24, %v6369_v56 }
 0x993   :  { %v3207_v38 = vadd.f32 %v6369_v56, %v3206_v33  ;;  %3306 = vmax.xlane.f32.xlu1 %v6537_v4  ;;  %v4410_v35 = vpop.f32.mrb[158].mxu1 }
 0x994   :  { %v3209_v32 = vpop.f32.mrb[159].mxu1  ;;  %v3218_v13 = vadd.f32 %v4410_v35, %v6369_v56  ;;  %v6556_v36 = vsel %vm3223_vm0, %v3215_v19, -1e+30 }
 0x995   :  { %v3210_v31 = vadd.f32 %v6369_v56, %v3209_v32  ;;  %v6545_v30 = vsel %vm3223_vm0, %v3207_v38, -1e+30 }
 0x996   :  { %3312 = vmax.xlane.f32.xlu0 %v6545_v30  ;;  %v6561_v41 = vsel %vm3223_vm0, %v3218_v13, -1e+30 }
 0x997   :  { %v6551_v25 = vsel %vm3223_vm0, %v3210_v31, -1e+30 }
 0x998   :  { %3314 = vmax.xlane.f32.xlu1 %v6551_v25 }
 0x99a   :  { %3316 = vmax.xlane.f32.xlu0 %v6556_v36 }
 0x99c   :  { %3318 = vmax.xlane.f32.xlu1 %v6561_v41 }
 0x9ea   :  { %v3261_v8 = vpop.xlane.xlu1 %3260 }
 0x9eb   :  { %v3322_v56 = vsub.f32 %v6377_v54, %v3261_v8  ;;  %v3257_v22 = vpop.xlane.xlu0 %3256 }
 0x9ec   :  { %v3320_v2 = vsub.f32 %v6383_v37, %v3257_v22 }
 0x9ed   :  { %v3356_v6 = vmul.f32 1.442695, %v3322_v56 }
 0x9ee   :  { %v3352_v18 = vmul.f32 1.442695, %v3320_v2  ;;  %v3263_v39 = vpop.xlane.xlu1 %3262 }
 0x9ef   :  { %4546 = vpow2.f32 %v3356_v6  ;;  %v3323_v60 = vsub.f32 %v6388_v46, %v3263_v39  ;;  %v3259_v59 = vpop.xlane.xlu0 %3258 }
 0x9f0   :  { %v3321_v40 = vsub.f32 %v6393_v3, %v3259_v59  ;;  %4548 = vpow2.f32 %v3352_v18 }
 0x9f1   :  { %v3358_v12 = vmul.f32 1.442695, %v3323_v60 }
 0x9f2   :  { %v3354_v15 = vmul.f32 1.442695, %v3321_v40 }
 0x9f3   :  { %4550 = vpow2.f32 %v3358_v12  ;;  %v3269_v63 = vpop.xlane.xlu0 %3268 }
 0x9f4   :  { %v3326_v55 = vsub.f32 %v6400_v52, %v3269_v63  ;;  %v3271_v54 = vpop.xlane.xlu1 %3270  ;;  %4552 = vpow2.f32 %v3354_v15 }
 0x9f5   :  { %v3327_v9 = vsub.f32 %v6407_v43, %v3271_v54 }
 0x9f6   :  { %v3364_v37 = vmul.f32 1.442695, %v3326_v55 }
 0x9f7   :  { %v3366_v10 = vmul.f32 1.442695, %v3327_v9  ;;  %v3265_v1 = vpop.xlane.xlu0 %3264 }
 0x9f8   :  { %4554 = vpow2.f32 %v3364_v37  ;;  %v3324_v46 = vsub.f32 %v6412_v48, %v3265_v1  ;;  %v3267_v53 = vpop.xlane.xlu1 %3266 }
 0x9f9   :  { %v6571_v57 = vpop.eup %4546  ;;  %v3325_v3 = vsub.f32 %v6418_v21, %v3267_v53  ;;  %4556 = vpow2.f32 %v3366_v10 }
 0x9fa   :  { %v3360_v17 = vmul.f32 1.442695, %v3324_v46  ;;  %3420 = vadd.xlane.f32.xlu0 %v6571_v57  ;;  %v6575_v7 = vpop.eup %4548 }
 0x9fb   :  { %v3362_v52 = vmul.f32 1.442695, %v3325_v3  ;;  %v3277_v61 = vpop.xlane.xlu0 %3276 }
 0x9fc   :  { %4558 = vpow2.f32 %v3360_v17  ;;  %v3330_v43 = vsub.f32 %v6424_v51, %v3277_v61  ;;  %v3279_v16 = vpop.xlane.xlu1 %3278 }
 0x9fd   :  { %v6578_v23 = vpop.eup %4550  ;;  %v3331_v48 = vsub.f32 %v6431_v14, %v3279_v16  ;;  %4560 = vpow2.f32 %v3362_v52 }
 0x9fe   :  { %v3372_v24 = vmul.f32 1.442695, %v3330_v43  ;;  %3422 = vadd.xlane.f32.xlu1 %v6578_v23  ;;  %3416 = vadd.xlane.f32.xlu0 %v6575_v7  ;;  %v6584_v32 = vpop.eup %4552 }
 0x9ff   :  { %v3374_v21 = vmul.f32 1.442695, %v3331_v48  ;;  %v3273_v33 = vpop.xlane.xlu0 %3272 }
 0xa00   :  { %4562 = vpow2.f32 %v3372_v24  ;;  %v3328_v38 = vsub.f32 %v6436_v0, %v3273_v33  ;;  %v3275_v35 = vpop.xlane.xlu1 %3274 }
 0xa01   :  { %v3329_v51 = vsub.f32 %v6442_v28, %v3275_v35  ;;  %4564 = vpow2.f32 %v3374_v21 }
 0xa02   :  { %v6587_v19 = vpop.eup %4554  ;;  %v3368_v31 = vmul.f32 1.442695, %v3328_v38  ;;  %3418 = vadd.xlane.f32.xlu1 %v6584_v32 }
 0xa03   :  { %v3370_v14 = vmul.f32 1.442695, %v3329_v51  ;;  %v3285_v13 = vpop.xlane.xlu0 %3284  ;;  %3428 = vadd.xlane.f32.xlu0 %v6587_v19  ;;  %v6592_v0 = vpop.eup %4556 }
 0xa04   :  { %4566 = vpow2.f32 %v3368_v31  ;;  %v3334_v8 = vsub.f32 %v6448_v50, %v3285_v13  ;;  %v3287_v56 = vpop.xlane.xlu1 %3286 }
 0xa05   :  { %v3335_v22 = vsub.f32 %v6455_v5, %v3287_v56  ;;  %4568 = vpow2.f32 %v3370_v14 }
 0xa06   :  { %v6595_v2 = vpop.eup %4558  ;;  %v3380_v28 = vmul.f32 1.442695, %v3334_v8  ;;  %3430 = vadd.xlane.f32.xlu1 %v6592_v0 }
 0xa07   :  { %v3382_v6 = vmul.f32 1.442695, %v3335_v22  ;;  %v3281_v18 = vpop.xlane.xlu0 %3280  ;;  %3424 = vadd.xlane.f32.xlu0 %v6595_v2  ;;  %v6600_v50 = vpop.eup %4560 }
 0xa08   :  { %4570 = vpow2.f32 %v3380_v28  ;;  %v3332_v39 = vsub.f32 %v6460_v34, %v3281_v18  ;;  %v3283_v60 = vpop.xlane.xlu1 %3282 }
 0xa09   :  { %v3333_v59 = vsub.f32 %v6466_v27, %v3283_v60  ;;  %4572 = vpow2.f32 %v3382_v6 }
 0xa0a   :  { %v6603_v40 = vpop.eup %4562  ;;  %v3376_v5 = vmul.f32 1.442695, %v3332_v39  ;;  %3426 = vadd.xlane.f32.xlu1 %v6600_v50 }
 0xa0b   :  { %v3378_v12 = vmul.f32 1.442695, %v3333_v59  ;;  %v3293_v15 = vpop.xlane.xlu0 %3292  ;;  %3436 = vadd.xlane.f32.xlu0 %v6603_v40  ;;  %v6608_v34 = vpop.eup %4564 }
 0xa0c   :  { %4574 = vpow2.f32 %v3376_v5  ;;  %v3338_v63 = vsub.f32 %v6472_v42, %v3293_v15  ;;  %v3295_v55 = vpop.xlane.xlu1 %3294 }
 0xa0d   :  { %v3339_v54 = vsub.f32 %v6479_v58, %v3295_v55  ;;  %4576 = vpow2.f32 %v3378_v12 }
 0xa0e   :  { %v6611_v9 = vpop.eup %4566  ;;  %v3388_v27 = vmul.f32 1.442695, %v3338_v63  ;;  %3438 = vadd.xlane.f32.xlu1 %v6608_v34 }
 0xa0f   :  { %v3390_v37 = vmul.f32 1.442695, %v3339_v54  ;;  %v3289_v10 = vpop.xlane.xlu0 %3288  ;;  %3432 = vadd.xlane.f32.xlu0 %v6611_v9  ;;  %v6616_v42 = vpop.eup %4568 }
 0xa10   :  { %4578 = vpow2.f32 %v3388_v27  ;;  %v3336_v1 = vsub.f32 %v6484_v45, %v3289_v10  ;;  %v3291_v46 = vpop.xlane.xlu1 %3290 }
 0xa11   :  { %v3337_v53 = vsub.f32 %v6490_v49, %v3291_v46  ;;  %4580 = vpow2.f32 %v3390_v37 }
 0xa12   :  { %v6619_v3 = vpop.eup %4570  ;;  %v3384_v58 = vmul.f32 1.442695, %v3336_v1  ;;  %3434 = vadd.xlane.f32.xlu1 %v6616_v42 }
 0xa13   :  { %v3386_v17 = vmul.f32 1.442695, %v3337_v53  ;;  %v3301_v52 = vpop.xlane.xlu0 %3300  ;;  %3444 = vadd.xlane.f32.xlu0 %v6619_v3  ;;  %v6624_v45 = vpop.eup %4572 }
 0xa14   :  { %4582 = vpow2.f32 %v3384_v58  ;;  %v3342_v61 = vsub.f32 %v6496_v47, %v3301_v52  ;;  %v3303_v43 = vpop.xlane.xlu1 %3302 }
 0xa15   :  { %v3343_v16 = vsub.f32 %v6503_v62, %v3303_v43  ;;  %4584 = vpow2.f32 %v3386_v17 }
 0xa16   :  { %v6627_v48 = vpop.eup %4574  ;;  %v3396_v49 = vmul.f32 1.442695, %v3342_v61  ;;  %3446 = vadd.xlane.f32.xlu1 %v6624_v45 }
 0xa17   :  { %v3398_v24 = vmul.f32 1.442695, %v3343_v16  ;;  %v3297_v21 = vpop.xlane.xlu0 %3296  ;;  %3440 = vadd.xlane.f32.xlu0 %v6627_v48  ;;  %v6632_v47 = vpop.eup %4576 }
 0xa18   :  { %4586 = vpow2.f32 %v3396_v49  ;;  %v3340_v33 = vsub.f32 %v6508_v26, %v3297_v21  ;;  %v3299_v38 = vpop.xlane.xlu1 %3298 }
 0xa19   :  { %v3341_v35 = vsub.f32 %v6514_v20, %v3299_v38  ;;  %4588 = vpow2.f32 %v3398_v24 }
 0xa1a   :  { %v6635_v51 = vpop.eup %4578  ;;  %v3392_v62 = vmul.f32 1.442695, %v3340_v33  ;;  %3442 = vadd.xlane.f32.xlu1 %v6632_v47 }
 0xa1b   :  { %v3394_v31 = vmul.f32 1.442695, %v3341_v35  ;;  %v3309_v14 = vpop.xlane.xlu0 %3308  ;;  %3452 = vadd.xlane.f32.xlu0 %v6635_v51  ;;  %v6640_v26 = vpop.eup %4580 }
 0xa1c   :  { %4590 = vpow2.f32 %v3392_v62  ;;  %v3346_v13 = vsub.f32 %v6520_v29, %v3309_v14  ;;  %v3311_v8 = vpop.xlane.xlu1 %3310 }
 0xa1d   :  { %v3347_v56 = vsub.f32 %v6527_v11, %v3311_v8  ;;  %4592 = vpow2.f32 %v3394_v31 }
 0xa1e   :  { %v6643_v22 = vpop.eup %4582  ;;  %v3404_v20 = vmul.f32 1.442695, %v3346_v13  ;;  %3454 = vadd.xlane.f32.xlu1 %v6640_v26 }
 0xa1f   :  { %v3406_v28 = vmul.f32 1.442695, %v3347_v56  ;;  %v3305_v6 = vpop.xlane.xlu0 %3304  ;;  %3448 = vadd.xlane.f32.xlu0 %v6643_v22  ;;  %v6648_v29 = vpop.eup %4584 }
 0xa20   :  { %4594 = vpow2.f32 %v3404_v20  ;;  %v3344_v18 = vsub.f32 %v6532_v44, %v3305_v6  ;;  %v3307_v39 = vpop.xlane.xlu1 %3306 }
 0xa21   :  { %v3345_v60 = vsub.f32 %v6537_v4, %v3307_v39  ;;  %4596 = vpow2.f32 %v3406_v28 }
 0xa22   :  { %v6651_v59 = vpop.eup %4586  ;;  %v3400_v11 = vmul.f32 1.442695, %v3344_v18  ;;  %3450 = vadd.xlane.f32.xlu1 %v6648_v29 }
 0xa23   :  { %v3402_v5 = vmul.f32 1.442695, %v3345_v60  ;;  %3460 = vadd.xlane.f32.xlu0 %v6651_v59  ;;  %v3313_v12 = vpop.xlane.xlu0 %3312  ;;  %v6656_v63 = vpop.eup %4588 }
 0xa24   :  { %4598 = vpow2.f32 %v3400_v11  ;;  %v3348_v15 = vsub.f32 %v6545_v30, %v3313_v12 }
 0xa25   :  { %v3315_v44 = vpop.xlane.xlu1 %3314  ;;  %4600 = vpow2.f32 %v3402_v5 }
 0xa26   :  { %v6658_v55 = vpop.eup %4590  ;;  %v3408_v54 = vmul.f32 1.442695, %v3348_v15  ;;  %v3349_v4 = vsub.f32 %v6551_v25, %v3315_v44  ;;  %3462 = vadd.xlane.f32.xlu1 %v6656_v63 }
 0xa27   :  { %3456 = vadd.xlane.f32.xlu0 %v6658_v55  ;;  %v3317_v27 = vpop.xlane.xlu0 %3316  ;;  %v6664_v1 = vpop.eup %4592 }
 0xa28   :  { %4602 = vpow2.f32 %v3408_v54  ;;  %v3410_v37 = vmul.f32 1.442695, %v3349_v4  ;;  %v3350_v10 = vsub.f32 %v6556_v36, %v3317_v27 }
 0xa29   :  { %v3319_v30 = vpop.xlane.xlu1 %3318 }
 0xa2a   :  { %v6666_v46 = vpop.eup %4594  ;;  %4604 = vpow2.f32 %v3410_v37  ;;  %v3412_v53 = vmul.f32 1.442695, %v3350_v10  ;;  %v3351_v58 = vsub.f32 %v6561_v41, %v3319_v30  ;;  %3458 = vadd.xlane.f32.xlu1 %v6664_v1 }
 0xa2b   :  { %3468 = vadd.xlane.f32.xlu0 %v6666_v46  ;;  %v6671_v17 = vpop.eup %4596 }
 0xa2c   :  { %4606 = vpow2.f32 %v3412_v53  ;;  %v3414_v25 = vmul.f32 1.442695, %v3351_v58 }
 0xa2e   :  { %v6673_v52 = vpop.eup %4598  ;;  %4608 = vpow2.f32 %v3414_v25  ;;  %3470 = vadd.xlane.f32.xlu1 %v6671_v17 }
 0xa2f   :  { %3464 = vadd.xlane.f32.xlu0 %v6673_v52  ;;  %v6677_v36 = vpop.eup %4600 }
 0xa32   :  { %v6679_v61 = vpop.eup %4602  ;;  %3466 = vadd.xlane.f32.xlu1 %v6677_v36 }
 0xa33   :  { %3472 = vadd.xlane.f32.xlu0 %v6679_v61 }
 0xa34   :  { %v6683_v41 = vpop.eup %4604 }
 0xa36   :  { %v6685_v43 = vpop.eup %4606  ;;  %3474 = vadd.xlane.f32.xlu1 %v6683_v41 }
 0xa37   :  { %3476 = vadd.xlane.f32.xlu0 %v6685_v43 }
 0xa38   :  { %v6689_v16 = vpop.eup %4608 }
 0xa3a   :  { %3478 = vadd.xlane.f32.xlu1 %v6689_v16 }
 0xa87   :  { %v3421_v49 = vpop.xlane.xlu0 %3420 }
 0xa88   :  { %4610 = vrcp.f32 %v3421_v49 }
 0xa8b   :  { %v3423_v24 = vpop.xlane.xlu1 %3422  ;;  %v3417_v21 = vpop.xlane.xlu0 %3416 }
 0xa8c   :  { %4612 = vrcp.f32 %v3423_v24 }
 0xa8d   :  { %4614 = vrcp.f32 %v3417_v21 }
 0xa8f   :  { %v3419_v33 = vpop.xlane.xlu1 %3418 }
 0xa90   :  { %4616 = vrcp.f32 %v3419_v33  ;;  %v3429_v38 = vpop.xlane.xlu0 %3428 }
 0xa91   :  { %4618 = vrcp.f32 %v3429_v38 }
 0xa92   :  { %v4611_v35 = vpop.eup %4610 }
 0xa93   :  { %v3514_v62 = vmul.f32 %v4611_v35, %v6571_v57  ;;  %v3431_v31 = vpop.xlane.xlu1 %3430 }
 0xa94   :  { %4620 = vrcp.f32 %v3431_v31  ;;  %v3425_v14 = vpop.xlane.xlu0 %3424 }
 0xa95   :  { %3546 = vst [vmem:[#allocation31 + $0x10] sm:$0xff] %v3514_v62  ;;  %4622 = vrcp.f32 %v3425_v14 }
 0xa96   :  { %v4613_v13 = vpop.eup %4612 }
 0xa97   :  { %v4615_v8 = vpop.eup %4614  ;;  %v3515_v56 = vmul.f32 %v4613_v13, %v6578_v23  ;;  %v3427_v20 = vpop.xlane.xlu1 %3426 }
 0xa98   :  { %v3512_v28 = vmul.f32 %v4615_v8, %v6575_v7  ;;  %4624 = vrcp.f32 %v3427_v20  ;;  %v3437_v6 = vpop.xlane.xlu0 %3436 }
 0xa99   :  { %3547 = vst [vmem:[#allocation31 + $0x18] sm:$0xff] %v3515_v56  ;;  %4626 = vrcp.f32 %v3437_v6 }
 0xa9a   :  { %v4617_v18 = vpop.eup %4616  ;;  %3544 = vst [vmem:[#allocation31] sm:$0xff] %v3512_v28 }
 0xa9b   :  { %v4619_v39 = vpop.eup %4618  ;;  %v3513_v57 = vmul.f32 %v4617_v18, %v6584_v32  ;;  %v3439_v60 = vpop.xlane.xlu1 %3438 }
 0xa9c   :  { %v3518_v11 = vmul.f32 %v4619_v39, %v6587_v19  ;;  %4628 = vrcp.f32 %v3439_v60  ;;  %v3433_v5 = vpop.xlane.xlu0 %3432 }
 0xa9d   :  { %3545 = vst [vmem:[#allocation31 + $0x8] sm:$0xff] %v3513_v57  ;;  %4630 = vrcp.f32 %v3433_v5 }
 0xa9e   :  { %v4621_v23 = vpop.eup %4620  ;;  %3550 = vst [vmem:[#allocation31 + $0x30] sm:$0xff] %v3518_v11 }
 0xa9f   :  { %v4623_v12 = vpop.eup %4622  ;;  %v3519_v7 = vmul.f32 %v4621_v23, %v6592_v0  ;;  %v3435_v15 = vpop.xlane.xlu1 %3434 }
 0xaa0   :  { %v3516_v44 = vmul.f32 %v4623_v12, %v6595_v2  ;;  %4632 = vrcp.f32 %v3435_v15  ;;  %v3445_v54 = vpop.xlane.xlu0 %3444 }
 0xaa1   :  { %3551 = vst [vmem:[#allocation31 + $0x38] sm:$0xff] %v3519_v7  ;;  %4634 = vrcp.f32 %v3445_v54 }
 0xaa2   :  { %v4625_v32 = vpop.eup %4624  ;;  %3548 = vst [vmem:[#allocation31 + $0x20] sm:$0xff] %v3516_v44 }
 0xaa3   :  { %v4627_v4 = vpop.eup %4626  ;;  %v3517_v19 = vmul.f32 %v4625_v32, %v6600_v50  ;;  %v3447_v27 = vpop.xlane.xlu1 %3446 }
 0xaa4   :  { %v3522_v37 = vmul.f32 %v4627_v4, %v6603_v40  ;;  %4636 = vrcp.f32 %v3447_v27  ;;  %v3441_v10 = vpop.xlane.xlu0 %3440 }
 0xaa5   :  { %3549 = vst [vmem:[#allocation31 + $0x28] sm:$0xff] %v3517_v19  ;;  %4638 = vrcp.f32 %v3441_v10 }
 0xaa6   :  { %v4629_v0 = vpop.eup %4628  ;;  %3554 = vst [vmem:[#allocation31 + $0x50] sm:$0xff] %v3522_v37 }
 0xaa7   :  { %v4631_v30 = vpop.eup %4630  ;;  %v3523_v2 = vmul.f32 %v4629_v0, %v6608_v34  ;;  %v3443_v53 = vpop.xlane.xlu1 %3442 }
 0xaa8   :  { %v3520_v58 = vmul.f32 %v4631_v30, %v6611_v9  ;;  %4640 = vrcp.f32 %v3443_v53  ;;  %v3453_v25 = vpop.xlane.xlu0 %3452 }
 0xaa9   :  { %3555 = vst [vmem:[#allocation31 + $0x58] sm:$0xff] %v3523_v2  ;;  %4642 = vrcp.f32 %v3453_v25 }
 0xaaa   :  { %v4633_v50 = vpop.eup %4632  ;;  %3552 = vst [vmem:[#allocation31 + $0x40] sm:$0xff] %v3520_v58 }
 0xaab   :  { %v4635_v49 = vpop.eup %4634  ;;  %v3521_v40 = vmul.f32 %v4633_v50, %v6616_v42  ;;  %v3455_v24 = vpop.xlane.xlu1 %3454 }
 0xaac   :  { %v3526_v21 = vmul.f32 %v4635_v49, %v6619_v3  ;;  %4644 = vrcp.f32 %v3455_v24  ;;  %v3449_v33 = vpop.xlane.xlu0 %3448 }
 0xaad   :  { %3553 = vst [vmem:[#allocation31 + $0x48] sm:$0xff] %v3521_v40  ;;  %4646 = vrcp.f32 %v3449_v33 }
 0xaae   :  { %v4637_v34 = vpop.eup %4636  ;;  %3558 = vst [vmem:[#allocation31 + $0x70] sm:$0xff] %v3526_v21 }
 0xaaf   :  { %v4639_v38 = vpop.eup %4638  ;;  %v3527_v9 = vmul.f32 %v4637_v34, %v6624_v45  ;;  %v3451_v35 = vpop.xlane.xlu1 %3450 }
 0xab0   :  { %v3524_v62 = vmul.f32 %v4639_v38, %v6627_v48  ;;  %4648 = vrcp.f32 %v3451_v35  ;;  %v3461_v31 = vpop.xlane.xlu0 %3460 }
 0xab1   :  { %3559 = vst [vmem:[#allocation31 + $0x78] sm:$0xff] %v3527_v9  ;;  %4650 = vrcp.f32 %v3461_v31 }
 0xab2   :  { %v4641_v42 = vpop.eup %4640  ;;  %3556 = vst [vmem:[#allocation31 + $0x60] sm:$0xff] %v3524_v62 }
 0xab3   :  { %v4643_v14 = vpop.eup %4642  ;;  %v3525_v3 = vmul.f32 %v4641_v42, %v6632_v47  ;;  %v3463_v13 = vpop.xlane.xlu1 %3462 }
 0xab4   :  { %v3530_v8 = vmul.f32 %v4643_v14, %v6635_v51  ;;  %4652 = vrcp.f32 %v3463_v13  ;;  %v3457_v56 = vpop.xlane.xlu0 %3456 }
 0xab5   :  { %3557 = vst [vmem:[#allocation31 + $0x68] sm:$0xff] %v3525_v3  ;;  %4654 = vrcp.f32 %v3457_v56 }
 0xab6   :  { %v4645_v45 = vpop.eup %4644  ;;  %3562 = vst [vmem:[#allocation31 + $0x90] sm:$0xff] %v3530_v8 }
 0xab7   :  { %v4647_v20 = vpop.eup %4646  ;;  %v3531_v48 = vmul.f32 %v4645_v45, %v6640_v26  ;;  %v3459_v28 = vpop.xlane.xlu1 %3458 }
 0xab8   :  { %v3528_v6 = vmul.f32 %v4647_v20, %v6643_v22  ;;  %4656 = vrcp.f32 %v3459_v28  ;;  %v3469_v18 = vpop.xlane.xlu0 %3468 }
 0xab9   :  { %3563 = vst [vmem:[#allocation31 + $0x98] sm:$0xff] %v3531_v48  ;;  %4658 = vrcp.f32 %v3469_v18 }
 0xaba   :  { %v4649_v47 = vpop.eup %4648  ;;  %3560 = vst [vmem:[#allocation31 + $0x80] sm:$0xff] %v3528_v6 }
 0xabb   :  { %v4651_v39 = vpop.eup %4650  ;;  %v3529_v51 = vmul.f32 %v4649_v47, %v6648_v29  ;;  %v3471_v57 = vpop.xlane.xlu1 %3470 }
 0xabc   :  { %v3534_v60 = vmul.f32 %v4651_v39, %v6651_v59  ;;  %4660 = vrcp.f32 %v3471_v57  ;;  %v3465_v11 = vpop.xlane.xlu0 %3464 }
 0xabd   :  { %3561 = vst [vmem:[#allocation31 + $0x88] sm:$0xff] %v3529_v51  ;;  %4662 = vrcp.f32 %v3465_v11 }
 0xabe   :  { %v4653_v26 = vpop.eup %4652  ;;  %3566 = vst [vmem:[#allocation31 + $0xb0] sm:$0xff] %v3534_v60 }
 0xabf   :  { %v4655_v5 = vpop.eup %4654  ;;  %v3535_v22 = vmul.f32 %v4653_v26, %v6656_v63  ;;  %v3467_v23 = vpop.xlane.xlu1 %3466 }
 0xac0   :  { %v3532_v12 = vmul.f32 %v4655_v5, %v6658_v55  ;;  %4664 = vrcp.f32 %v3467_v23  ;;  %v3473_v7 = vpop.xlane.xlu0 %3472 }
 0xac1   :  { %3567 = vst [vmem:[#allocation31 + $0xb8] sm:$0xff] %v3535_v22  ;;  %4666 = vrcp.f32 %v3473_v7 }
 0xac2   :  { %v4657_v29 = vpop.eup %4656  ;;  %3564 = vst [vmem:[#allocation31 + $0xa0] sm:$0xff] %v3532_v12 }
 0xac3   :  { %v4659_v15 = vpop.eup %4658  ;;  %v3533_v59 = vmul.f32 %v4657_v29, %v6664_v1  ;;  %v3475_v44 = vpop.xlane.xlu1 %3474 }
 0xac4   :  { %v3538_v54 = vmul.f32 %v4659_v15, %v6666_v46  ;;  %4668 = vrcp.f32 %v3475_v44  ;;  %v3477_v32 = vpop.xlane.xlu0 %3476 }
 0xac5   :  { %3565 = vst [vmem:[#allocation31 + $0xa8] sm:$0xff] %v3533_v59  ;;  %4670 = vrcp.f32 %v3477_v32 }
 0xac6   :  { %v4661_v63 = vpop.eup %4660  ;;  %3570 = vst [vmem:[#allocation31 + $0xd0] sm:$0xff] %v3538_v54 }
 0xac7   :  { %v4663_v4 = vpop.eup %4662  ;;  %v3539_v55 = vmul.f32 %v4661_v63, %v6671_v17  ;;  %v3479_v19 = vpop.xlane.xlu1 %3478 }
 0xac8   :  { %v3536_v27 = vmul.f32 %v4663_v4, %v6673_v52  ;;  %4672 = vrcp.f32 %v3479_v19 }
 0xac9   :  { %3571 = vst [vmem:[#allocation31 + $0xd8] sm:$0xff] %v3539_v55 }
 0xaca   :  { %v4665_v37 = vpop.eup %4664  ;;  %3568 = vst [vmem:[#allocation31 + $0xc0] sm:$0xff] %v3536_v27 }
 0xacb   :  { %v4667_v1 = vpop.eup %4666  ;;  %v3537_v10 = vmul.f32 %v4665_v37, %v6677_v36 }
 0xacc   :  { %v3540_v46 = vmul.f32 %v4667_v1, %v6679_v61 }
 0xacd   :  { %3569 = vst [vmem:[#allocation31 + $0xc8] sm:$0xff] %v3537_v10 }
 0xace   :  { %v4669_v0 = vpop.eup %4668  ;;  %3572 = vst [vmem:[#allocation31 + $0xe0] sm:$0xff] %v3540_v46 }
 0xacf   :  { %v4671_v30 = vpop.eup %4670  ;;  %v3541_v2 = vmul.f32 %v4669_v0, %v6683_v41 }
 0xad0   :  { %v3542_v17 = vmul.f32 %v4671_v30, %v6685_v43 }
 0xad1   :  { %3573 = vst [vmem:[#allocation31 + $0xe8] sm:$0xff] %v3541_v2 }
 0xad2   :  { %v4673_v52 = vpop.eup %4672  ;;  %3574 = vst [vmem:[#allocation31 + $0xf0] sm:$0xff] %v3542_v17 }
 0xad3   :  { %v3543_v53 = vmul.f32 %v4673_v52, %v6689_v16 }
 0xad5   :  { %3575 = vst [vmem:[#allocation31 + $0xf8] sm:$0xff] %v3543_v53 }
 0xad6   :  { %5111 = shalt.err (!%p5108_p8)
}
 0xad7   :  { %s6982_s24 = sld [smem:[#allocation71_spill]] }
 0xadd   :  { %s5112_s30 = scalar_lea.hbm %s6982_s24, 4096 }
 0xade   :  { %p5113_p9 = scmp.ne.s32.totalorder %s6982_s24, %s5112_s30  ;;  %p5116_p10 = scmp.lt.u32.totalorder %s5112_s30, %s6982_s24 }
 0xae0   :  { %p5118_p11 = pnand %p5116_p10, %p5113_p9 }
 0xae2   :  { %5121 = shalt.err (!%p5118_p11)
}
 0xae3   :  { %3587 = dma.vmem_to_hbm [thread:$0]  %s3582_s1, 4096, %s6982_s24, [#allocation4], %s6870_s4, %s6870_s4, %s6869_s15  }
 0xae4   :  { %5142 = dma.done.wait [#allocation4], 4096  }
 0xae5   :  { %5143 = vsyncadd [#allocation4], 4294963200 }
 0xae6   :  { %3591 = vsyncpa [#allocation3], 1 }
 0xae7   :  { %3592 = vsyncpa [#allocation6], 1 }
 0xae8   :  { %3593 = vsyncpa [#allocation9], 1 }
 0xae9   :  { %3594 = vsyncpa [#allocation12], 1 }
 0xaea   :  { %3595 = vsyncpa [#allocation15], 1 }
 0xaeb   :  { %3596 = vsyncpa [#allocation18], 1 }
 0xaec   :  { %3597 = vsyncpa [#allocation21], 1 }
 0xaed   :  { %3598 = vsyncpa [#allocation24], 1 }
 0xaee   :  { %3599 = vsyncpa [#allocation27], 1 }
 0xaef   :  { %3600 = vsyncpa [#allocation30], 1 }
 0xaf0   :  { %3601 = vsyncpa [#allocation4], 1 }

</bundles_post_ra>
